<compile_context>
chip_gen: v6e
topology: v6e:2x2x1
jax: 0.10.0
libtpu: 0.0.40
codegen_flags: <defaults>
</compile_context>

<pallas_src>
import jax
import jax.numpy as jnp
from jax import lax
from jax.experimental import pallas as pl
from jax.experimental.pallas import tpu as pltpu


# ---------------------------------------------------------------------------
# In-kernel helper: 3x3 "same" conv as a single K = 9*C GEMM, + bias + ReLU
# ---------------------------------------------------------------------------
def _conv3x3_relu_gemm(xp, w_col, b_row):
    """xp:    (H+2, W+2, C) zero-padded activation (compute dtype), VMEM value
       w_col: (9*C, Cout)   weights, tap-major then channel
       b_row: (1, Cout)     f32 bias
       returns ReLU(conv3x3(xp) + b) as (H*W, Cout) f32."""
    Hp, Wp, C = xp.shape
    H, W = Hp - 2, Wp - 2
    # Nine shifted tap views of the VMEM tile, concatenated along the channel (lane)
    # axis -> one (H*W, 9*C) matrix -> a single MXU GEMM with contraction depth 9*C.
    taps = [xp[kh:kh + H, kw:kw + W, :] for kh in range(3) for kw in range(3)]
    x_col = jnp.concatenate(taps, axis=-1).reshape(H * W, 9 * C)
    acc = jnp.dot(x_col, w_col, preferred_element_type=jnp.float32)
    return jnp.maximum(acc + b_row, 0.0)  # bias + ReLU in f32


# ---------------------------------------------------------------------------
# Fused ConvBlock kernel: one image (grid step) per invocation
# ---------------------------------------------------------------------------
def conv_block_kernel(x_ref, w1_ref, b1_ref, w2_ref, b2_ref, o_ref, xp_s, y1p_s):
    # x_ref : (1, H, W, Cin)    dense NHWC input tile (compute dtype)
    # w1_ref: (9*Cin,  Cmid)    b1_ref: (1, Cmid) f32
    # w2_ref: (9*Cmid, Cout)    b2_ref: (1, Cout) f32
    # o_ref : (1, Ho, Wo*Cout)  pooled output tile (f32), lane-dense
    # xp_s  : (H+2, W+2, Cin)   VMEM scratch: zero-padded input
    # y1p_s : (H+2, W+2, Cmid)  VMEM scratch: zero-padded conv1 activation
    _, H, W, Cin = x_ref.shape
    Cmid = y1p_s.shape[-1]
    Ho = o_ref.shape[1]
    Wo = W // 2
    Cout = o_ref.shape[2] // Wo

    # ---- conv1 + ReLU -------------------------------------------------------
    # "same" padding needs a true zero halo.  Scratch persists across grid steps, so
    # rebuild the halo every step (interior is fully overwritten each step anyway).
    xp_s[...] = jnp.zeros(xp_s.shape, xp_s.dtype)
    xp_s[1:H + 1, 1:W + 1, :] = x_ref[0]
    y1 = _conv3x3_relu_gemm(xp_s[...], w1_ref[...], b1_ref[...])      # (H*W, Cmid) f32

    # ---- conv2 + ReLU -------------------------------------------------------
    # conv2 pads the *post-ReLU* activation, so its halo must be true zeros
    # (not ReLU(b1)).  Zero the padded scratch, then write the interior.
    y1p_s[...] = jnp.zeros(y1p_s.shape, y1p_s.dtype)
    y1p_s[1:H + 1, 1:W + 1, :] = y1.reshape(H, W, Cmid).astype(y1p_s.dtype)
    y2 = _conv3x3_relu_gemm(y1p_s[...], w2_ref[...], b2_ref[...])     # (H*W, Cout) f32

    # ---- 2x2 max pool, stride 2 --------------------------------------------
    p = y2.reshape(Ho, 2, Wo, 2, Cout)
    p = jnp.max(p, axis=3)          # reduce the W-window pair
    p = jnp.max(p, axis=1)          # reduce the H-window pair -> (Ho, Wo, Cout)
    o_ref[0] = p.reshape(Ho, Wo * Cout).astype(o_ref.dtype)


# ---------------------------------------------------------------------------
# Wrapper: NCHW in / NCHW out, PyTorch OIHW weights
# ---------------------------------------------------------------------------
def conv_block_forward(x_nchw, w1_oihw, b1, w2_oihw, b2, *, compute_dtype=jnp.bfloat16):
    # TODO(synk): `checkpoint=True` in the reference only changes backward-pass
    # recomputation; forward semantics implemented here are identical.
    # NOTE: `pool` is assumed to be nn.MaxPool2d(2) (2x2 window, stride 2).
    N, Cin, H, W = x_nchw.shape
    Cmid = w1_oihw.shape[0]
    Cout = w2_oihw.shape[0]
    assert w1_oihw.shape == (Cmid, Cin, 3, 3) and w2_oihw.shape == (Cout, Cmid, 3, 3)
    assert H % 2 == 0 and W % 2 == 0, "2x2/stride-2 pool requires even H, W"
    Ho, Wo = H // 2, W // 2

    # Layout glue (plain XLA, fuses into single copies): NCHW -> NHWC + cast to the
    # bf16 MXU compute dtype; OIHW -> (kh, kw, ci, co)-ordered GEMM weight columns.
    x = jnp.transpose(x_nchw, (0, 2, 3, 1)).astype(compute_dtype)         # (N,H,W,Cin)
    w1_col = jnp.transpose(w1_oihw, (2, 3, 1, 0)).reshape(9 * Cin, Cmid)
    w2_col = jnp.transpose(w2_oihw, (2, 3, 1, 0)).reshape(9 * Cmid, Cout)
    w1_col = w1_col.astype(compute_dtype)
    w2_col = w2_col.astype(compute_dtype)
    b1_row = b1.reshape(1, Cmid).astype(jnp.float32)
    b2_row = b2.reshape(1, Cout).astype(jnp.float32)

    out_flat = pl.pallas_call(
        conv_block_kernel,
        out_shape=jax.ShapeDtypeStruct((N, Ho, Wo * Cout), jnp.float32),
        grid_spec=pltpu.PrefetchScalarGridSpec(
            num_scalar_prefetch=0,
            grid=(N,),  # one image per step; batch shards across v7x's 2 TensorCores
            in_specs=[
                pl.BlockSpec((1, H, W, Cin), lambda n: (n, 0, 0, 0)),
                pl.BlockSpec((9 * Cin, Cmid), lambda n: (0, 0)),   # grid-invariant
                pl.BlockSpec((1, Cmid), lambda n: (0, 0)),
                pl.BlockSpec((9 * Cmid, Cout), lambda n: (0, 0)),
                pl.BlockSpec((1, Cout), lambda n: (0, 0)),
            ],
            out_specs=pl.BlockSpec((1, Ho, Wo * Cout), lambda n: (n, 0, 0)),
            scratch_shapes=[
                pltpu.VMEM((H + 2, W + 2, Cin), compute_dtype),    # padded input
                pltpu.VMEM((H + 2, W + 2, Cmid), compute_dtype),   # padded conv1 act
            ],
        ),
        compiler_params=pltpu.CompilerParams(dimension_semantics=("parallel",)),
    )(x, w1_col, b1_row, w2_col, b2_row)

    out_nhwc = out_flat.reshape(N, Ho, Wo, Cout)
    out = jnp.transpose(out_nhwc, (0, 3, 1, 2))                           # NHWC -> NCHW
    return out.astype(x_nchw.dtype)


if __name__ == "__main__":
    key = jax.random.PRNGKey(0)
    kx, kw1, kb1, kw2, kb2 = jax.random.split(key, 5)

    N, Cin, H, W = 2, 4, 16, 16
    Cmid, Cout = 8, 8

    x = jax.random.normal(kx, (N, Cin, H, W), jnp.float32)
    # deterministic params in PyTorch OIHW layout (the wrapper handles conversion)
    w1_oihw = jax.random.normal(kw1, (Cmid, Cin, 3, 3), jnp.float32) * 0.1
    b1 = jax.random.normal(kb1, (Cmid,), jnp.float32) * 0.1
    w2_oihw = jax.random.normal(kw2, (Cout, Cmid, 3, 3), jnp.float32) * 0.1
    b2 = jax.random.normal(kb2, (Cout,), jnp.float32) * 0.1

    out = conv_block_forward(x, w1_oihw, b1, w2_oihw, b2)
    out = jax.block_until_ready(out)

    # reference (plain XLA, f32) to validate semantics
    def ref_forward(x):
        dn = lax.conv_dimension_numbers(x.shape, w1_oihw.shape, ("NCHW", "OIHW", "NCHW"))
        y = lax.conv_general_dilated(x, w1_oihw, (1, 1), ((1, 1), (1, 1)),
                                     dimension_numbers=dn)
        y = jnp.maximum(y + b1[None, :, None, None], 0.0)
        y = lax.conv_general_dilated(y, w2_oihw, (1, 1), ((1, 1), (1, 1)),
                                     dimension_numbers=dn)
        y = jnp.maximum(y + b2[None, :, None, None], 0.0)
        y = lax.reduce_window(y, -jnp.inf, lax.max, (1, 1, 2, 2), (1, 1, 2, 2), "VALID")
        return y

    ref = jax.block_until_ready(ref_forward(x))
    assert out.shape == ref.shape == (N, Cout, H // 2, W // 2), (out.shape, ref.shape)
    # Kernel uses bf16 MXU inputs with f32 accumulation, so compare against the f32
    # XLA reference with a bf16-appropriate tolerance.
    assert bool(jnp.allclose(out, ref, atol=5e-2, rtol=5e-2)), "mismatch vs XLA reference"
    print("KERNEL_OK")
</pallas_src>

<mosaic_0001>
module attributes {stable_mosaic.version = 11 : i64} {
  func.func @conv_block_kernel(%arg0: i32, %arg1: memref<1x16x16x4xbf16, #tpu.memory_space<vmem>>, %arg2: memref<36x8xbf16, #tpu.memory_space<vmem>>, %arg3: memref<1x8xf32, #tpu.memory_space<vmem>>, %arg4: memref<72x8xbf16, #tpu.memory_space<vmem>>, %arg5: memref<1x8xf32, #tpu.memory_space<vmem>>, %arg6: memref<1x8x64xf32, #tpu.memory_space<vmem>>, %arg7: memref<18x18x4xbf16, #tpu.memory_space<vmem>>, %arg8: memref<18x18x8xbf16, #tpu.memory_space<vmem>>) attributes {dimension_semantics = [#tpu.dimension_semantics<parallel>], iteration_bounds = array<i64: 2>, scalar_prefetch = 0 : i64, scratch_operands = 2 : i64, tpu.core_type = #tpu.core_type<tc>, window_params = [{transform_indices = @transform_0, window_bounds = array<i64: 1, 16, 16, 4>}, {pipeline_mode = #tpu.pipeline_mode<synchronous>, transform_indices = @transform_1, window_bounds = array<i64: 36, 8>}, {pipeline_mode = #tpu.pipeline_mode<synchronous>, transform_indices = @transform_2, window_bounds = array<i64: 1, 8>}, {pipeline_mode = #tpu.pipeline_mode<synchronous>, transform_indices = @transform_3, window_bounds = array<i64: 72, 8>}, {pipeline_mode = #tpu.pipeline_mode<synchronous>, transform_indices = @transform_4, window_bounds = array<i64: 1, 8>}, {transform_indices = @transform_5, window_bounds = array<i64: 1, 8, 64>}]} {
    %cst = arith.constant 0.000000e+00 : bf16
    %0 = vector.broadcast %cst : bf16 to vector<18x18x4xbf16>
    %c0 = arith.constant 0 : index
    %c0_0 = arith.constant 0 : index
    %c0_1 = arith.constant 0 : index
    %1 = vector.load %arg7[%c0, %c0_0, %c0_1] : memref<18x18x4xbf16, #tpu.memory_space<vmem>>, vector<18x18x4xbf16>
    tpu.vector_store %arg7[%c0, %c0_0, %c0_1], %0 {strides = array<i32>} : memref<18x18x4xbf16, #tpu.memory_space<vmem>>, vector<18x18x4xbf16>,
    %c0_2 = arith.constant 0 : index
    %c0_3 = arith.constant 0 : index
    %c0_4 = arith.constant 0 : index
    %c0_5 = arith.constant 0 : index
    %2 = vector.load %arg1[%c0_2, %c0_3, %c0_4, %c0_5] : memref<1x16x16x4xbf16, #tpu.memory_space<vmem>>, vector<1x16x16x4xbf16>
    %3 = vector.shape_cast %2 : vector<1x16x16x4xbf16> to vector<16x16x4xbf16>
    %c1 = arith.constant 1 : index
    %c1_6 = arith.constant 1 : index
    %c0_7 = arith.constant 0 : index
    %4 = vector.load %arg7[%c1, %c1_6, %c0_7] : memref<18x18x4xbf16, #tpu.memory_space<vmem>>, vector<16x16x4xbf16>
    tpu.vector_store %arg7[%c1, %c1_6, %c0_7], %3 {strides = array<i32>} : memref<18x18x4xbf16, #tpu.memory_space<vmem>>, vector<16x16x4xbf16>,
    %c0_8 = arith.constant 0 : index
    %c0_9 = arith.constant 0 : index
    %c0_10 = arith.constant 0 : index
    %5 = vector.load %arg7[%c0_8, %c0_9, %c0_10] : memref<18x18x4xbf16, #tpu.memory_space<vmem>>, vector<18x18x4xbf16>
    %c0_11 = arith.constant 0 : index
    %c0_12 = arith.constant 0 : index
    %6 = vector.load %arg2[%c0_11, %c0_12] : memref<36x8xbf16, #tpu.memory_space<vmem>>, vector<36x8xbf16>
    %c0_13 = arith.constant 0 : index
    %c0_14 = arith.constant 0 : index
    %7 = vector.load %arg3[%c0_13, %c0_14] : memref<1x8xf32, #tpu.memory_space<vmem>>, vector<1x8xf32>
    %8 = vector.extract_strided_slice %5 {offsets = [0, 0, 0], sizes = [16, 16, 4], strides = [1, 1, 1]} : vector<18x18x4xbf16> to vector<16x16x4xbf16>
    %9 = vector.extract_strided_slice %5 {offsets = [0, 1, 0], sizes = [16, 16, 4], strides = [1, 1, 1]} : vector<18x18x4xbf16> to vector<16x16x4xbf16>
    %10 = vector.extract_strided_slice %5 {offsets = [0, 2, 0], sizes = [16, 16, 4], strides = [1, 1, 1]} : vector<18x18x4xbf16> to vector<16x16x4xbf16>
    %11 = vector.extract_strided_slice %5 {offsets = [1, 0, 0], sizes = [16, 16, 4], strides = [1, 1, 1]} : vector<18x18x4xbf16> to vector<16x16x4xbf16>
    %12 = vector.extract_strided_slice %5 {offsets = [1, 1, 0], sizes = [16, 16, 4], strides = [1, 1, 1]} : vector<18x18x4xbf16> to vector<16x16x4xbf16>
    %13 = vector.extract_strided_slice %5 {offsets = [1, 2, 0], sizes = [16, 16, 4], strides = [1, 1, 1]} : vector<18x18x4xbf16> to vector<16x16x4xbf16>
    %14 = vector.extract_strided_slice %5 {offsets = [2, 0, 0], sizes = [16, 16, 4], strides = [1, 1, 1]} : vector<18x18x4xbf16> to vector<16x16x4xbf16>
    %15 = vector.extract_strided_slice %5 {offsets = [2, 1, 0], sizes = [16, 16, 4], strides = [1, 1, 1]} : vector<18x18x4xbf16> to vector<16x16x4xbf16>
    %16 = vector.extract_strided_slice %5 {offsets = [2, 2, 0], sizes = [16, 16, 4], strides = [1, 1, 1]} : vector<18x18x4xbf16> to vector<16x16x4xbf16>
    %17 = tpu.concatenate %8, %9, %10, %11, %12, %13, %14, %15, %16 in 2 : vector<16x16x4xbf16>, vector<16x16x4xbf16>, vector<16x16x4xbf16>, vector<16x16x4xbf16>, vector<16x16x4xbf16>, vector<16x16x4xbf16>, vector<16x16x4xbf16>, vector<16x16x4xbf16>, vector<16x16x4xbf16> -> vector<16x16x36xbf16>
    %18 = vector.shape_cast %17 : vector<16x16x36xbf16> to vector<256x36xbf16>
    %cst_15 = arith.constant dense<0.000000e+00> : vector<256x8xf32>
    %19 = tpu.matmul %18, %6, %cst_15 {dimension_numbers = #tpu.dot_dimension_numbers<[1], [0], [0], [1], [0, 0, 1, 1], [], []>} : vector<256x36xbf16>, vector<36x8xbf16>, vector<256x8xf32> -> vector<256x8xf32>
    %20 = vector.broadcast %7 : vector<1x8xf32> to vector<256x8xf32>
    %21 = arith.addf %19, %20 : vector<256x8xf32>
    %cst_16 = arith.constant 0.000000e+00 : f32
    %22 = vector.broadcast %cst_16 : f32 to vector<256x8xf32>
    %23 = arith.maximumf %21, %22 : vector<256x8xf32>
    %cst_17 = arith.constant 0.000000e+00 : bf16
    %24 = vector.broadcast %cst_17 : bf16 to vector<18x18x8xbf16>
    %c0_18 = arith.constant 0 : index
    %c0_19 = arith.constant 0 : index
    %c0_20 = arith.constant 0 : index
    %25 = vector.load %arg8[%c0_18, %c0_19, %c0_20] : memref<18x18x8xbf16, #tpu.memory_space<vmem>>, vector<18x18x8xbf16>
    tpu.vector_store %arg8[%c0_18, %c0_19, %c0_20], %24 {strides = array<i32>} : memref<18x18x8xbf16, #tpu.memory_space<vmem>>, vector<18x18x8xbf16>,
    %26 = vector.shape_cast %23 : vector<256x8xf32> to vector<16x16x8xf32>
    %27 = arith.truncf %26 : vector<16x16x8xf32> to vector<16x16x8xbf16>
    %c1_21 = arith.constant 1 : index
    %c1_22 = arith.constant 1 : index
    %c0_23 = arith.constant 0 : index
    %28 = vector.load %arg8[%c1_21, %c1_22, %c0_23] : memref<18x18x8xbf16, #tpu.memory_space<vmem>>, vector<16x16x8xbf16>
    tpu.vector_store %arg8[%c1_21, %c1_22, %c0_23], %27 {strides = array<i32>} : memref<18x18x8xbf16, #tpu.memory_space<vmem>>, vector<16x16x8xbf16>,
    %c0_24 = arith.constant 0 : index
    %c0_25 = arith.constant 0 : index
    %c0_26 = arith.constant 0 : index
    %29 = vector.load %arg8[%c0_24, %c0_25, %c0_26] : memref<18x18x8xbf16, #tpu.memory_space<vmem>>, vector<18x18x8xbf16>
    %c0_27 = arith.constant 0 : index
    %c0_28 = arith.constant 0 : index
    %30 = vector.load %arg4[%c0_27, %c0_28] : memref<72x8xbf16, #tpu.memory_space<vmem>>, vector<72x8xbf16>
    %c0_29 = arith.constant 0 : index
    %c0_30 = arith.constant 0 : index
    %31 = vector.load %arg5[%c0_29, %c0_30] : memref<1x8xf32, #tpu.memory_space<vmem>>, vector<1x8xf32>
    %32 = vector.extract_strided_slice %29 {offsets = [0, 0, 0], sizes = [16, 16, 8], strides = [1, 1, 1]} : vector<18x18x8xbf16> to vector<16x16x8xbf16>
    %33 = vector.extract_strided_slice %29 {offsets = [0, 1, 0], sizes = [16, 16, 8], strides = [1, 1, 1]} : vector<18x18x8xbf16> to vector<16x16x8xbf16>
    %34 = vector.extract_strided_slice %29 {offsets = [0, 2, 0], sizes = [16, 16, 8], strides = [1, 1, 1]} : vector<18x18x8xbf16> to vector<16x16x8xbf16>
    %35 = vector.extract_strided_slice %29 {offsets = [1, 0, 0], sizes = [16, 16, 8], strides = [1, 1, 1]} : vector<18x18x8xbf16> to vector<16x16x8xbf16>
    %36 = vector.extract_strided_slice %29 {offsets = [1, 1, 0], sizes = [16, 16, 8], strides = [1, 1, 1]} : vector<18x18x8xbf16> to vector<16x16x8xbf16>
    %37 = vector.extract_strided_slice %29 {offsets = [1, 2, 0], sizes = [16, 16, 8], strides = [1, 1, 1]} : vector<18x18x8xbf16> to vector<16x16x8xbf16>
    %38 = vector.extract_strided_slice %29 {offsets = [2, 0, 0], sizes = [16, 16, 8], strides = [1, 1, 1]} : vector<18x18x8xbf16> to vector<16x16x8xbf16>
    %39 = vector.extract_strided_slice %29 {offsets = [2, 1, 0], sizes = [16, 16, 8], strides = [1, 1, 1]} : vector<18x18x8xbf16> to vector<16x16x8xbf16>
    %40 = vector.extract_strided_slice %29 {offsets = [2, 2, 0], sizes = [16, 16, 8], strides = [1, 1, 1]} : vector<18x18x8xbf16> to vector<16x16x8xbf16>
    %41 = tpu.concatenate %32, %33, %34, %35, %36, %37, %38, %39, %40 in 2 : vector<16x16x8xbf16>, vector<16x16x8xbf16>, vector<16x16x8xbf16>, vector<16x16x8xbf16>, vector<16x16x8xbf16>, vector<16x16x8xbf16>, vector<16x16x8xbf16>, vector<16x16x8xbf16>, vector<16x16x8xbf16> -> vector<16x16x72xbf16>
    %42 = vector.shape_cast %41 : vector<16x16x72xbf16> to vector<256x72xbf16>
    %cst_31 = arith.constant dense<0.000000e+00> : vector<256x8xf32>
    %43 = tpu.matmul %42, %30, %cst_31 {dimension_numbers = #tpu.dot_dimension_numbers<[1], [0], [0], [1], [0, 0, 1, 1], [], []>} : vector<256x72xbf16>, vector<72x8xbf16>, vector<256x8xf32> -> vector<256x8xf32>
    %44 = vector.broadcast %31 : vector<1x8xf32> to vector<256x8xf32>
    %45 = arith.addf %43, %44 : vector<256x8xf32>
    %cst_32 = arith.constant 0.000000e+00 : f32
    %46 = vector.broadcast %cst_32 : f32 to vector<256x8xf32>
    %47 = arith.maximumf %45, %46 : vector<256x8xf32>
    %48 = vector.shape_cast %47 : vector<256x8xf32> to vector<8x2x8x2x8xf32>
    %cst_33 = arith.constant dense<0xFF800000> : vector<8x2x8x8xf32>
    %49 = vector.multi_reduction <maximumf>, %48, %cst_33 [3] : vector<8x2x8x2x8xf32> to vector<8x2x8x8xf32>
    %cst_34 = arith.constant dense<0xFF800000> : vector<8x8x8xf32>
    %50 = vector.multi_reduction <maximumf>, %49, %cst_34 [1] : vector<8x2x8x8xf32> to vector<8x8x8xf32>
    %51 = vector.shape_cast %50 : vector<8x8x8xf32> to vector<8x64xf32>
    %c0_35 = arith.constant 0 : index
    %c0_36 = arith.constant 0 : index
    %c0_37 = arith.constant 0 : index
    %52 = vector.load %arg6[%c0_35, %c0_36, %c0_37] : memref<1x8x64xf32, #tpu.memory_space<vmem>>, vector<1x8x64xf32>
    %53 = vector.shape_cast %52 : vector<1x8x64xf32> to vector<8x64xf32>
    %54 = vector.shape_cast %51 : vector<8x64xf32> to vector<1x8x64xf32>
    tpu.vector_store %arg6[%c0_35, %c0_36, %c0_37], %54 {strides = array<i32>} : memref<1x8x64xf32, #tpu.memory_space<vmem>>, vector<1x8x64xf32>,
    return
  }
  func.func @transform_0(%arg0: i32) -> (i32, i32, i32, i32) {
    %c0_i32 = arith.constant 0 : i32
    %c0_i32_0 = arith.constant 0 : i32
    %c0_i32_1 = arith.constant 0 : i32
    %c0_i32_2 = arith.constant 0 : i32
    return %arg0, %c0_i32, %c0_i32_0, %c0_i32_1 : i32, i32, i32, i32
  }
  func.func @transform_1(%arg0: i32) -> (i32, i32) {
    %c0_i32 = arith.constant 0 : i32
    %c0_i32_0 = arith.constant 0 : i32
    %c0_i32_1 = arith.constant 0 : i32
    return %c0_i32, %c0_i32_0 : i32, i32
  }
  func.func @transform_2(%arg0: i32) -> (i32, i32) {
    %c0_i32 = arith.constant 0 : i32
    %c0_i32_0 = arith.constant 0 : i32
    %c0_i32_1 = arith.constant 0 : i32
    return %c0_i32, %c0_i32_0 : i32, i32
  }
  func.func @transform_3(%arg0: i32) -> (i32, i32) {
    %c0_i32 = arith.constant 0 : i32
    %c0_i32_0 = arith.constant 0 : i32
    %c0_i32_1 = arith.constant 0 : i32
    return %c0_i32, %c0_i32_0 : i32, i32
  }
  func.func @transform_4(%arg0: i32) -> (i32, i32) {
    %c0_i32 = arith.constant 0 : i32
    %c0_i32_0 = arith.constant 0 : i32
    %c0_i32_1 = arith.constant 0 : i32
    return %c0_i32, %c0_i32_0 : i32, i32
  }
  func.func @transform_5(%arg0: i32) -> (i32, i32, i32) {
    %c0_i32 = arith.constant 0 : i32
    %c0_i32_0 = arith.constant 0 : i32
    %c0_i32_1 = arith.constant 0 : i32
    return %arg0, %c0_i32, %c0_i32_0 : i32, i32, i32
  }
}

</mosaic_0001>

<bundles_post_ra>
// kernel: tpu_custom_call.1
= control target key start
LH: loop header
LB: loop body
LE: loop exit
PB: predicated region body
PF: predicated region fallthrough
CT: control target
= control target key end

     0   :  { %10 = vsyncpa [#allocation5], 0  ;;  %s9078_s0 = inlined_call_operand.vmem [shape: bf16[2,16,16,4], index: 0, kind: input, shape index: {}]   ;;  %s9079_s1 = inlined_call_operand.vmem [shape: bf16[36,8], index: 1, kind: input, shape index: {}]   ;;  %s9080_s2 = inlined_call_operand.vmem [shape: f32[1,8], index: 2, kind: input, shape index: {}]   ;;  %s9081_s3 = inlined_call_operand.vmem [shape: bf16[72,8], index: 3, kind: input, shape index: {}]   ;;  %s9082_s4 = inlined_call_operand.vmem [shape: f32[1,8], index: 4, kind: input, shape index: {}]   ;;  %s9083_s5 = inlined_call_operand.hbm [shape: f32[2,8,64], index: 5, kind: output, shape index: {}]  }
   0x1   :  { %12 = vsyncpa [#allocation5 + $0x1], 0  ;;  %s6591_s18 = smov 0   ;;  %s6593_s19 = smov 0  }
   0x2   :  { %s6595_s20 = smov 0   ;;  %s6597_s21 = smov 0  }
   0x3 LB: > { %s6612_s22 = sadd.s32 4294967295, %s6543_s21   ;;  %s6019_s23 = sadd.s32 4294967294, %s6543_s21   ;;  %s6543_s21 = sphi %s6597_s21, %s9144_s21   ;;  %s6539_s20 = sphi %s6595_s20, %s9143_s20   ;;  %s6535_s19 = sphi %s6593_s19, %s9142_s19   ;;  %s6531_s18 = sphi %s6591_s18, %s9141_s18  }
   0x4   : > { %s6616_s24 = sadd.s32 1, %s6543_s21   ;;  %s135_s25 = sadd.s32 1, %s6539_s20 }
   0x5   : > { %s132_s26 = ssub.s32 %s6543_s21, %s6616_s24  ;;  %p145_p0 = scmp.ne.s32.totalorder %s6539_s20, %s6535_s19 }
   0x6   : > { %p133_p1 = scmp.eq.s32.totalorder %s132_s26, 0  ;;  %p146_p2 = scmp.eq.s32.totalorder %s6612_s22, 1 }
   0x7   : > { %p151_p3 = scmp.ne.s32.totalorder %s6535_s19, %s6531_s18  ;;  %p152_p4 = scmp.eq.s32.totalorder %s6019_s23, 1 }
   0x8   : > { %s6627_s27 = scalar_select %p133_p1, %s6539_s20, %s135_s25  }
   0x9   : > { %p6629_p5 = por %p146_p2, %p145_p0  ;;  %p6633_p6 = por %p152_p4, %p151_p3 }
   0xa   : > { %p6022_p7 = scmp.ge.s32.totalorder %s6543_s21, 1  ;;  %p190_p8 = scmp.lt.s32.totalorder %s6543_s21, 3 }
   0xc   : > { %p191_p9 = pnand %p6022_p7, %p190_p8 }
   0xe   : > { %194 = sbr.rel (%p191_p9) target bundleno = 1301 (0x515), region = 40 }
  0x13   : > { %vm224_vm0 = vcmask 27648   ;;  %vm227_vm1 = vcmask 24576   ;;  %v6545_v0 = vmov 0   ;;  %p218_p10 = scmp.lt.s32.totalorder %s6612_s22, 1  ;;  %vm312_vm2 = vsmask.f32 256 }
  0x14   : > { %225 = vst.msk [vmem:[#allocation2] sm:$0xf] %vm224_vm0, %v6545_v0  ;;  %226 = vst.msk [vmem:[#allocation2 + $0x4] sm:$0xf] %vm224_vm0, %v6545_v0  ;;  %vm313_vm3 = vsmask.f32 4368 }
  0x15   : > { %228 = vst.msk [vmem:[#allocation2 + $0x8] sm:$0x1] %vm227_vm1, %v6545_v0  ;;  %231 = vst.msk [vmem:[#allocation2 + $0x14] sm:$0x1] %vm227_vm1, %v6545_v0  ;;  %s219_s30 = scalar_select %p218_p10, %s6612_s22, 1  ;;  %vm1166_vm6 = vcmask 1046528  }
  0x16   : > { %229 = vst.msk [vmem:[#allocation2 + $0xc] sm:$0xf] %vm224_vm0, %v6545_v0  ;;  %230 = vst.msk [vmem:[#allocation2 + $0x10] sm:$0xf] %vm224_vm0, %v6545_v0  ;;  %vm637_vm4 = vsmask.f32 7938 }
  0x17   : > { %232 = vst.msk [vmem:[#allocation2 + $0x18] sm:$0xf] %vm224_vm0, %v6545_v0  ;;  %233 = vst.msk [vmem:[#allocation2 + $0x1c] sm:$0xf] %vm224_vm0, %v6545_v0  ;;  %s6176_s6 = sshll.u32 %s219_s30, 7  ;;  %s6546_s10 = smov 8  }
  0x18   : > { %234 = vst.msk [vmem:[#allocation2 + $0x20] sm:$0x1] %vm227_vm1, %v6545_v0  ;;  %237 = vst.msk [vmem:[#allocation2 + $0x2c] sm:$0x1] %vm227_vm1, %v6545_v0  ;;  %vm9084_vm5 = vsmask.f32 7424  ;;  %s6752_s9 = scalar_lea.vmem %s9078_s0, %s6176_s6 }
  0x19   : > { %235 = vst.msk [vmem:[#allocation2 + $0x24] sm:$0xf] %vm224_vm0, %v6545_v0  ;;  %236 = vst.msk [vmem:[#allocation2 + $0x28] sm:$0xf] %vm224_vm0, %v6545_v0  ;;  %v282_v1 = vld [vmem:[%s6752_s9 + $0x8] sm:$0xf] }
  0x1a   : > { %238 = vst.msk [vmem:[#allocation2 + $0x30] sm:$0xf] %vm224_vm0, %v6545_v0  ;;  %239 = vst.msk [vmem:[#allocation2 + $0x34] sm:$0xf] %vm224_vm0, %v6545_v0  ;;  %v283_v2 = vld [vmem:[%s6752_s9 + $0xc] sm:$0xf] }
  0x1b   : > { %240 = vst.msk [vmem:[#allocation2 + $0x38] sm:$0x1] %vm227_vm1, %v6545_v0  ;;  %243 = vst.msk [vmem:[#allocation2 + $0x44] sm:$0x1] %vm227_vm1, %v6545_v0  ;;  %v280_v3 = vld [vmem:[%s6752_s9] sm:$0xf] }
  0x1c   : > { %241 = vst.msk [vmem:[#allocation2 + $0x3c] sm:$0xf] %vm224_vm0, %v6545_v0  ;;  %242 = vst.msk [vmem:[#allocation2 + $0x40] sm:$0xf] %vm224_vm0, %v6545_v0  ;;  %v6385_v4 = vld [vmem:[#allocation2] sm:$0xff]   ;;  %v333_v6 = vshrl.u32 %v282_v1, 16 }
  0x1d   : > { %244 = vst.msk [vmem:[#allocation2 + $0x48] sm:$0xf] %vm224_vm0, %v6545_v0  ;;  %245 = vst.msk [vmem:[#allocation2 + $0x4c] sm:$0xf] %vm224_vm0, %v6545_v0  ;;  %v336_v7 = vshll.u32 %v282_v1, 16  ;;  %v341_v8 = vshrl.u32 %v283_v2, 16 }
  0x1e   : > { %246 = vst.msk [vmem:[#allocation2 + $0x50] sm:$0x1] %vm227_vm1, %v6545_v0  ;;  %249 = vst.msk [vmem:[#allocation2 + $0x5c] sm:$0x1] %vm227_vm1, %v6545_v0  ;;  %v344_v9 = vshll.u32 %v283_v2, 16  ;;  %v1167_v11 = vrot.slane %v6385_v4, 1 }
  0x1f   : > { %247 = vst.msk [vmem:[#allocation2 + $0x54] sm:$0xf] %vm224_vm0, %v6545_v0  ;;  %248 = vst.msk [vmem:[#allocation2 + $0x58] sm:$0xf] %vm224_vm0, %v6545_v0  ;;  %v281_v10 = vld [vmem:[%s6752_s9 + $0x4] sm:$0xf] }
  0x20   : > { %250 = vst.msk [vmem:[#allocation2 + $0x60] sm:$0xf] %vm224_vm0, %v6545_v0  ;;  %251 = vst.msk [vmem:[#allocation2 + $0x64] sm:$0xf] %vm224_vm0, %v6545_v0  ;;  %v943_v13 = vshrl.u32 %v6385_v4, 16  ;;  %v945_v14 = vshll.u32 %v6385_v4, 16 }
  0x21   : > { %252 = vst.msk [vmem:[#allocation2 + $0x68] sm:$0x1] %vm227_vm1, %v6545_v0  ;;  %255 = vst.msk [vmem:[#allocation2 + $0x74] sm:$0x1] %vm227_vm1, %v6545_v0  ;;  %v335_v17 = vrot.slane %v333_v6, 7  ;;  %v343_v18 = vrot.slane %v341_v8, 7 }
  0x22   : > { %253 = vst.msk [vmem:[#allocation2 + $0x6c] sm:$0xf] %vm224_vm0, %v6545_v0  ;;  %254 = vst.msk [vmem:[#allocation2 + $0x70] sm:$0xf] %vm224_vm0, %v6545_v0  ;;  %v648_v19 = vld [vmem:[#allocation2 + $0x18] sm:$0xf] }
  0x23   : > { %256 = vst.msk [vmem:[#allocation2 + $0x78] sm:$0xf] %vm224_vm0, %v6545_v0  ;;  %257 = vst.msk [vmem:[#allocation2 + $0x7c] sm:$0xf] %vm224_vm0, %v6545_v0  ;;  %v316_v20 = vshrl.u32 %v280_v3, 16  ;;  %v947_v22 = vrot.slane %v945_v14, 1  ;;  %v338_v28 = vor.u32 %v336_v7, %v335_v17  ;;  %v346_v30 = vor.u32 %v344_v9, %v343_v18 }
  0x24   : > { %258 = vst.msk [vmem:[#allocation2 + $0x80] sm:$0x1] %vm227_vm1, %v6545_v0  ;;  %261 = vst.msk [vmem:[#allocation2 + $0x8c] sm:$0x1] %vm227_vm1, %v6545_v0  ;;  %v319_v24 = vshll.u32 %v280_v3, 16  ;;  %v324_v25 = vshrl.u32 %v281_v10, 16 }
  0x25   : > { %259 = vst.msk [vmem:[#allocation2 + $0x84] sm:$0xf] %vm224_vm0, %v6545_v0  ;;  %260 = vst.msk [vmem:[#allocation2 + $0x88] sm:$0xf] %vm224_vm0, %v6545_v0  ;;  %v284_v26 = vld [vmem:[%s6752_s9 + $0x10] sm:$0xf]  ;;  %v948_v31 = vor.u32 %v947_v22, %v943_v13 }
  0x26   : > { %262 = vst.msk [vmem:[#allocation2 + $0x90] sm:$0xf] %vm224_vm0, %v6545_v0  ;;  %263 = vst.msk [vmem:[#allocation2 + $0x94] sm:$0xf] %vm224_vm0, %v6545_v0  ;;  %v339_v29 = vrot.slane %v335_v17, 4  ;;  %v318_v32 = vrot.slane %v316_v20, 7 }
  0x27   : > { %264 = vst.msk [vmem:[#allocation2 + $0x98] sm:$0x1] %vm227_vm1, %v6545_v0  ;;  %267 = vst.msk [vmem:[#allocation2 + $0xa4] sm:$0x1] %vm227_vm1, %v6545_v0  ;;  %v326_v33 = vrot.slane %v324_v25, 7  ;;  %v327_v34 = vshll.u32 %v281_v10, 16 }
  0x28   : > { %265 = vst.msk [vmem:[#allocation2 + $0x9c] sm:$0xf] %vm224_vm0, %v6545_v0  ;;  %266 = vst.msk [vmem:[#allocation2 + $0xa0] sm:$0xf] %vm224_vm0, %v6545_v0  ;;  %v285_v35 = vld [vmem:[%s6752_s9 + $0x14] sm:$0xf]  ;;  %v321_v43 = vor.u32 %v319_v24, %v318_v32 }
  0x29   : > { %268 = vst.msk [vmem:[#allocation2 + $0xa8] sm:$0xf] %vm224_vm0, %v6545_v0  ;;  %269 = vst.msk [vmem:[#allocation2 + $0xac] sm:$0xf] %vm224_vm0, %v6545_v0  ;;  %v639_v38 = vld [vmem:[#allocation2 + $0xc] sm:$0xf]  ;;  %v329_v45 = vor.u32 %v327_v34, %v326_v33 }
  0x2a   : > { %270 = vst.msk [vmem:[#allocation2 + $0xb0] sm:$0x1] %vm227_vm1, %v6545_v0  ;;  %273 = vst.msk [vmem:[#allocation2 + $0xbc] sm:$0x1] %vm227_vm1, %v6545_v0  ;;  %v350_v39 = vshrl.u32 %v284_v26, 16  ;;  %v353_v40 = vshll.u32 %v284_v26, 16 }
  0x2b   : > { %271 = vst.msk [vmem:[#allocation2 + $0xb4] sm:$0xf] %vm224_vm0, %v6545_v0  ;;  %272 = vst.msk [vmem:[#allocation2 + $0xb8] sm:$0xf] %vm224_vm0, %v6545_v0  ;;  %v286_v41 = vld [vmem:[%s6752_s9 + $0x18] sm:$0xf] }
  0x2c   : > { %274 = vst.msk [vmem:[#allocation2 + $0xc0] sm:$0xf] %vm224_vm0, %v6545_v0  ;;  %275 = vst.msk [vmem:[#allocation2 + $0xc4] sm:$0xf] %vm224_vm0, %v6545_v0  ;;  %v322_v44 = vrot.slane %v318_v32, 4  ;;  %s6547_s11 = smov 4  }
  0x2d   : > { %276 = vst.msk [vmem:[#allocation2 + $0xc8] sm:$0x1] %vm227_vm1, %v6545_v0  ;;  %279 = vst.msk [vmem:[#allocation2 + $0xd4] sm:$0x1] %vm227_vm1, %v6545_v0  ;;  %v645_v47 = vld [vmem:[#allocation2 + $0x14] sm:$0x1] }
  0x2e   : > { %277 = vst.msk [vmem:[#allocation2 + $0xcc] sm:$0xf] %vm224_vm0, %v6545_v0  ;;  %278 = vst.msk [vmem:[#allocation2 + $0xd0] sm:$0xf] %vm224_vm0, %v6545_v0  ;;  %v652_v48 = vld [vmem:[#allocation2 + $0x20] sm:$0x1] }
  0x2f   : > { %v6386_v5 = vld [vmem:[#allocation2 + $0x8] ss:$0 sps:$4 sm:$0x11]   ;;  %vm6760_vm7 = vmor %vm312_vm2, %vm313_vm3  ;;  %v352_v49 = vrot.slane %v350_v39, 7  ;;  %v358_v50 = vshrl.u32 %v285_v35, 16  ;;  %v361_v51 = vshll.u32 %v285_v35, 16 }
  0x30   : > { %v1168_v12 = vrot.slane %v6386_v5, 1  ;;  %v950_v15 = vshll.u32 %v6386_v5, 16  ;;  %vm6767_vm8 = vmand %vm224_vm0, %vm637_vm4  ;;  %v347_v36 = vsel %vm6760_vm7, %v339_v29, %v346_v30  ;;  %v331_v52 = vrot.slane %v326_v33, 4  ;;  %v287_v53 = vld [vmem:[%s6752_s9 + $0x1c] sm:$0xf]  ;;  %s6548_s12 = smov 12  }
  0x31   : > { %v649_v37 = vsel %vm6767_vm8, %v338_v28, %v648_v19  ;;  %651 = vst.msk [vmem:[#allocation2 + $0x1c] sm:$0xf] %vm224_vm0, %v347_v36  ;;  %vm6783_vm9 = vmand %vm227_vm1, %vm312_vm2  ;;  %v330_v54 = vsel %vm6760_vm7, %v322_v44, %v329_v45  ;;  %v640_v55 = vsel %vm6767_vm8, %v321_v43, %v639_v38  ;;  %v655_v56 = vld [vmem:[#allocation2 + $0x24] sm:$0xf]  ;;  %v348_v57 = vrot.slane %v343_v18, 4  ;;  %s6549_s13 = smov 24  }
  0x32   : > { %v1169_v21 = vsel %vm1166_vm6, %v1167_v11, %v1168_v12  ;;  %v952_v27 = vrot.slane %v950_v15, 1  ;;  %650 = vst [vmem:[#allocation2 + $0x18] sm:$0xf] %v649_v37  ;;  %v367_v58 = vshrl.u32 %v286_v41, 16  ;;  %641 = vst [vmem:[#allocation2 + $0xc] sm:$0xf] %v640_v55  ;;  %v355_v59 = vor.u32 %v353_v40, %v352_v49 }
  0x33   : > { %1215 = vrot.lane.b32.xlu1 %v1169_v21, %s6546_s10  ;;  %642 = vst.msk [vmem:[#allocation2 + $0x10] sm:$0xf] %vm224_vm0, %v330_v54  ;;  %v356_v60 = vrot.slane %v352_v49, 4  ;;  %v360_v61 = vrot.slane %v358_v50, 7  ;;  %v646_v62 = vsel %vm6783_vm9, %v331_v52, %v645_v47  ;;  %v288_v63 = vld [vmem:[%s6752_s9 + $0x20] sm:$0xf]  ;;  %v653_v1 = vsel %vm6783_vm9, %v348_v57, %v652_v48 }
  0x34   : > { %v953_v42 = vsel %vm9084_vm5, %v948_v31, %v952_v27  ;;  %647 = vst [vmem:[#allocation2 + $0x14] sm:$0x1] %v646_v62  ;;  %v659_v2 = vld [vmem:[#allocation2 + $0x2c] sm:$0x1]  ;;  %v369_v3 = vrot.slane %v367_v58, 7  ;;  %v370_v4 = vshll.u32 %v286_v41, 16  ;;  %v656_v7 = vsel %vm6767_vm8, %v355_v59, %v655_v56 }
  0x35   : > { %1134 = vrot.lane.b32.xlu0 %v953_v42, %s6547_s11  ;;  %v375_v5 = vshrl.u32 %v287_v53, 16  ;;  %v363_v6 = vor.u32 %v361_v51, %v360_v61  ;;  %654 = vst [vmem:[#allocation2 + $0x20] sm:$0x1] %v653_v1  ;;  %v365_v8 = vrot.slane %v360_v61, 4  ;;  %v378_v9 = vshll.u32 %v287_v53, 16  ;;  %s6550_s14 = smov 20  }
  0x36   : > { %v662_v10 = vld [vmem:[#allocation2 + $0x30] sm:$0xf]  ;;  %v666_v11 = vld [vmem:[#allocation2 + $0x38] sm:$0x1]  ;;  %657 = vst [vmem:[#allocation2 + $0x24] sm:$0xf] %v656_v7  ;;  %v372_v12 = vor.u32 %v370_v4, %v369_v3 }
  0x37   : > { %v373_v13 = vrot.slane %v369_v3, 4  ;;  %v377_v14 = vrot.slane %v375_v5, 7  ;;  %v289_v15 = vld [vmem:[%s6752_s9 + $0x24] sm:$0xf]  ;;  %v384_v17 = vshrl.u32 %v288_v63, 16  ;;  %v364_v19 = vsel %vm6760_vm7, %v356_v60, %v363_v6  ;;  %s6551_s15 = smov 32  }
  0x38   : > { %v660_v20 = vsel %vm6783_vm9, %v365_v8, %v659_v2  ;;  %v387_v21 = vshll.u32 %v288_v63, 16  ;;  %658 = vst.msk [vmem:[#allocation2 + $0x28] sm:$0xf] %vm224_vm0, %v364_v19  ;;  %v663_v24 = vsel %vm6767_vm8, %v372_v12, %v662_v10  ;;  %v669_v28 = vld [vmem:[#allocation2 + $0x3c] sm:$0xf]  ;;  %v392_v33 = vshrl.u32 %v289_v15, 16 }
  0x39   : > { %v6387_v18 = vld [vmem:[#allocation2 + $0x18] sm:$0xff]   ;;  %661 = vst [vmem:[#allocation2 + $0x2c] sm:$0x1] %v660_v20  ;;  %v380_v22 = vor.u32 %v378_v9, %v377_v14  ;;  %v382_v25 = vrot.slane %v377_v14, 4  ;;  %v386_v26 = vrot.slane %v384_v17, 7  ;;  %v395_v50 = vshll.u32 %v289_v15, 16 }
  0x3a   : > { %1254 = vrot.lane.b32.xlu1 %v6387_v18, %s6548_s12  ;;  %v969_v27 = vshll.u32 %v6387_v18, 16  ;;  %664 = vst [vmem:[#allocation2 + $0x30] sm:$0xf] %v663_v24  ;;  %v6810_v29 = vld [vmem:[#allocation2 + $0xc] sm:$0xff]   ;;  %v967_v40 = vshrl.u32 %v6387_v18, 16  ;;  %v394_v43 = vrot.slane %v392_v33, 7 }
  0x3b   : > { %v381_v30 = vsel %vm6760_vm7, %v373_v13, %v380_v22  ;;  %v667_v31 = vsel %vm6783_vm9, %v382_v25, %v666_v11  ;;  %v389_v32 = vor.u32 %v387_v21, %v386_v26  ;;  %v6390_v34 = vld [vmem:[#allocation2 + $0x14] ss:$0 sps:$4 sm:$0x11]   ;;  %1252 = vrot.lane.b32.xlu0 %v6810_v29, %s6548_s12  ;;  %v1170_v37 = vrot.slane %v6810_v29, 1  ;;  %v290_v62 = vld [vmem:[%s6752_s9 + $0x28] sm:$0xf] }
  0x3c   : > { %665 = vst.msk [vmem:[#allocation2 + $0x34] sm:$0xf] %vm224_vm0, %v381_v30  ;;  %668 = vst [vmem:[#allocation2 + $0x38] sm:$0x1] %v667_v31  ;;  %v1171_v38 = vrot.slane %v6390_v34, 1  ;;  %v957_v39 = vshll.u32 %v6810_v29, 16  ;;  %v397_v58 = vor.u32 %v395_v50, %v394_v43 }
  0x3d   : > { %v6391_v35 = vld [vmem:[#allocation2 + $0x20] ss:$0 sps:$4 sm:$0x11]   ;;  %v670_v36 = vsel %vm6767_vm8, %v389_v32, %v669_v28  ;;  %v971_v41 = vrot.slane %v969_v27, 1  ;;  %v955_v42 = vshrl.u32 %v6810_v29, 16  ;;  %v962_v48 = vshll.u32 %v6390_v34, 16 }
  0x3e   : > { %671 = vst [vmem:[#allocation2 + $0x3c] sm:$0xf] %v670_v36  ;;  %v974_v45 = vshll.u32 %v6391_v35, 16  ;;  %v959_v47 = vrot.slane %v957_v39, 1  ;;  %v1172_v51 = vsel %vm1166_vm6, %v1170_v37, %v1171_v38  ;;  %v1173_v52 = vrot.slane %v6387_v18, 1  ;;  %s6552_s16 = smov 16  }
  0x3f   : > { %v6824_v44 = vld [vmem:[#allocation2 + $0x24] sm:$0xff]   ;;  %1371 = vrot.lane.b32.xlu0 %v6387_v18, %s6549_s13  ;;  %v1174_v53 = vrot.slane %v6391_v35, 1  ;;  %v390_v57 = vrot.slane %v386_v26, 4  ;;  %v972_v59 = vor.u32 %v971_v41, %v967_v40  ;;  %v964_v1 = vrot.slane %v962_v48, 1  ;;  %v291_v5 = vld [vmem:[%s6752_s9 + $0x2c] sm:$0xf] }
  0x40   : > { %v6827_v49 = vld [vmem:[#allocation2 + $0x2c] ss:$0 sps:$4 sm:$0x11]   ;;  %1373 = vrot.lane.b32.xlu1 %v6824_v44, %s6549_s13  ;;  %v981_v54 = vshll.u32 %v6824_v44, 16  ;;  %v979_v55 = vshrl.u32 %v6824_v44, 16  ;;  %v976_v60 = vrot.slane %v974_v45, 1  ;;  %v960_v63 = vor.u32 %v959_v47, %v955_v42 }
  0x41   : > { %v986_v56 = vshll.u32 %v6827_v49, 16  ;;  %v6839_v2 = vsel %vm1166_vm6, %v1173_v52, %v1174_v53  ;;  %v673_v4 = vld [vmem:[#allocation2 + $0x44] sm:$0x1]  ;;  %v398_v7 = vsel %vm6760_vm7, %v390_v57, %v397_v58  ;;  %v399_v8 = vrot.slane %v394_v43, 4  ;;  %v292_v10 = vld [vmem:[%s6752_s9 + $0x30] sm:$0xf] }
  0x42   : > { %v983_v61 = vrot.slane %v981_v54, 1  ;;  %v401_v9 = vshrl.u32 %v290_v62, 16  ;;  %v293_v11 = vld [vmem:[%s6752_s9 + $0x34] sm:$0xf]  ;;  %v6847_v12 = vsel %vm9084_vm5, %v972_v59, %v976_v60  ;;  %672 = vst.msk [vmem:[#allocation2 + $0x40] sm:$0xf] %vm224_vm0, %v398_v7  ;;  %v965_v14 = vsel %vm9084_vm5, %v960_v63, %v964_v1 }
  0x43   : > { %1334 = vrot.lane.b32.xlu0 %v1172_v51, %s6550_s14  ;;  %v988_v3 = vrot.slane %v986_v56, 1  ;;  %v404_v13 = vshll.u32 %v290_v62, 16  ;;  %v674_v15 = vsel %vm6783_vm9, %v399_v8, %v673_v4  ;;  %v409_v18 = vshrl.u32 %v291_v5, 16  ;;  %v294_v19 = vld [vmem:[%s6752_s9 + $0x38] sm:$0xf]  ;;  %s6553_s17 = smov 28  }
  0x44   : > { %1217 = vrot.lane.b32.xlu1 %v1172_v51, %s6546_s10  ;;  %v984_v6 = vor.u32 %v983_v61, %v979_v55  ;;  %v403_v17 = vrot.slane %v401_v9, 7  ;;  %675 = vst [vmem:[#allocation2 + $0x44] sm:$0x1] %v674_v15  ;;  %v412_v20 = vshll.u32 %v291_v5, 16  ;;  %v676_v21 = vld [vmem:[#allocation2 + $0x48] sm:$0xf] }
  0x45   : > { %v418_v22 = vshrl.u32 %v292_v10, 16  ;;  %v421_v24 = vshll.u32 %v292_v10, 16  ;;  %v426_v25 = vshrl.u32 %v293_v11, 16  ;;  %v411_v30 = vrot.slane %v409_v18, 7  ;;  %v680_v31 = vld [vmem:[#allocation2 + $0x50] sm:$0x1] }
  0x46   : > { %v6859_v26 = vsel %vm9084_vm5, %v984_v6, %v988_v3  ;;  %v406_v27 = vor.u32 %v404_v13, %v403_v17  ;;  %v407_v28 = vrot.slane %v403_v17, 4  ;;  %v429_v34 = vshll.u32 %v293_v11, 16  ;;  %v295_v35 = vld [vmem:[%s6752_s9 + $0x3c] sm:$0xf]  ;;  %v683_v40 = vld [vmem:[#allocation2 + $0x54] sm:$0xf] }
  0x47   : > { %1453 = vrot.lane.b32.xlu0 %v6839_v2, %s6551_s15  ;;  %v420_v32 = vrot.slane %v418_v22, 7  ;;  %v428_v33 = vrot.slane %v426_v25, 7  ;;  %v435_v36 = vshrl.u32 %v294_v19, 16  ;;  %v414_v37 = vor.u32 %v412_v20, %v411_v30  ;;  %v687_v41 = vld [vmem:[#allocation2 + $0x5c] sm:$0x1]  ;;  %v6886_v4 = vld [vmem:[#allocation2 + $0x30] sm:$0xff]  }
  0x48   : > { %1336 = vrot.lane.b32.xlu1 %v6839_v2, %s6550_s14  ;;  %v677_v38 = vsel %vm6767_vm8, %v406_v27, %v676_v21  ;;  %v416_v39 = vrot.slane %v411_v30, 4  ;;  %v438_v42 = vshll.u32 %v294_v19, 16  ;;  %v443_v53 = vshrl.u32 %v295_v35, 16  ;;  %v690_v58 = vld [vmem:[#allocation2 + $0x60] sm:$0xf] }
  0x49   : > { %678 = vst [vmem:[#allocation2 + $0x48] sm:$0xf] %v677_v38  ;;  %v423_v43 = vor.u32 %v421_v24, %v420_v32  ;;  %v424_v45 = vrot.slane %v420_v32, 4  ;;  %v431_v47 = vor.u32 %v429_v34, %v428_v33  ;;  %v433_v48 = vrot.slane %v428_v33, 4  ;;  %v296_v60 = vld [vmem:[%s6752_s9 + $0x40] sm:$0xf] }
  0x4a   : > { %v415_v50 = vsel %vm6760_vm7, %v407_v28, %v414_v37  ;;  %v681_v51 = vsel %vm6783_vm9, %v416_v39, %v680_v31  ;;  %v437_v52 = vrot.slane %v435_v36, 7  ;;  %v446_v57 = vshll.u32 %v295_v35, 16  ;;  %v297_v3 = vld [vmem:[%s6752_s9 + $0x44] sm:$0xf]  ;;  %v694_v6 = vld [vmem:[#allocation2 + $0x68] sm:$0x1] }
  0x4b   : > { %1136 = vrot.lane.b32.xlu0 %v965_v14, %s6547_s11  ;;  %679 = vst.msk [vmem:[#allocation2 + $0x4c] sm:$0xf] %vm224_vm0, %v415_v50  ;;  %682 = vst [vmem:[#allocation2 + $0x50] sm:$0x1] %v681_v51  ;;  %v432_v54 = vsel %vm6760_vm7, %v424_v45, %v431_v47  ;;  %v684_v55 = vsel %vm6767_vm8, %v423_v43, %v683_v40  ;;  %v688_v56 = vsel %vm6783_vm9, %v433_v48, %v687_v41  ;;  %v697_v20 = vld [vmem:[#allocation2 + $0x6c] sm:$0xf] }
  0x4c   : > { %1301 = vrot.lane.b32.xlu1 %v6847_v12, %s6552_s16  ;;  %685 = vst [vmem:[#allocation2 + $0x54] sm:$0xf] %v684_v55  ;;  %686 = vst.msk [vmem:[#allocation2 + $0x58] sm:$0xf] %vm224_vm0, %v432_v54  ;;  %v440_v59 = vor.u32 %v438_v42, %v437_v52  ;;  %v1176_v61 = vrot.slane %v6824_v44, 1  ;;  %v1177_v62 = vrot.slane %v6827_v49, 1 }
  0x4d   : > { %689 = vst [vmem:[#allocation2 + $0x5c] sm:$0x1] %v688_v56  ;;  %v441_v63 = vrot.slane %v437_v52, 4  ;;  %v445_v1 = vrot.slane %v443_v53, 7  ;;  %v452_v9 = vshrl.u32 %v296_v60, 16  ;;  %v455_v10 = vshll.u32 %v296_v60, 16 }
  0x4e   : > { %v691_v5 = vsel %vm6767_vm8, %v440_v59, %v690_v58  ;;  %v460_v11 = vshrl.u32 %v297_v3, 16  ;;  %v6895_v49 = vsel %vm1166_vm6, %v1176_v61, %v1177_v62  ;;  %v6394_v13 = vld [vmem:[#allocation2 + $0x38] ss:$0 sps:$4 sm:$0x11]   ;;  %v993_v18 = vshll.u32 %v6886_v4, 16  ;;  %v6917_v34 = vld [vmem:[#allocation2 + $0x3c] sm:$0xff]  }
  0x4f   : > { %1299 = vrot.lane.b32.xlu0 %v965_v14, %s6552_s16  ;;  %v448_v7 = vor.u32 %v446_v57, %v445_v1  ;;  %692 = vst [vmem:[#allocation2 + $0x60] sm:$0xf] %v691_v5  ;;  %v450_v8 = vrot.slane %v445_v1, 4  ;;  %v454_v17 = vrot.slane %v452_v9, 7  ;;  %v991_v21 = vshrl.u32 %v6886_v4, 16  ;;  %v6407_v40 = vld [vmem:[%s9079_s1 + $0x8] sm:$0xff]  }
  0x50   : > { %1420 = vrot.lane.b32.xlu1 %v6859_v26, %s6553_s17  ;;  %v998_v22 = vshll.u32 %v6394_v13, 16  ;;  %v995_v24 = vrot.slane %v993_v18, 1  ;;  %v463_v27 = vshll.u32 %v297_v3, 16  ;;  %v6405_v31 = vld [vmem:[%s9079_s1 + $0x10] ss:$0 sps:$4 sm:$0x33]  }
  0x51   : > { %v449_v14 = vsel %vm6760_vm7, %v441_v63, %v448_v7  ;;  %v695_v15 = vsel %vm6783_vm9, %v450_v8, %v694_v6  ;;  %v457_v19 = vor.u32 %v455_v10, %v454_v17  ;;  %v458_v25 = vrot.slane %v454_v17, 4  ;;  %v701_v36 = vld [vmem:[#allocation2 + $0x74] sm:$0x1]  ;;  %v298_v37 = vld [vmem:[%s6752_s9 + $0x48] sm:$0xf]  ;;  %v6409_v55 = vld [vmem:[%s9079_s1] sm:$0xff]  }
  0x52   : > { %693 = vst.msk [vmem:[#allocation2 + $0x64] sm:$0xf] %vm224_vm0, %v449_v14  ;;  %696 = vst [vmem:[#allocation2 + $0x68] sm:$0x1] %v695_v15  ;;  %v996_v32 = vor.u32 %v995_v24, %v991_v21  ;;  %v1000_v33 = vrot.slane %v998_v22, 1  ;;  %v1179_v39 = vrot.slane %v6886_v4, 1 }
  0x53   : > { %1418 = vrot.lane.b32.xlu0 %v6847_v12, %s6553_s17  ;;  %v698_v28 = vsel %vm6767_vm8, %v457_v19, %v697_v20  ;;  %v299_v38 = vld [vmem:[%s6752_s9 + $0x4c] sm:$0xf]  ;;  %vm1803_vm10 = vcmask 1041408   ;;  %v1180_v41 = vrot.slane %v6394_v13, 1  ;;  %v472_v45 = vshll.u32 %v298_v37, 16 }
  0x54   : > { %1138 = vrot.lane.b32.xlu1 %v6847_v12, %s6547_s11  ;;  %v462_v12 = vrot.slane %v460_v11, 7  ;;  %699 = vst [vmem:[#allocation2 + $0x6c] sm:$0xf] %v698_v28  ;;  %v6932_v42 = vld [vmem:[#allocation2 + $0x44] ss:$0 sps:$4 sm:$0x11]   ;;  %6329 = vmatprep.subr.msk.bf16.mxu0 %vm1803_vm10, %v6405_v31  ;;  %v6938_v47 = vsel %vm9084_vm5, %v996_v32, %v1000_v33 }
  0x55   : > { %v1005_v48 = vshll.u32 %v6917_v34, 16  ;;  %v477_v50 = vshrl.u32 %v299_v38, 16  ;;  %v480_v51 = vshll.u32 %v299_v38, 16  ;;  %v704_v52 = vld [vmem:[#allocation2 + $0x78] sm:$0xf]  ;;  %v1805_v54 = vsel %vm1803_vm10, %v6405_v31, 0 }
  0x56   : > { %v465_v30 = vor.u32 %v463_v27, %v462_v12  ;;  %v300_v56 = vld [vmem:[%s6752_s9 + $0x50] sm:$0xf]  ;;  %v1003_v57 = vshrl.u32 %v6917_v34, 16  ;;  %6250 = vmatpush3.bf16.msra.mxu0 %v1805_v54  ;;  %v708_v59 = vld [vmem:[#allocation2 + $0x80] sm:$0x1]  ;;  %v6953_v61 = vsel %vm1166_vm6, %v1179_v39, %v1180_v41  ;;  %v1010_v62 = vshll.u32 %v6932_v42, 16 }
  0x57   : > { %1455 = vrot.lane.b32.xlu0 %v6895_v49, %s6551_s15  ;;  %v479_v58 = vrot.slane %v477_v50, 7  ;;  %v301_v60 = vld [vmem:[%s6752_s9 + $0x54] sm:$0xf]  ;;  %6251 = vmatprep.subr.bf16.mxu0 %v6407_v40  ;;  %v1007_v3 = vrot.slane %v1005_v48, 1  ;;  %v486_v6 = vshrl.u32 %v300_v56, 16  ;;  %v489_v8 = vshll.u32 %v300_v56, 16 }
  0x58   : > { %1140 = vrot.lane.b32.xlu1 %v6859_v26, %s6547_s11  ;;  %v466_v35 = vsel %vm6760_vm7, %v458_v25, %v465_v30  ;;  %v494_v9 = vshrl.u32 %v301_v60, 16  ;;  %v302_v10 = vld [vmem:[%s6752_s9 + $0x58] sm:$0xf]  ;;  %v497_v13 = vshll.u32 %v301_v60, 16  ;;  %v711_v14 = vld [vmem:[#allocation2 + $0x84] sm:$0xf] }
  0x59   : > { %700 = vst.msk [vmem:[#allocation2 + $0x70] sm:$0xf] %vm224_vm0, %v466_v35  ;;  %v484_v5 = vrot.slane %v479_v58, 4  ;;  %v1012_v15 = vrot.slane %v1010_v62, 1  ;;  %v488_v18 = vrot.slane %v486_v6, 7  ;;  %v1008_v19 = vor.u32 %v1007_v3, %v1003_v57 }
  0x5a   : > { %6252 = vmatpush3.bf16.msra.mxu0 %v6407_v40  ;;  %v496_v20 = vrot.slane %v494_v9, 7  ;;  %v506_v21 = vshll.u32 %v302_v10, 16  ;;  %v715_v25 = vld [vmem:[#allocation2 + $0x8c] sm:$0x1]  ;;  %v304_v31 = vld [vmem:[%s6752_s9 + $0x60] sm:$0xf] }
  0x5b   : > { %1219 = vrot.lane.b32.xlu0 %v6839_v2, %s6546_s10  ;;  %v467_v2 = vrot.slane %v462_v12, 4  ;;  %v709_v17 = vsel %vm6783_vm9, %v484_v5, %v708_v59  ;;  %6253 = vmatprep.subr.bf16.mxu0 %v6409_v55  ;;  %v503_v12 = vshrl.u32 %v302_v10, 16  ;;  %v491_v22 = vor.u32 %v489_v8, %v488_v18  ;;  %v718_v35 = vld [vmem:[#allocation2 + $0x90] sm:$0xf]  ;;  %v722_v48 = vld [vmem:[#allocation2 + $0x98] sm:$0x1] }
  0x5c   : > { %1221 = vrot.lane.b32.xlu1 %v6895_v49, %s6546_s10  ;;  %710 = vst [vmem:[#allocation2 + $0x80] sm:$0x1] %v709_v17  ;;  %v492_v24 = vrot.slane %v488_v18, 4  ;;  %v499_v27 = vor.u32 %v497_v13, %v496_v20  ;;  %v501_v28 = vrot.slane %v496_v20, 4  ;;  %v523_v50 = vshll.u32 %v304_v31, 16 }
  0x5d   : > { %v702_v43 = vsel %vm6783_vm9, %v467_v2, %v701_v36  ;;  %v505_v30 = vrot.slane %v503_v12, 7  ;;  %v712_v32 = vsel %vm6767_vm8, %v491_v22, %v711_v14  ;;  %v305_v36 = vld [vmem:[%s6752_s9 + $0x64] sm:$0xf]  ;;  %v6980_v2 = vld [vmem:[#allocation2 + $0x48] sm:$0xff]   ;;  %vm1485_vm11 = vcmask 31744  }
  0x5e   : > { %703 = vst [vmem:[#allocation2 + $0x74] sm:$0x1] %v702_v43  ;;  %6254 = vmatpush3.bf16.msra.mxu0 %v6409_v55  ;;  %713 = vst [vmem:[#allocation2 + $0x84] sm:$0xf] %v712_v32  ;;  %v716_v38 = vsel %vm6783_vm9, %v501_v28, %v715_v25  ;;  %v531_v57 = vshll.u32 %v305_v36, 16  ;;  %v1015_v17 = vshrl.u32 %v6980_v2, 16 }
  0x5f   : > { %1256 = vrot.lane.b32.xlu0 %v6824_v44, %s6548_s12  ;;  %v469_v44 = vshrl.u32 %v298_v37, 16  ;;  %v6978_v37 = vsel %vm9084_vm5, %v1008_v19, %v1012_v15  ;;  %v508_v39 = vor.u32 %v506_v21, %v505_v30  ;;  %717 = vst [vmem:[#allocation2 + $0x8c] sm:$0x1] %v716_v38  ;;  %v509_v40 = vrot.slane %v505_v30, 4  ;;  %v732_v20 = vld [vmem:[#allocation2 + $0xa8] sm:$0xf] }
  0x60   : > { %1258 = vrot.lane.b32.xlu1 %v6886_v4, %s6548_s12  ;;  %v6996_v59 = vld [vmem:[#allocation2 + $0x50] ss:$0 sps:$4 sm:$0x11]   ;;  %v309_v32 = vld [vmem:[%s6752_s9 + $0x74] sm:$0xf]  ;;  %vm1518_vm12 = vcmask 64512  }
  0x61   : > { %v471_v53 = vrot.slane %v469_v44, 7  ;;  %v520_v44 = vshrl.u32 %v304_v31, 16  ;;  %v1022_v18 = vshll.u32 %v6996_v59, 16  ;;  %v308_v25 = vld [vmem:[%s6752_s9 + $0x70] sm:$0xf]  ;;  %vm1551_vm13 = vcmask 97280  }
  0x62   : > { %v736_v31 = vld [vmem:[#allocation2 + $0xb0] sm:$0x1]  ;;  %vm1584_vm14 = vcmask 130048   ;;  %vm1617_vm15 = vcmask 162816   ;;  %vm1683_vm1 = vcmask 228352   ;;  %vm1716_vm3 = vcmask 261120  }
  0x63   : > { %1303 = vrot.lane.b32.xlu0 %v6859_v26, %s6552_s16  ;;  %v474_v63 = vor.u32 %v472_v45, %v471_v53  ;;  %v475_v1 = vrot.slane %v471_v53, 4  ;;  %v482_v26 = vor.u32 %v480_v51, %v479_v58  ;;  %v719_v45 = vsel %vm6767_vm8, %v508_v39, %v718_v35  ;;  %v306_v58 = vld [vmem:[%s6752_s9 + $0x68] sm:$0xf] }
  0x64   : > { %1305 = vrot.lane.b32.xlu1 %v6938_v47, %s6552_s16  ;;  %v528_v51 = vshrl.u32 %v305_v36, 16  ;;  %v1183_v53 = vrot.slane %v6932_v42, 1  ;;  %720 = vst [vmem:[#allocation2 + $0x90] sm:$0xf] %v719_v45  ;;  %v522_v56 = vrot.slane %v520_v44, 7  ;;  %v1017_v42 = vshll.u32 %v6980_v2, 16 }
  0x65   : > { %v705_v7 = vsel %vm6767_vm8, %v474_v63, %v704_v52  ;;  %v483_v11 = vsel %vm6760_vm7, %v475_v1, %v482_v26  ;;  %v1182_v52 = vrot.slane %v6917_v34, 1  ;;  %v725_v63 = vld [vmem:[#allocation2 + $0x9c] sm:$0xf]  ;;  %v307_v26 = vld [vmem:[%s6752_s9 + $0x6c] sm:$0xf]  ;;  %v537_v8 = vshrl.u32 %v306_v58, 16 }
  0x66   : > { %706 = vst [vmem:[#allocation2 + $0x78] sm:$0xf] %v705_v7  ;;  %707 = vst.msk [vmem:[#allocation2 + $0x7c] sm:$0xf] %vm224_vm0, %v483_v11  ;;  %v525_v1 = vor.u32 %v523_v50, %v522_v56  ;;  %v530_v3 = vrot.slane %v528_v51, 7  ;;  %v526_v6 = vrot.slane %v522_v56, 4 }
  0x67   : > { %1338 = vrot.lane.b32.xlu0 %v6895_v49, %s6550_s14  ;;  %v303_v49 = vld [vmem:[%s6752_s9 + $0x5c] sm:$0xf]  ;;  %v7010_v5 = vsel %vm1166_vm6, %v1182_v52, %v1183_v53  ;;  %v729_v7 = vld [vmem:[#allocation2 + $0xa4] sm:$0x1]  ;;  %v540_v13 = vshll.u32 %v306_v58, 16  ;;  %v539_v14 = vrot.slane %v537_v8, 7 }
  0x68   : > { %1340 = vrot.lane.b32.xlu1 %v6953_v61, %s6550_s14  ;;  %v511_v33 = vshrl.u32 %v303_v49, 16  ;;  %v514_v43 = vshll.u32 %v303_v49, 16  ;;  %v533_v9 = vor.u32 %v531_v57, %v530_v3  ;;  %v726_v10 = vsel %vm6767_vm8, %v525_v1, %v725_v63  ;;  %v739_v50 = vld [vmem:[#allocation2 + $0xb4] sm:$0xf]  ;;  %v743_v58 = vld [vmem:[#allocation2 + $0xbc] sm:$0x1] }
  0x69   : > { %v535_v11 = vrot.slane %v530_v3, 4  ;;  %727 = vst [vmem:[#allocation2 + $0x9c] sm:$0xf] %v726_v10  ;;  %v545_v15 = vshrl.u32 %v307_v26, 16  ;;  %v1019_v12 = vrot.slane %v1017_v42, 1  ;;  %v542_v21 = vor.u32 %v540_v13, %v539_v14 }
  0x6a   : > { %v513_v41 = vrot.slane %v511_v33, 7  ;;  %v534_v49 = vsel %vm6760_vm7, %v526_v6, %v533_v9  ;;  %v543_v22 = vrot.slane %v539_v14, 4  ;;  %v554_v33 = vshrl.u32 %v308_v25, 16  ;;  %v6400_v52 = vld [vmem:[#allocation2 + $0x5c] ss:$0 sps:$4 sm:$0x11]  }
  0x6b   : > { %1375 = vrot.lane.b32.xlu0 %v6886_v4, %s6549_s13  ;;  %v500_v4 = vsel %vm6760_vm7, %v492_v24, %v499_v27  ;;  %v730_v19 = vsel %vm6783_vm9, %v535_v11, %v729_v7  ;;  %728 = vst.msk [vmem:[#allocation2 + $0xa0] sm:$0xf] %vm224_vm0, %v534_v49  ;;  %v547_v24 = vrot.slane %v545_v15, 7  ;;  %v733_v28 = vsel %vm6767_vm8, %v542_v21, %v732_v20  ;;  %v310_v6 = vld [vmem:[%s6752_s9 + $0x78] sm:$0xf] }
  0x6c   : > { %1377 = vrot.lane.b32.xlu1 %v6917_v34, %s6549_s13  ;;  %714 = vst.msk [vmem:[#allocation2 + $0x88] sm:$0xf] %vm224_vm0, %v500_v4  ;;  %v516_v54 = vor.u32 %v514_v43, %v513_v41  ;;  %v518_v55 = vrot.slane %v513_v41, 4  ;;  %731 = vst [vmem:[#allocation2 + $0xa4] sm:$0x1] %v730_v19  ;;  %v1020_v35 = vor.u32 %v1019_v12, %v1015_v17  ;;  %v1024_v36 = vrot.slane %v1022_v18, 1 }
  0x6d   : > { %v552_v30 = vrot.slane %v547_v24, 4  ;;  %734 = vst [vmem:[#allocation2 + $0xa8] sm:$0xf] %v733_v28  ;;  %v7033_v4 = vld [vmem:[#allocation2 + $0x54] sm:$0xff]   ;;  %v556_v39 = vrot.slane %v554_v33, 7  ;;  %v1185_v41 = vrot.slane %v6980_v2, 1 }
  0x6e   : > { %v517_v60 = vsel %vm6760_vm7, %v509_v40, %v516_v54  ;;  %v723_v62 = vsel %vm6783_vm9, %v518_v55, %v722_v48  ;;  %v557_v40 = vshll.u32 %v308_v25, 16  ;;  %v1186_v43 = vrot.slane %v6996_v59, 1  ;;  %v311_v7 = vld [vmem:[%s6752_s9 + $0x7c] sm:$0xf]  ;;  %v746_v19 = vld [vmem:[#allocation2 + $0xc0] sm:$0xf] }
  0x6f   : > { %1422 = vrot.lane.b32.xlu0 %v6938_v47, %s6553_s17  ;;  %721 = vst.msk [vmem:[#allocation2 + $0x94] sm:$0xf] %vm224_vm0, %v517_v60  ;;  %724 = vst [vmem:[#allocation2 + $0x98] sm:$0x1] %v723_v62  ;;  %v562_v44 = vshrl.u32 %v309_v32, 16  ;;  %v565_v45 = vshll.u32 %v309_v32, 16  ;;  %v1025_v51 = vsel %vm9084_vm5, %v1020_v35, %v1024_v36 }
  0x70   : > { %1424 = vrot.lane.b32.xlu1 %v6978_v37, %s6553_s17  ;;  %v559_v48 = vor.u32 %v557_v40, %v556_v39  ;;  %v1029_v53 = vshll.u32 %v7033_v4, 16  ;;  %v560_v54 = vrot.slane %v556_v39, 4  ;;  %v1027_v59 = vshrl.u32 %v7033_v4, 16  ;;  %v6402_v25 = vld [vmem:[#allocation2 + $0x68] ss:$0 sps:$4 sm:$0x11]  }
  0x71   : > { %v564_v55 = vrot.slane %v562_v44, 7  ;;  %v1187_v62 = vsel %vm1166_vm6, %v1185_v41, %v1186_v43  ;;  %v1034_v42 = vshll.u32 %v6400_v52, 16  ;;  %v571_v9 = vshrl.u32 %v310_v6, 16  ;;  %v7091_v35 = vld [vmem:[#allocation2 + $0x6c] sm:$0xff]  }
  0x72   : > { %v740_v57 = vsel %vm6767_vm8, %v559_v48, %v739_v50  ;;  %v1031_v63 = vrot.slane %v1029_v53, 1  ;;  %v579_v10 = vshrl.u32 %v311_v7, 16  ;;  %v574_v11 = vshll.u32 %v310_v6, 16 }
  0x73   : > { %1457 = vrot.lane.b32.xlu0 %v6953_v61, %s6551_s15  ;;  %v567_v56 = vor.u32 %v565_v45, %v564_v55  ;;  %741 = vst [vmem:[#allocation2 + $0xb4] sm:$0xf] %v740_v57  ;;  %v569_v60 = vrot.slane %v564_v55, 4  ;;  %v1188_v13 = vrot.slane %v7033_v4, 1  ;;  %v1189_v14 = vrot.slane %v6400_v52, 1 }
  0x74   : > { %1142 = vrot.lane.b32.xlu1 %v6938_v47, %s6547_s11  ;;  %v548_v47 = vshll.u32 %v307_v26, 16  ;;  %v1032_v3 = vor.u32 %v1031_v63, %v1027_v59  ;;  %v1036_v26 = vrot.slane %v1034_v42, 1  ;;  %v581_v15 = vrot.slane %v579_v10, 7  ;;  %v6408_v63 = vld [vmem:[#allocation2 + $0x80] ss:$0 sps:$4 sm:$0x11]  }
  0x75   : > { %v744_v1 = vsel %vm6783_vm9, %v569_v60, %v743_v58  ;;  %v1190_v21 = vsel %vm1166_vm6, %v1188_v13, %v1189_v14  ;;  %v1053_v39 = vshll.u32 %v7091_v35, 16  ;;  %v1051_v41 = vshrl.u32 %v7091_v35, 16  ;;  %v7114_v58 = vld [vmem:[#allocation2 + $0x78] sm:$0xff]   ;;  %v7126_v13 = vld [vmem:[#allocation2 + $0x84] sm:$0xff]  }
  0x76   : > { %v550_v27 = vor.u32 %v548_v47, %v547_v24  ;;  %745 = vst [vmem:[#allocation2 + $0xbc] sm:$0x1] %v744_v1  ;;  %v1037_v8 = vsel %vm9084_vm5, %v1032_v3, %v1036_v26  ;;  %v7073_v47 = vld [vmem:[#allocation2 + $0x60] sm:$0xff]   ;;  %v586_v12 = vrot.slane %v581_v15, 4  ;;  %v750_v24 = vld [vmem:[#allocation2 + $0xc8] sm:$0x1] }
  0x77   : > { %1459 = vrot.lane.b32.xlu0 %v7010_v5, %s6551_s15  ;;  %v1039_v23 = vshrl.u32 %v7073_v47, 16  ;;  %v1191_v36 = vrot.slane %v7073_v47, 1  ;;  %v1055_v43 = vrot.slane %v1053_v39, 1  ;;  %v1194_v55 = vrot.slane %v7091_v35, 1 }
  0x78   : > { %1144 = vrot.lane.b32.xlu1 %v6978_v37, %s6547_s11  ;;  %v551_v38 = vsel %vm6760_vm7, %v543_v22, %v550_v27  ;;  %v1041_v27 = vshll.u32 %v7073_v47, 16  ;;  %v751_v28 = vsel %vm6783_vm9, %v586_v12, %v750_v24  ;;  %v1065_v42 = vshll.u32 %v7114_v58, 16 }
  0x79   : > { %735 = vst.msk [vmem:[#allocation2 + $0xac] sm:$0xf] %vm224_vm0, %v551_v38  ;;  %752 = vst [vmem:[#allocation2 + $0xc8] sm:$0x1] %v751_v28  ;;  %v1192_v38 = vrot.slane %v6402_v25, 1  ;;  %v1056_v50 = vor.u32 %v1055_v43, %v1051_v41  ;;  %v1063_v3 = vshrl.u32 %v7114_v58, 16 }
  0x7a   : > { %v1067_v26 = vrot.slane %v1065_v42, 1  ;;  %v1070_v6 = vshll.u32 %v6408_v63, 16  ;;  %v1077_v24 = vshll.u32 %v7126_v13, 16  ;;  %vm2003_vm10 = vcmask 57344  }
  0x7b   : > { %1223 = vrot.lane.b32.xlu0 %v6953_v61, %s6546_s10  ;;  %v737_v61 = vsel %vm6783_vm9, %v552_v30, %v736_v31  ;;  %v1043_v30 = vrot.slane %v1041_v27, 1  ;;  %v1046_v31 = vshll.u32 %v6402_v25, 16  ;;  %v1193_v40 = vsel %vm1166_vm6, %v1191_v36, %v1192_v38  ;;  %2010 = vst.msk [vmem:[#allocation3 + $0x20] sm:$0x1] %vm2003_vm10, %v6545_v0  ;;  %2004 = vst.msk [vmem:[#allocation3 + $0x8] sm:$0x1] %vm2003_vm10, %v6545_v0 }
  0x7c   : > { %1225 = vrot.lane.b32.xlu1 %v7010_v5, %s6546_s10  ;;  %738 = vst [vmem:[#allocation2 + $0xb0] sm:$0x1] %v737_v61  ;;  %v6404_v61 = vld [vmem:[#allocation2 + $0x74] ss:$0 sps:$4 sm:$0x11]   ;;  %vm2000_vm9 = vcmask 60416  }
  0x7d   : > { %v1044_v32 = vor.u32 %v1043_v30, %v1039_v23  ;;  %v1048_v33 = vrot.slane %v1046_v31, 1  ;;  %v1058_v44 = vshll.u32 %v6404_v61, 16  ;;  %2008 = vst.msk [vmem:[#allocation3 + $0x18] sm:$0xf] %vm2000_vm9, %v6545_v0  ;;  %2001 = vst.msk [vmem:[#allocation3] sm:$0xf] %vm2000_vm9, %v6545_v0 }
  0x7e   : > { %2002 = vst.msk [vmem:[#allocation3 + $0x4] sm:$0xf] %vm2000_vm9, %v6545_v0  ;;  %2005 = vst.msk [vmem:[#allocation3 + $0xc] sm:$0xf] %vm2000_vm9, %v6545_v0 }
  0x7f   : > { %1260 = vrot.lane.b32.xlu0 %v6917_v34, %s6548_s12  ;;  %v1049_v46 = vsel %vm9084_vm5, %v1044_v32, %v1048_v33  ;;  %v1075_v33 = vshrl.u32 %v7126_v13, 16  ;;  %2006 = vst.msk [vmem:[#allocation3 + $0x10] sm:$0xf] %vm2000_vm9, %v6545_v0  ;;  %2009 = vst.msk [vmem:[#allocation3 + $0x1c] sm:$0xf] %vm2000_vm9, %v6545_v0 }
  0x80   : > { %1262 = vrot.lane.b32.xlu1 %v6980_v2, %s6548_s12  ;;  %2011 = vst.msk [vmem:[#allocation3 + $0x24] sm:$0xf] %vm2000_vm9, %v6545_v0  ;;  %2012 = vst.msk [vmem:[#allocation3 + $0x28] sm:$0xf] %vm2000_vm9, %v6545_v0 }
  0x81   : > { %2014 = vst.msk [vmem:[#allocation3 + $0x30] sm:$0xf] %vm2000_vm9, %v6545_v0  ;;  %2015 = vst.msk [vmem:[#allocation3 + $0x34] sm:$0xf] %vm2000_vm9, %v6545_v0 }
  0x82   : > { %2017 = vst.msk [vmem:[#allocation3 + $0x3c] sm:$0xf] %vm2000_vm9, %v6545_v0  ;;  %2018 = vst.msk [vmem:[#allocation3 + $0x40] sm:$0xf] %vm2000_vm9, %v6545_v0 }
  0x83   : > { %1307 = vrot.lane.b32.xlu0 %v6978_v37, %s6552_s16  ;;  %v568_v37 = vsel %vm6760_vm7, %v560_v54, %v567_v56  ;;  %v1195_v56 = vrot.slane %v6404_v61, 1  ;;  %2020 = vst.msk [vmem:[#allocation3 + $0x48] sm:$0xf] %vm2000_vm9, %v6545_v0  ;;  %2021 = vst.msk [vmem:[#allocation3 + $0x4c] sm:$0xf] %vm2000_vm9, %v6545_v0 }
  0x84   : > { %1309 = vrot.lane.b32.xlu1 %v1025_v51, %s6552_s16  ;;  %742 = vst.msk [vmem:[#allocation2 + $0xb8] sm:$0xf] %vm224_vm0, %v568_v37 }
  0x85   : > { %v1196_v60 = vsel %vm1166_vm6, %v1194_v55, %v1195_v56  ;;  %2023 = vst.msk [vmem:[#allocation3 + $0x54] sm:$0xf] %vm2000_vm9, %v6545_v0  ;;  %2024 = vst.msk [vmem:[#allocation3 + $0x58] sm:$0xf] %vm2000_vm9, %v6545_v0 }
  0x86   : > { %2026 = vst.msk [vmem:[#allocation3 + $0x60] sm:$0xf] %vm2000_vm9, %v6545_v0  ;;  %2027 = vst.msk [vmem:[#allocation3 + $0x64] sm:$0xf] %vm2000_vm9, %v6545_v0 }
  0x87   : > { %1342 = vrot.lane.b32.xlu0 %v7010_v5, %s6550_s14  ;;  %v573_v5 = vrot.slane %v571_v9, 7  ;;  %2029 = vst.msk [vmem:[#allocation3 + $0x6c] sm:$0xf] %vm2000_vm9, %v6545_v0  ;;  %2030 = vst.msk [vmem:[#allocation3 + $0x70] sm:$0xf] %vm2000_vm9, %v6545_v0 }
  0x88   : > { %1344 = vrot.lane.b32.xlu1 %v1187_v62, %s6550_s14  ;;  %2032 = vst.msk [vmem:[#allocation3 + $0x78] sm:$0xf] %vm2000_vm9, %v6545_v0  ;;  %2033 = vst.msk [vmem:[#allocation3 + $0x7c] sm:$0xf] %vm2000_vm9, %v6545_v0 }
  0x89   : > { %v576_v17 = vor.u32 %v574_v11, %v573_v5  ;;  %v577_v18 = vrot.slane %v573_v5, 4  ;;  %v1068_v5 = vor.u32 %v1067_v26, %v1063_v3  ;;  %v1072_v11 = vrot.slane %v1070_v6, 1  ;;  %2035 = vst.msk [vmem:[#allocation3 + $0x84] sm:$0xf] %vm2000_vm9, %v6545_v0  ;;  %2036 = vst.msk [vmem:[#allocation3 + $0x88] sm:$0xf] %vm2000_vm9, %v6545_v0 }
  0x8a   : > { %2038 = vst.msk [vmem:[#allocation3 + $0x90] sm:$0xf] %vm2000_vm9, %v6545_v0  ;;  %2039 = vst.msk [vmem:[#allocation3 + $0x94] sm:$0xf] %vm2000_vm9, %v6545_v0 }
  0x8b   : > { %1379 = vrot.lane.b32.xlu0 %v6980_v2, %s6549_s13  ;;  %v582_v2 = vshll.u32 %v311_v7, 16  ;;  %v747_v20 = vsel %vm6767_vm8, %v576_v17, %v746_v19  ;;  %v1198_v19 = vrot.slane %v6408_v63, 1  ;;  %vm1770_vm8 = vcmask 293888   ;;  %v6413_v63 = vld [vmem:[#allocation2 + $0x98] ss:$0 sps:$4 sm:$0x11]  }
  0x8c   : > { %1381 = vrot.lane.b32.xlu1 %v7033_v4, %s6549_s13  ;;  %748 = vst [vmem:[#allocation2 + $0xc0] sm:$0xf] %v747_v20  ;;  %v1094_v6 = vshll.u32 %v6413_v63, 16  ;;  %2041 = vst.msk [vmem:[#allocation3 + $0x9c] sm:$0xf] %vm2000_vm9, %v6545_v0 }
  0x8d   : > { %v584_v49 = vor.u32 %v582_v2, %v581_v15  ;;  %2042 = vst.msk [vmem:[#allocation3 + $0xa0] sm:$0xf] %vm2000_vm9, %v6545_v0  ;;  %2044 = vst.msk [vmem:[#allocation3 + $0xa8] sm:$0xf] %vm2000_vm9, %v6545_v0 }
  0x8e   : > { %2045 = vst.msk [vmem:[#allocation3 + $0xac] sm:$0xf] %vm2000_vm9, %v6545_v0  ;;  %2047 = vst.msk [vmem:[#allocation3 + $0xb4] sm:$0xf] %vm2000_vm9, %v6545_v0 }
  0x8f   : > { %1426 = vrot.lane.b32.xlu0 %v1025_v51, %s6553_s17  ;;  %v585_v22 = vsel %vm6760_vm7, %v577_v18, %v584_v49  ;;  %v1197_v49 = vrot.slane %v7114_v58, 1  ;;  %2048 = vst.msk [vmem:[#allocation3 + $0xb8] sm:$0xf] %vm2000_vm9, %v6545_v0  ;;  %2050 = vst.msk [vmem:[#allocation3 + $0xc0] sm:$0xf] %vm2000_vm9, %v6545_v0 }
  0x90   : > { %1428 = vrot.lane.b32.xlu1 %v1037_v8, %s6553_s17  ;;  %749 = vst.msk [vmem:[#allocation2 + $0xc4] sm:$0xf] %vm224_vm0, %v585_v22  ;;  %vm1650_vm0 = vcmask 195584   ;;  %v6411_v22 = vld [vmem:[#allocation2 + $0x8c] ss:$0 sps:$4 sm:$0x11]  }
  0x91   : > { %v1199_v32 = vsel %vm1166_vm6, %v1197_v49, %v1198_v19  ;;  %v1082_v36 = vshll.u32 %v6411_v22, 16  ;;  %v1201_v55 = vrot.slane %v6411_v22, 1  ;;  %v6467_v49 = vld [vmem:[#allocation2 + $0x24] sm:$0xff]   ;;  %2051 = vst.msk [vmem:[#allocation3 + $0xc4] sm:$0xf] %vm2000_vm9, %v6545_v0 }
  0x92   : > { %2053 = vst.msk [vmem:[#allocation3 + $0xcc] sm:$0xf] %vm2000_vm9, %v6545_v0  ;;  %2054 = vst.msk [vmem:[#allocation3 + $0xd0] sm:$0xf] %vm2000_vm9, %v6545_v0 }
  0x93   : > { %1461 = vrot.lane.b32.xlu0 %v1187_v62, %s6551_s15  ;;  %2007 = vst.msk [vmem:[#allocation3 + $0x14] sm:$0x1] %vm2003_vm10, %v6545_v0  ;;  %2013 = vst.msk [vmem:[#allocation3 + $0x2c] sm:$0x1] %vm2003_vm10, %v6545_v0 }
  0x94   : > { %1146 = vrot.lane.b32.xlu1 %v1025_v51, %s6547_s11  ;;  %v1060_v51 = vrot.slane %v1058_v44, 1  ;;  %2016 = vst.msk [vmem:[#allocation3 + $0x38] sm:$0x1] %vm2003_vm10, %v6545_v0  ;;  %2019 = vst.msk [vmem:[#allocation3 + $0x44] sm:$0x1] %vm2003_vm10, %v6545_v0 }
  0x95   : > { %2022 = vst.msk [vmem:[#allocation3 + $0x50] sm:$0x1] %vm2003_vm10, %v6545_v0  ;;  %2025 = vst.msk [vmem:[#allocation3 + $0x5c] sm:$0x1] %vm2003_vm10, %v6545_v0 }
  0x96   : > { %v1061_v54 = vsel %vm9084_vm5, %v1056_v50, %v1060_v51  ;;  %2028 = vst.msk [vmem:[#allocation3 + $0x68] sm:$0x1] %vm2003_vm10, %v6545_v0  ;;  %2031 = vst.msk [vmem:[#allocation3 + $0x74] sm:$0x1] %vm2003_vm10, %v6545_v0 }
  0x97   : > { %1463 = vrot.lane.b32.xlu0 %v1190_v21, %s6551_s15  ;;  %2034 = vst.msk [vmem:[#allocation3 + $0x80] sm:$0x1] %vm2003_vm10, %v6545_v0  ;;  %2037 = vst.msk [vmem:[#allocation3 + $0x8c] sm:$0x1] %vm2003_vm10, %v6545_v0 }
  0x98   : > { %1148 = vrot.lane.b32.xlu1 %v1037_v8, %s6547_s11  ;;  %2040 = vst.msk [vmem:[#allocation3 + $0x98] sm:$0x1] %vm2003_vm10, %v6545_v0  ;;  %2043 = vst.msk [vmem:[#allocation3 + $0xa4] sm:$0x1] %vm2003_vm10, %v6545_v0 }
  0x99   : > { %2046 = vst.msk [vmem:[#allocation3 + $0xb0] sm:$0x1] %vm2003_vm10, %v6545_v0  ;;  %2049 = vst.msk [vmem:[#allocation3 + $0xbc] sm:$0x1] %vm2003_vm10, %v6545_v0 }
  0x9a   : > { %2052 = vst.msk [vmem:[#allocation3 + $0xc8] sm:$0x1] %vm2003_vm10, %v6545_v0  ;;  %2055 = vst.msk [vmem:[#allocation3 + $0xd4] sm:$0x1] %vm2003_vm10, %v6545_v0 }
  0x9b   : > { %1227 = vrot.lane.b32.xlu0 %v1187_v62, %s6546_s10 }
  0x9c   : > { %1229 = vrot.lane.b32.xlu1 %v1190_v21, %s6546_s10 }
  0x9f   : > { %1264 = vrot.lane.b32.xlu0 %v7033_v4, %s6548_s12 }
  0xa0   : > { %1266 = vrot.lane.b32.xlu1 %v7073_v47, %s6548_s12 }
  0xa3   : > { %1311 = vrot.lane.b32.xlu0 %v1037_v8, %s6552_s16  ;;  %v6465_v8 = vld [vmem:[#allocation2] sm:$0xff]  }
  0xa4   : > { %1313 = vrot.lane.b32.xlu1 %v1049_v46, %s6552_s16 }
  0xa5   : > { %v1216_v45 = vpop.permute.xlu1 %1215 }
  0xa7   : > { %1346 = vrot.lane.b32.xlu0 %v1190_v21, %s6550_s14  ;;  %v1135_v48 = vpop.permute.xlu0 %1134  ;;  %v1073_v21 = vsel %vm9084_vm5, %v1068_v5, %v1072_v11  ;;  %v7178_v5 = vld [vmem:[#allocation2 + $0x9c] sm:$0xff]  }
  0xa8   : > { %1348 = vrot.lane.b32.xlu1 %v1193_v40, %s6550_s14  ;;  %v1487_v9 = vsel %vm1485_vm11, %v6465_v8, %v1135_v48  ;;  %v1101_v22 = vshll.u32 %v7178_v5, 16 }
  0xa9   : > { %v1520_v17 = vsel %vm1518_vm12, %v1487_v9, %v1216_v45  ;;  %v1084_v45 = vrot.slane %v1082_v36, 1 }
  0xaa   : > { %v1103_v36 = vrot.slane %v1101_v22, 1 }
  0xab   : > { %1383 = vrot.lane.b32.xlu0 %v7073_v47, %s6549_s13 }
  0xac   : > { %1385 = vrot.lane.b32.xlu1 %v7091_v35, %s6549_s13  ;;  %v1255_v52 = vpop.permute.xlu1 %1254 }
  0xad   : > { %v1253_v53 = vpop.permute.xlu0 %1252 }
  0xaf   : > { %1430 = vrot.lane.b32.xlu0 %v1049_v46, %s6553_s17 }
  0xb0   : > { %1432 = vrot.lane.b32.xlu1 %v1061_v54, %s6553_s17 }
  0xb1   : > { %v1372_v57 = vpop.permute.xlu0 %1371 }
  0xb2   : > { %v1374_v59 = vpop.permute.xlu1 %1373 }
  0xb3   : > { %1465 = vrot.lane.b32.xlu0 %v1193_v40, %s6551_s15 }
  0xb4   : > { %1150 = vrot.lane.b32.xlu1 %v1049_v46, %s6547_s11  ;;  %v1079_v46 = vrot.slane %v1077_v24, 1 }
  0xb5   : > { %v1335_v62 = vpop.permute.xlu0 %1334 }
  0xb6   : > { %v1218_v37 = vpop.permute.xlu1 %1217  ;;  %v1080_v44 = vor.u32 %v1079_v46, %v1075_v33 }
  0xb7   : > { %1467 = vrot.lane.b32.xlu0 %v1196_v60, %s6551_s15 }
  0xb8   : > { %1152 = vrot.lane.b32.xlu1 %v1061_v54, %s6547_s11 }
  0xb9   : > { %v1454_v1 = vpop.permute.xlu0 %1453 }
  0xba   : > { %v1337_v7 = vpop.permute.xlu1 %1336 }
  0xbb   : > { %1231 = vrot.lane.b32.xlu0 %v1193_v40, %s6546_s10 }
  0xbc   : > { %1233 = vrot.lane.b32.xlu1 %v1196_v60, %s6546_s10 }
  0xbd   : > { %v1137_v10 = vpop.permute.xlu0 %1136 }
  0xbe   : > { %v1302_v14 = vpop.permute.xlu1 %1301  ;;  %v1489_v15 = vsel %vm1485_vm11, %v6810_v29, %v1137_v10  ;;  %v1553_v29 = vsel %vm1551_vm13, %v1520_v17, %v1253_v53  ;;  %v1096_v10 = vrot.slane %v1094_v6, 1 }
  0xbf   : > { %v1522_v2 = vsel %vm1518_vm12, %v1489_v15, %v1218_v37  ;;  %1268 = vrot.lane.b32.xlu0 %v7091_v35, %s6548_s12 }
  0xc0   : > { %v1555_v18 = vsel %vm1551_vm13, %v1522_v2, %v1255_v52  ;;  %1270 = vrot.lane.b32.xlu1 %v7114_v58, %s6548_s12  ;;  %v1085_v52 = vsel %vm9084_vm5, %v1080_v44, %v1084_v45 }
  0xc1   : > { %v1588_v20 = vsel %vm1584_vm14, %v1555_v18, %v1302_v14  ;;  %v1300_v12 = vpop.permute.xlu0 %1299  ;;  %v6466_v14 = vld [vmem:[#allocation2 + $0x18] sm:$0xff]   ;;  %v1204_v18 = vrot.slane %v6413_v63, 1 }
  0xc2   : > { %v1421_v25 = vpop.permute.xlu1 %1420  ;;  %v1586_v27 = vsel %vm1584_vm14, %v1553_v29, %v1300_v12  ;;  %v1621_v28 = vsel %vm1617_vm15, %v1588_v20, %v1337_v7 }
  0xc3   : > { %v1619_v23 = vsel %vm1617_vm15, %v1586_v27, %v1335_v62  ;;  %1315 = vrot.lane.b32.xlu0 %v1061_v54, %s6552_s16  ;;  %v1654_v38 = vsel %vm1650_vm0, %v1621_v28, %v1374_v59  ;;  %v1200_v54 = vrot.slane %v7126_v13, 1 }
  0xc4   : > { %1317 = vrot.lane.b32.xlu1 %v1073_v21, %s6552_s16  ;;  %v1652_v30 = vsel %vm1650_vm0, %v1619_v23, %v1372_v57  ;;  %v1687_v41 = vsel %vm1683_vm1, %v1654_v38, %v1421_v25  ;;  %v7167_v57 = vld [vmem:[#allocation2 + $0x90] sm:$0xff]  }
  0xc5   : > { %v1419_v31 = vpop.permute.xlu0 %1418  ;;  %v1089_v42 = vshll.u32 %v7167_v57, 16  ;;  %v1087_v3 = vshrl.u32 %v7167_v57, 16  ;;  %v1203_v17 = vrot.slane %v7167_v57, 1 }
  0xc6   : > { %v1139_v61 = vpop.permute.xlu1 %1138  ;;  %v1685_v39 = vsel %vm1683_vm1, %v1652_v30, %v1419_v31  ;;  %v1099_v31 = vshrl.u32 %v7178_v5, 16 }
  0xc7   : > { %1350 = vrot.lane.b32.xlu0 %v1196_v60, %s6550_s14  ;;  %v1718_v40 = vsel %vm1716_vm3, %v1685_v39, %v1454_v1  ;;  %v1202_v60 = vsel %vm1166_vm6, %v1200_v54, %v1201_v55  ;;  %v1091_v26 = vrot.slane %v1089_v42, 1  ;;  %v1491_v15 = vsel %vm1485_vm11, %v6466_v14, %v1139_v61 }
  0xc8   : > { %1352 = vrot.lane.b32.xlu1 %v1199_v32, %s6550_s14  ;;  %6255 = vmatprep.mubr.msk.bf16.mxu0 %vm1770_vm8, %v1718_v40  ;;  %v1205_v30 = vsel %vm1166_vm6, %v1203_v17, %v1204_v18  ;;  %v6468_v18 = vld [vmem:[#allocation2 + $0x30] sm:$0xff]  }
  0xc9   : > { %v1456_v43 = vpop.permute.xlu0 %1455  ;;  %v1092_v9 = vor.u32 %v1091_v26, %v1087_v3 }
  0xca   : > { %v1141_v48 = vpop.permute.xlu1 %1140  ;;  %v1720_v50 = vsel %vm1716_vm3, %v1687_v41, %v1456_v43 }
  0xcb   : > { %1387 = vrot.lane.b32.xlu0 %v7114_v58, %s6549_s13  ;;  %6256 = vmatmul.mubr.msk.bf16.vlgmr.msra.gmra.mxu0 %vm1770_vm8, %v1720_v50  ;;  %v1493_v19 = vsel %vm1485_vm11, %v6467_v49, %v1141_v48  ;;  %v1097_v12 = vsel %vm9084_vm5, %v1092_v9, %v1096_v10  ;;  %v1104_v48 = vor.u32 %v1103_v36, %v1099_v31 }
  0xcc   : > { %1389 = vrot.lane.b32.xlu1 %v7126_v13, %s6549_s13 }
  0xcd   : > { %v1220_v51 = vpop.permute.xlu0 %1219 }
  0xce   : > { %v1222_v53 = vpop.permute.xlu1 %1221  ;;  %v1524_v2 = vsel %vm1518_vm12, %v1491_v15, %v1220_v51 }
  0xcf   : > { %1434 = vrot.lane.b32.xlu0 %v1073_v21, %s6553_s17  ;;  %v1526_v28 = vsel %vm1518_vm12, %v1493_v19, %v1222_v53 }
  0xd0   : > { %1436 = vrot.lane.b32.xlu1 %v1085_v52, %s6553_s17 }
  0xd1   : > { %v1257_v56 = vpop.permute.xlu0 %1256 }
  0xd2   : > { %v1259_v59 = vpop.permute.xlu1 %1258  ;;  %v1557_v29 = vsel %vm1551_vm13, %v1524_v2, %v1257_v56  ;;  %v1206_v56 = vrot.slane %v7178_v5, 1  ;;  %v7230_v2 = vld [vmem:[#allocation2 + $0xb4] sm:$0xff]  }
  0xd3   : > { %1469 = vrot.lane.b32.xlu0 %v1199_v32, %s6551_s15 }
  0xd4   : > { %1154 = vrot.lane.b32.xlu1 %v1073_v21, %s6547_s11  ;;  %v6415_v21 = vld [vmem:[#allocation2 + $0xa4] ss:$0 sps:$4 sm:$0x11]  }
  0xd5   : > { %v1304_v62 = vpop.permute.xlu0 %1303  ;;  %v1106_v38 = vshll.u32 %v6415_v21, 16 }
  0xd6   : > { %v1306_v37 = vpop.permute.xlu1 %1305  ;;  %v1590_v24 = vsel %vm1584_vm14, %v1557_v29, %v1304_v62  ;;  %v7219_v62 = vld [vmem:[#allocation2 + $0xa8] sm:$0xff]  }
  0xd7   : > { %1471 = vrot.lane.b32.xlu0 %v1202_v60, %s6551_s15  ;;  %v1108_v50 = vrot.slane %v1106_v38, 1  ;;  %v1113_v3 = vshll.u32 %v7219_v62, 16  ;;  %v1209_v29 = vrot.slane %v7219_v62, 1 }
  0xd8   : > { %1156 = vrot.lane.b32.xlu1 %v1085_v52, %s6547_s11 }
  0xd9   : > { %v1339_v1 = vpop.permute.xlu0 %1338  ;;  %v1109_v54 = vsel %vm9084_vm5, %v1104_v48, %v1108_v50 }
  0xda   : > { %v1341_v7 = vpop.permute.xlu1 %1340  ;;  %v1623_v27 = vsel %vm1617_vm15, %v1590_v24, %v1339_v1  ;;  %v6417_v1 = vld [vmem:[#allocation2 + $0xb0] ss:$0 sps:$4 sm:$0x11]  }
  0xdb   : > { %1235 = vrot.lane.b32.xlu0 %v1199_v32, %s6546_s10  ;;  %v1559_v32 = vsel %vm1551_vm13, %v1526_v28, %v1259_v59  ;;  %v1207_v59 = vrot.slane %v6415_v21, 1  ;;  %v1118_v9 = vshll.u32 %v6417_v1, 16 }
  0xdc   : > { %1237 = vrot.lane.b32.xlu1 %v1202_v60, %s6546_s10  ;;  %v1592_v61 = vsel %vm1584_vm14, %v1559_v32, %v1306_v37 }
  0xdd   : > { %v1376_v8 = vpop.permute.xlu0 %1375  ;;  %v1625_v41 = vsel %vm1617_vm15, %v1592_v61, %v1341_v7  ;;  %v1208_v42 = vsel %vm1166_vm6, %v1206_v56, %v1207_v59  ;;  %v1111_v7 = vshrl.u32 %v7219_v62, 16  ;;  %v1120_v15 = vrot.slane %v1118_v9, 1 }
  0xde   : > { %v1378_v11 = vpop.permute.xlu1 %1377  ;;  %v1656_v23 = vsel %vm1650_vm0, %v1623_v27, %v1376_v8  ;;  %v1115_v8 = vrot.slane %v1113_v3, 1  ;;  %v1125_v27 = vshll.u32 %v7230_v2, 16 }
  0xdf   : > { %1272 = vrot.lane.b32.xlu0 %v7126_v13, %s6548_s12  ;;  %v1658_v43 = vsel %vm1650_vm0, %v1625_v41, %v1378_v11 }
  0xe0   : > { %1274 = vrot.lane.b32.xlu1 %v7167_v57, %s6548_s12  ;;  %v1116_v14 = vor.u32 %v1115_v8, %v1111_v7  ;;  %v1127_v61 = vrot.slane %v1125_v27, 1 }
  0xe1   : > { %v1423_v20 = vpop.permute.xlu0 %1422 }
  0xe2   : > { %v1425_v25 = vpop.permute.xlu1 %1424  ;;  %v1689_v33 = vsel %vm1683_vm1, %v1656_v23, %v1423_v20  ;;  %v1210_v20 = vrot.slane %v6417_v1, 1  ;;  %v7243_v24 = vsel %vm9084_vm5, %v1116_v14, %v1120_v15 }
  0xe3   : > { %1319 = vrot.lane.b32.xlu0 %v1085_v52, %s6552_s16  ;;  %v1691_v44 = vsel %vm1683_vm1, %v1658_v43, %v1425_v25  ;;  %v7245_v25 = vld [vmem:[#allocation2 + $0xbc] ss:$0 sps:$4 sm:$0x11]  }
  0xe4   : > { %1321 = vrot.lane.b32.xlu1 %v1097_v12, %s6552_s16  ;;  %v7256_v32 = vsel %vm1166_vm6, %v1209_v29, %v1210_v20  ;;  %v6469_v29 = vld [vmem:[#allocation2 + $0x48] sm:$0xff]  }
  0xe5   : > { %v1458_v46 = vpop.permute.xlu0 %1457 }
  0xe6   : > { %v1143_v39 = vpop.permute.xlu1 %1142  ;;  %v1722_v40 = vsel %vm1716_vm3, %v1689_v33, %v1458_v46  ;;  %v1123_v33 = vshrl.u32 %v7230_v2, 16 }
  0xe7   : > { %1354 = vrot.lane.b32.xlu0 %v1202_v60, %s6550_s14  ;;  %6259 = vmatprep.mubr.msk.bf16.mxu0 %vm1770_vm8, %v1722_v40  ;;  %v1495_v49 = vsel %vm1485_vm11, %v6468_v18, %v1143_v39  ;;  %v1130_v39 = vshll.u32 %v7245_v25, 16 }
  0xe8   : > { %1356 = vrot.lane.b32.xlu1 %v1205_v30, %s6550_s14 }
  0xe9   : > { %v1460_v45 = vpop.permute.xlu0 %1459 }
  0xea   : > { %v1145_v51 = vpop.permute.xlu1 %1144  ;;  %v1724_v52 = vsel %vm1716_vm3, %v1691_v44, %v1460_v45 }
  0xeb   : > { %1391 = vrot.lane.b32.xlu0 %v7167_v57, %s6549_s13  ;;  %6260 = vmatmul.mubr.msk.bf16.gmra.mxu0 %vm1770_vm8, %v1724_v52  ;;  %v1132_v52 = vrot.slane %v1130_v39, 1 }
  0xec   : > { %1393 = vrot.lane.b32.xlu1 %v7178_v5, %s6549_s13 }
  0xed   : > { %v1224_v53 = vpop.permute.xlu0 %1223 }
  0xee   : > { %v1226_v55 = vpop.permute.xlu1 %1225  ;;  %v1528_v19 = vsel %vm1518_vm12, %v1495_v49, %v1224_v53  ;;  %v7417_v49 = vld [vmem:[#allocation2 + $0xcc] sm:$0xff]  }
  0xef   : > { %1438 = vrot.lane.b32.xlu0 %v1097_v12, %s6553_s17 }
  0xf0   : > { %1440 = vrot.lane.b32.xlu1 %v1109_v54, %s6553_s17 }
  0xf1   : > { %v1261_v60 = vpop.permute.xlu0 %1260 }
  0xf2   : > { %v1263_v63 = vpop.permute.xlu1 %1262  ;;  %v1561_v21 = vsel %vm1551_vm13, %v1528_v19, %v1261_v60  ;;  %v1212_v60 = vrot.slane %v7230_v2, 1 }
  0xf3   : > { %1473 = vrot.lane.b32.xlu0 %v1205_v30, %s6551_s15 }
  0xf4   : > { %1158 = vrot.lane.b32.xlu1 %v1097_v12, %s6547_s11  ;;  %v1497_v12 = vsel %vm1485_vm11, %v6917_v34, %v1145_v51  ;;  %v1128_v51 = vor.u32 %v1127_v61, %v1123_v33 }
  0xf5   : > { %v1308_v37 = vpop.permute.xlu0 %1307  ;;  %v1530_v31 = vsel %vm1518_vm12, %v1497_v12, %v1226_v55 }
  0xf6   : > { %v1310_v26 = vpop.permute.xlu1 %1309  ;;  %v1594_v28 = vsel %vm1584_vm14, %v1561_v21, %v1308_v37  ;;  %v1563_v46 = vsel %vm1551_vm13, %v1530_v31, %v1263_v63  ;;  %v7284_v56 = vsel %vm9084_vm5, %v1128_v51, %v1132_v52  ;;  %v1213_v63 = vrot.slane %v7245_v25, 1  ;;  %v7366_v37 = vld [vmem:[#allocation2 + $0xc0] sm:$0xff]  }
  0xf7   : > { %1475 = vrot.lane.b32.xlu0 %v1208_v42, %s6551_s15  ;;  %v1596_v40 = vsel %vm1584_vm14, %v1563_v46, %v1310_v26  ;;  %v1290_v7 = vshll.u32 %v7366_v37, 16  ;;  %v1288_v9 = vshrl.u32 %v7366_v37, 16  ;;  %v1331_v21 = vrot.slane %v7366_v37, 1  ;;  %v6425_v52 = vld [vmem:[#allocation3 + $0x8] ss:$0 sps:$4 sm:$0x11]  }
  0xf8   : > { %1160 = vrot.lane.b32.xlu1 %v1109_v54, %s6547_s11  ;;  %v1214_v3 = vsel %vm1166_vm6, %v1212_v60, %v1213_v63 }
  0xf9   : > { %v1343_v6 = vpop.permute.xlu0 %1342 }
  0xfa   : > { %v1345_v10 = vpop.permute.xlu1 %1344 }
  0xfb   : > { %1239 = vrot.lane.b32.xlu0 %v1205_v30, %s6546_s10  ;;  %v1627_v30 = vsel %vm1617_vm15, %v1594_v28, %v1343_v6  ;;  %v1629_v44 = vsel %vm1617_vm15, %v1596_v40, %v1345_v10  ;;  %v6421_v6 = vld [vmem:[#allocation2 + $0xc8] ss:$0 sps:$4 sm:$0x11]   ;;  %v1292_v10 = vrot.slane %v1290_v7, 1  ;;  %v1450_v7 = vrot.slane %v7417_v49, 1 }
  0xfc   : > { %1241 = vrot.lane.b32.xlu1 %v1208_v42, %s6546_s10 }
  0xfd   : > { %v1380_v11 = vpop.permute.xlu0 %1379 }
  0xfe   : > { %v1382_v17 = vpop.permute.xlu1 %1381  ;;  %v1660_v34 = vsel %vm1650_vm0, %v1627_v30, %v1380_v11  ;;  %v1295_v11 = vshll.u32 %v6421_v6, 16  ;;  %v1409_v30 = vshll.u32 %v7417_v49, 16 }
  0xff   : > { %1276 = vrot.lane.b32.xlu0 %v7178_v5, %s6548_s12  ;;  %v1662_v45 = vsel %vm1650_vm0, %v1629_v44, %v1382_v17  ;;  %v1293_v17 = vor.u32 %v1292_v10, %v1288_v9 }
 0x100   : > { %1278 = vrot.lane.b32.xlu1 %v7219_v62, %s6548_s12  ;;  %v1297_v18 = vrot.slane %v1295_v11, 1 }
 0x101   : > { %v1427_v22 = vpop.permute.xlu0 %1426 }
 0x102   : > { %v1429_v23 = vpop.permute.xlu1 %1428  ;;  %v1693_v36 = vsel %vm1683_vm1, %v1660_v34, %v1427_v22  ;;  %v1332_v22 = vrot.slane %v6421_v6, 1  ;;  %v1298_v28 = vsel %vm9084_vm5, %v1293_v17, %v1297_v18  ;;  %v3006_v18 = vrot.slane %v6425_v52, 1 }
 0x103   : > { %1323 = vrot.lane.b32.xlu0 %v1109_v54, %s6552_s16  ;;  %v1695_v48 = vsel %vm1683_vm1, %v1662_v45, %v1429_v23  ;;  %v6423_v23 = vld [vmem:[#allocation2 + $0xd4] ss:$0 sps:$4 sm:$0x11]  }
 0x104   : > { %1325 = vrot.lane.b32.xlu1 %v7243_v24, %s6552_s16  ;;  %v1333_v46 = vsel %vm1166_vm6, %v1331_v21, %v1332_v22 }
 0x105   : > { %v1462_v38 = vpop.permute.xlu0 %1461 }
 0x106   : > { %v7263_v41 = vpop.permute.xlu1 %1146  ;;  %v1726_v43 = vsel %vm1716_vm3, %v1693_v36, %v1462_v38  ;;  %v1407_v36 = vshrl.u32 %v7417_v49, 16  ;;  %v6424_v38 = vld [vmem:[#allocation3] sm:$0xff]  }
 0x107   : > { %1358 = vrot.lane.b32.xlu0 %v1208_v42, %s6550_s14  ;;  %6263 = vmatprep.mubr.msk.bf16.mxu0 %vm1770_vm8, %v1726_v43  ;;  %v1499_v20 = vsel %vm1485_vm11, %v6469_v29, %v7263_v41  ;;  %v1411_v41 = vrot.slane %v1409_v30, 1  ;;  %v1414_v43 = vshll.u32 %v6423_v23, 16  ;;  %v3005_v17 = vrot.slane %v6424_v38, 1 }
 0x108   : > { %1360 = vrot.lane.b32.xlu1 %v7256_v32, %s6550_s14 }
 0x109   : > { %v1464_v50 = vpop.permute.xlu0 %1463  ;;  %v3007_v29 = vsel %vm1166_vm6, %v3005_v17, %v3006_v18 }
 0x10a   : > { %v7273_v53 = vpop.permute.xlu1 %1148  ;;  %v1728_v54 = vsel %vm1716_vm3, %v1695_v48, %v1464_v50 }
 0x10b   : > { %1395 = vrot.lane.b32.xlu0 %v7219_v62, %s6549_s13  ;;  %6264 = vmatmul.mubr.msk.bf16.gmra.mxu0 %vm1770_vm8, %v1728_v54 }
 0x10c   : > { %1397 = vrot.lane.b32.xlu1 %v7230_v2, %s6549_s13 }
 0x10d   : > { %v7281_v55 = vpop.permute.xlu0 %1227 }
 0x10e   : > { %v7286_v59 = vpop.permute.xlu1 %1229  ;;  %v1532_v12 = vsel %vm1518_vm12, %v1499_v20, %v7281_v55 }
 0x10f   : > { %1442 = vrot.lane.b32.xlu0 %v7243_v24, %s6553_s17 }
 0x110   : > { %1444 = vrot.lane.b32.xlu1 %v7284_v56, %s6553_s17 }
 0x111   : > { %v1265_v42 = vpop.permute.xlu0 %1264 }
 0x112   : > { %v1267_v1 = vpop.permute.xlu1 %1266  ;;  %v1565_v25 = vsel %vm1551_vm13, %v1532_v12, %v1265_v42  ;;  %v2782_v42 = vshrl.u32 %v6424_v38, 16 }
 0x113   : > { %1477 = vrot.lane.b32.xlu0 %v7256_v32, %s6551_s15 }
 0x114   : > { %1162 = vrot.lane.b32.xlu1 %v7243_v24, %s6547_s11  ;;  %v1501_v24 = vsel %vm1485_vm11, %v7033_v4, %v7273_v53  ;;  %v2784_v53 = vshll.u32 %v6424_v38, 16 }
 0x115   : > { %v1312_v26 = vpop.permute.xlu0 %1311  ;;  %v1534_v33 = vsel %vm1518_vm12, %v1501_v24, %v7286_v59  ;;  %v1416_v59 = vrot.slane %v1414_v43, 1 }
 0x116   : > { %v1314_v8 = vpop.permute.xlu1 %1313  ;;  %v1598_v31 = vsel %vm1584_vm14, %v1565_v25, %v1312_v26  ;;  %v1567_v61 = vsel %vm1551_vm13, %v1534_v33, %v1267_v1  ;;  %v2786_v1 = vrot.slane %v2784_v53, 1 }
 0x117   : > { %1479 = vrot.lane.b32.xlu0 %v1214_v3, %s6551_s15  ;;  %v1600_v44 = vsel %vm1584_vm14, %v1567_v61, %v1314_v8  ;;  %v1451_v8 = vrot.slane %v6423_v23, 1 }
 0x118   : > { %1164 = vrot.lane.b32.xlu1 %v7284_v56, %s6547_s11  ;;  %s6554_s11 = smov 48  }
 0x119   : > { %v1347_v0 = vpop.permute.xlu0 %1346  ;;  %v1452_v11 = vsel %vm1166_vm6, %v1450_v7, %v1451_v8 }
 0x11a   : > { %v1349_v14 = vpop.permute.xlu1 %1348 }
 0x11b   : > { %1243 = vrot.lane.b32.xlu0 %v7256_v32, %s6546_s10  ;;  %v1631_v32 = vsel %vm1617_vm15, %v1598_v31, %v1347_v0  ;;  %v1633_v50 = vsel %vm1617_vm15, %v1600_v44, %v1349_v14 }
 0x11c   : > { %1245 = vrot.lane.b32.xlu1 %v1214_v3, %s6546_s10 }
 0x11d   : > { %v1384_v15 = vpop.permute.xlu0 %1383 }
 0x11e   : > { %v1386_v19 = vpop.permute.xlu1 %1385  ;;  %v1664_v4 = vsel %vm1650_vm0, %v1631_v32, %v1384_v15 }
 0x11f   : > { %1280 = vrot.lane.b32.xlu0 %v7230_v2, %s6548_s12  ;;  %v1666_v51 = vsel %vm1650_vm0, %v1633_v50, %v1386_v19 }
 0x120   : > { %1282 = vrot.lane.b32.xlu1 %v7366_v37, %s6548_s12  ;;  %s6555_s12 = smov 40  }
 0x121   : > { %v1431_v27 = vpop.permute.xlu0 %1430 }
 0x122   : > { %v1433_v34 = vpop.permute.xlu1 %1432  ;;  %v1697_v39 = vsel %vm1683_vm1, %v1664_v4, %v1431_v27 }
 0x123   : > { %1327 = vrot.lane.b32.xlu0 %v7284_v56, %s6552_s16  ;;  %v1699_v54 = vsel %vm1683_vm1, %v1666_v51, %v1433_v34  ;;  %v1412_v56 = vor.u32 %v1411_v41, %v1407_v36 }
 0x124   : > { %1329 = vrot.lane.b32.xlu1 %v1298_v28, %s6552_s16 }
 0x125   : > { %v1466_v40 = vpop.permute.xlu0 %1465  ;;  %v1417_v6 = vsel %vm9084_vm5, %v1412_v56, %v1416_v59 }
 0x126   : > { %v1151_v45 = vpop.permute.xlu1 %1150  ;;  %v1730_v48 = vsel %vm1716_vm3, %v1697_v39, %v1466_v40 }
 0x127   : > { %1362 = vrot.lane.b32.xlu0 %v1214_v3, %s6550_s14  ;;  %6267 = vmatprep.mubr.msk.bf16.mxu0 %vm1770_vm8, %v1730_v48  ;;  %v2789_v3 = vshll.u32 %v6425_v52, 16  ;;  %v1503_v24 = vsel %vm1485_vm11, %v7073_v47, %v1151_v45 }
 0x128   : > { %1364 = vrot.lane.b32.xlu1 %v1333_v46, %s6550_s14  ;;  %s6556_s14 = smov 64  }
 0x129   : > { %v1468_v55 = vpop.permute.xlu0 %1467  ;;  %v2791_v9 = vrot.slane %v2789_v3, 1 }
 0x12a   : > { %v1153_v60 = vpop.permute.xlu1 %1152  ;;  %v1732_v63 = vsel %vm1716_vm3, %v1699_v54, %v1468_v55 }
 0x12b   : > { %1399 = vrot.lane.b32.xlu0 %v7366_v37, %s6549_s13  ;;  %6268 = vmatmul.mubr.msk.bf16.gmra.mxu0 %vm1770_vm8, %v1732_v63  ;;  %v2787_v37 = vor.u32 %v2786_v1, %v2782_v42  ;;  %v1505_v27 = vsel %vm1485_vm11, %v7091_v35, %v1153_v60 }
 0x12c   : > { %1401 = vrot.lane.b32.xlu1 %v7417_v49, %s6549_s13 }
 0x12d   : > { %v1232_v26 = vpop.permute.xlu0 %1231  ;;  %v2792_v15 = vsel %vm9084_vm5, %v2787_v37, %v2791_v9  ;;  %vm7548_vm5 = vmand %vm2000_vm9, %vm637_vm4 }
 0x12e   : > { %v1234_v0 = vpop.permute.xlu1 %1233  ;;  %v1536_v25 = vsel %vm1518_vm12, %v1503_v24, %v1232_v26  ;;  %vm7556_vm4 = vmand %vm2003_vm10, %vm312_vm2  ;;  %vm9102_vm2 = vsmask.f32 7424 }
 0x12f   : > { %1446 = vrot.lane.b32.xlu0 %v1298_v28, %s6553_s17  ;;  %v1538_v32 = vsel %vm1518_vm12, %v1505_v27, %v1234_v0 }
 0x130   : > { %1448 = vrot.lane.b32.xlu1 %v1417_v6, %s6553_s17  ;;  %s6557_s17 = smov 56  }
 0x131   : > { %v1269_v10 = vpop.permute.xlu0 %1268 }
 0x132   : > { %v1271_v14 = vpop.permute.xlu1 %1270  ;;  %v1569_v28 = vsel %vm1551_vm13, %v1536_v25, %v1269_v10 }
 0x133   : > { %1481 = vrot.lane.b32.xlu0 %v1333_v46, %s6551_s15  ;;  %v1571_v4 = vsel %vm1551_vm13, %v1538_v32, %v1271_v14 }
 0x134   : > { %1483 = vrot.lane.b32.xlu1 %v1452_v11, %s6551_s15 }
 0x135   : > { %v1316_v49 = vpop.permute.xlu0 %1315 }
 0x136   : > { %v1318_v19 = vpop.permute.xlu1 %1317  ;;  %v1602_v30 = vsel %vm1584_vm14, %v1569_v28, %v1316_v49 }
 0x137   : > { %2973 = vrot.lane.b32.xlu0 %v2792_v15, %s6546_s10  ;;  %v1604_v36 = vsel %vm1584_vm14, %v1571_v4, %v1318_v19 }
 0x139   : > { %v1351_v20 = vpop.permute.xlu0 %1350 }
 0x13a   : > { %v1353_v12 = vpop.permute.xlu1 %1352  ;;  %v1635_v34 = vsel %vm1617_vm15, %v1602_v30, %v1351_v20 }
 0x13b   : > { %3053 = vrot.lane.b32.xlu0 %v3007_v29, %s6552_s16  ;;  %v1637_v61 = vsel %vm1617_vm15, %v1604_v36, %v1353_v12 }
 0x13d   : > { %v1388_v21 = vpop.permute.xlu0 %1387 }
 0x13e   : > { %v1390_v22 = vpop.permute.xlu1 %1389  ;;  %v1668_v33 = vsel %vm1650_vm0, %v1635_v34, %v1388_v21 }
 0x13f   : > { %v1670_v39 = vsel %vm1650_vm0, %v1637_v61, %v1390_v22 }
 0x141   : > { %v1435_v23 = vpop.permute.xlu0 %1434 }
 0x142   : > { %v1437_v31 = vpop.permute.xlu1 %1436  ;;  %v1701_v47 = vsel %vm1683_vm1, %v1668_v33, %v1435_v23 }
 0x143   : > { %v1703_v40 = vsel %vm1683_vm1, %v1670_v39, %v1437_v31 }
 0x145   : > { %v1470_v46 = vpop.permute.xlu0 %1469 }
 0x146   : > { %v1155_v35 = vpop.permute.xlu1 %1154  ;;  %v1734_v38 = vsel %vm1716_vm3, %v1701_v47, %v1470_v46 }
 0x147   : > { %6271 = vmatprep.mubr.msk.bf16.mxu0 %vm1770_vm8, %v1734_v38  ;;  %v1507_v60 = vsel %vm1485_vm11, %v7114_v58, %v1155_v35 }
 0x149   : > { %v1472_v41 = vpop.permute.xlu0 %1471 }
 0x14a   : > { %v1157_v43 = vpop.permute.xlu1 %1156  ;;  %v1736_v44 = vsel %vm1716_vm3, %v1703_v40, %v1472_v41 }
 0x14b   : > { %6272 = vmatmul.mubr.msk.bf16.gmra.mxu0 %vm1770_vm8, %v1736_v44  ;;  %v1509_v42 = vsel %vm1485_vm11, %v7126_v13, %v1157_v43 }
 0x14d   : > { %v1236_v45 = vpop.permute.xlu0 %1235 }
 0x14e   : > { %v1238_v48 = vpop.permute.xlu1 %1237  ;;  %v1540_v63 = vsel %vm1518_vm12, %v1507_v60, %v1236_v45 }
 0x14f   : > { %v1542_v8 = vsel %vm1518_vm12, %v1509_v42, %v1238_v48  ;;  %v7534_v48 = vld [vmem:[%s9080_s2] ss:$0 sm:$0xff] }
 0x151   : > { %v1273_v50 = vpop.permute.xlu0 %1272 }
 0x152   : > { %v1275_v51 = vpop.permute.xlu1 %1274  ;;  %v1573_v1 = vsel %vm1551_vm13, %v1540_v63, %v1273_v50 }
 0x153   : > { %v1575_v37 = vsel %vm1551_vm13, %v1542_v8, %v1275_v51 }
 0x155   : > { %v1320_v52 = vpop.permute.xlu0 %1319 }
 0x156   : > { %v1322_v53 = vpop.permute.xlu1 %1321  ;;  %v1606_v26 = vsel %vm1584_vm14, %v1573_v1, %v1320_v52 }
 0x157   : > { %v1608_v10 = vsel %vm1584_vm14, %v1575_v37, %v1322_v53 }
 0x159   : > { %v1355_v54 = vpop.permute.xlu0 %1354 }
 0x15a   : > { %v1357_v55 = vpop.permute.xlu1 %1356  ;;  %v1639_v7 = vsel %vm1617_vm15, %v1606_v26, %v1355_v54 }
 0x15b   : > { %v1641_v14 = vsel %vm1617_vm15, %v1608_v10, %v1357_v55 }
 0x15d   : > { %v1392_v56 = vpop.permute.xlu0 %1391 }
 0x15e   : > { %v1394_v59 = vpop.permute.xlu1 %1393  ;;  %v1672_v0 = vsel %vm1650_vm0, %v1639_v7, %v1392_v56 }
 0x15f   : > { %v1674_v15 = vsel %vm1650_vm0, %v1641_v14, %v1394_v59 }
 0x161   : > { %v1439_v3 = vpop.permute.xlu0 %1438 }
 0x162   : > { %v1441_v6 = vpop.permute.xlu1 %1440  ;;  %v1705_v58 = vsel %vm1683_vm1, %v1672_v0, %v1439_v3 }
 0x163   : > { %v1707_v17 = vsel %vm1683_vm1, %v1674_v15, %v1441_v6  ;;  %v2484_v15 = vld [vmem:[#allocation3 + $0x18] sm:$0xf] }
 0x165   : > { %v1474_v9 = vpop.permute.xlu0 %1473 }
 0x166   : > { %v1159_v13 = vpop.permute.xlu1 %1158  ;;  %v1738_v11 = vsel %vm1716_vm3, %v1705_v58, %v1474_v9 }
 0x167   : > { %6275 = vmatprep.mubr.msk.bf16.mxu0 %vm1770_vm8, %v1738_v11  ;;  %v1511_v30 = vsel %vm1485_vm11, %v7167_v57, %v1159_v13 }
 0x169   : > { %v1476_v18 = vpop.permute.xlu0 %1475 }
 0x16a   : > { %v1161_v49 = vpop.permute.xlu1 %1160  ;;  %v1740_v19 = vsel %vm1716_vm3, %v1707_v17, %v1476_v18 }
 0x16b   : > { %6276 = vmatmul.mubr.msk.bf16.gmra.mxu0 %vm1770_vm8, %v1740_v19  ;;  %v1513_v34 = vsel %vm1485_vm11, %v7178_v5, %v1161_v49 }
 0x16d   : > { %v1240_v29 = vpop.permute.xlu0 %1239 }
 0x16e   : > { %v1242_v20 = vpop.permute.xlu1 %1241  ;;  %v1544_v31 = vsel %vm1518_vm12, %v1511_v30, %v1240_v29  ;;  %v2488_v30 = vld [vmem:[#allocation3 + $0x20] sm:$0x1] }
 0x16f   : > { %v1546_v36 = vsel %vm1518_vm12, %v1513_v34, %v1242_v20 }
 0x171   : > { %v1277_v12 = vpop.permute.xlu0 %1276 }
 0x172   : > { %v1279_v21 = vpop.permute.xlu1 %1278  ;;  %v1577_v32 = vsel %vm1551_vm13, %v1544_v31, %v1277_v12 }
 0x173   : > { %v1579_v38 = vsel %vm1551_vm13, %v1546_v36, %v1279_v21  ;;  %v2475_v21 = vld [vmem:[#allocation3 + $0xc] sm:$0xf] }
 0x175   : > { %v1324_v22 = vpop.permute.xlu0 %1323 }
 0x176   : > { %v1326_v24 = vpop.permute.xlu1 %1325  ;;  %v1610_v4 = vsel %vm1584_vm14, %v1577_v32, %v1324_v22 }
 0x177   : > { %v1612_v39 = vsel %vm1584_vm14, %v1579_v38, %v1326_v24 }
 0x179   : > { %v1359_v25 = vpop.permute.xlu0 %1358 }
 0x17a   : > { %v1361_v27 = vpop.permute.xlu1 %1360  ;;  %v1643_v46 = vsel %vm1617_vm15, %v1610_v4, %v1359_v25 }
 0x17b   : > { %v1645_v41 = vsel %vm1617_vm15, %v1612_v39, %v1361_v27 }
 0x17d   : > { %v1396_v28 = vpop.permute.xlu0 %1395 }
 0x17e   : > { %v1398_v23 = vpop.permute.xlu1 %1397  ;;  %v1676_v35 = vsel %vm1650_vm0, %v1643_v46, %v1396_v28 }
 0x17f   : > { %v1678_v43 = vsel %vm1650_vm0, %v1645_v41, %v1398_v23 }
 0x181   : > { %v1443_v33 = vpop.permute.xlu0 %1442 }
 0x182   : > { %v1445_v47 = vpop.permute.xlu1 %1444  ;;  %v1709_v57 = vsel %vm1683_vm1, %v1676_v35, %v1443_v33 }
 0x183   : > { %v1711_v44 = vsel %vm1683_vm1, %v1678_v43, %v1445_v47 }
 0x185   : > { %v1478_v61 = vpop.permute.xlu0 %1477 }
 0x186   : > { %v7524_v5 = vpop.permute.xlu1 %1162  ;;  %v1742_v40 = vsel %vm1716_vm3, %v1709_v57, %v1478_v61  ;;  %v2481_v61 = vld [vmem:[#allocation3 + $0x14] sm:$0x1] }
 0x187   : > { %6279 = vmatprep.mubr.msk.bf16.mxu0 %vm1770_vm8, %v1742_v40 }
 0x189   : > { %v1480_v45 = vpop.permute.xlu0 %1479 }
 0x18a   : > { %v7536_v50 = vpop.permute.xlu1 %1164  ;;  %v1744_v51 = vsel %vm1716_vm3, %v1711_v44, %v1480_v45 }
 0x18b   : > { %v6257_v52 = vpop.f32.mrf.mxu0  ;;  %6280 = vmatmul.mubr.msk.bf16.gmra.mxu0 %vm1770_vm8, %v1744_v51  ;;  %v1517_v44 = vsel %vm1485_vm11, %v7230_v2, %v7536_v50  ;;  %v1515_v51 = vsel %vm1485_vm11, %v7219_v62, %v7524_v5  ;;  %vm9103_vm11 = vmmov %vm9102_vm2 }
 0x18c   : > { %v1850_v53 = vadd.f32 %v6257_v52, %v7534_v48 }
 0x18d   : > { %v1841_v54 = vpop.f32.mrf.mxu0  ;;  %v1244_v55 = vpop.permute.xlu0 %1243 }
 0x18e   : > { %v1970_v56 = vmax.f32 %v1850_v53, 0.0  ;;  %v7541_v59 = vpop.permute.xlu1 %1245  ;;  %v1842_v60 = vadd.f32 %v7534_v48, %v1841_v54  ;;  %v1548_v54 = vsel %vm1518_vm12, %v1515_v51, %v1244_v55 }
 0x18f   : > { %v6258_v63 = vpop.f32.mrf.mxu0 }
 0x190   : > { %v6179_v42 = vpack.c.bf16 %v1970_v56, %v1970_v56  ;;  %v1968_v1 = vmax.f32 %v1842_v60, 0.0  ;;  %v1853_v3 = vadd.f32 %v6258_v63, %v7534_v48  ;;  %v1550_v56 = vsel %vm1518_vm12, %v1517_v44, %v7541_v59 }
 0x191   : > { %v1844_v26 = vpop.f32.mrf.mxu0  ;;  %v1281_v6 = vpop.permute.xlu0 %1280 }
 0x192   : > { %v2170_v7 = vshrl.u32 %v6179_v42, 16  ;;  %v6177_v8 = vpack.c.bf16 %v1968_v1, %v1968_v1  ;;  %v1971_v0 = vmax.f32 %v1853_v3, 0.0  ;;  %v1283_v37 = vpop.permute.xlu1 %1282  ;;  %v1845_v58 = vadd.f32 %v7534_v48, %v1844_v26 }
 0x193   : > { %v2173_v10 = vshll.u32 %v6179_v42, 16  ;;  %v1581_v2 = vsel %vm1551_vm13, %v1548_v54, %v1281_v6  ;;  %v1583_v60 = vsel %vm1551_vm13, %v1550_v56, %v1283_v37  ;;  %vm3649_vm13 = vcmask 1043456  }
 0x194   : > { %v2172_v9 = vrot.slane %v2170_v7, 7  ;;  %v2153_v13 = vshrl.u32 %v6177_v8, 16  ;;  %v6180_v11 = vpack.c.bf16 %v1971_v0, %v1971_v0  ;;  %v1969_v17 = vmax.f32 %v1845_v58, 0.0 }
 0x195   : > { %v1328_v18 = vpop.permute.xlu0 %1327  ;;  %v2156_v29 = vshll.u32 %v6177_v8, 16 }
 0x196   : > { %v2175_v49 = vor.u32 %v2173_v10, %v2172_v9  ;;  %v2155_v19 = vrot.slane %v2153_v13, 7  ;;  %v2178_v20 = vshrl.u32 %v6180_v11, 16  ;;  %v1330_v12 = vpop.permute.xlu1 %1329  ;;  %v6178_v22 = vpack.c.bf16 %v1969_v17, %v1969_v17 }
 0x197   : > { %v2181_v28 = vshll.u32 %v6180_v11, 16  ;;  %v2176_v32 = vrot.slane %v2172_v9, 4  ;;  %v1614_v62 = vsel %vm1584_vm14, %v1581_v2, %v1328_v18  ;;  %v1616_v63 = vsel %vm1584_vm14, %v1583_v60, %v1330_v12 }
 0x198   : > { %v2485_v24 = vsel %vm7548_vm5, %v2175_v49, %v2484_v15  ;;  %v2158_v25 = vor.u32 %v2156_v29, %v2155_v19  ;;  %v2180_v27 = vrot.slane %v2178_v20, 7  ;;  %v2161_v31 = vshrl.u32 %v6178_v22, 16 }
 0x199   : > { %2486 = vst [vmem:[#allocation3 + $0x18] sm:$0xf] %v2485_v24  ;;  %v1363_v34 = vpop.permute.xlu0 %1362  ;;  %v2164_v35 = vshll.u32 %v6178_v22, 16  ;;  %v2159_v39 = vrot.slane %v2155_v19, 4 }
 0x19a   : > { %v2476_v33 = vsel %vm7548_vm5, %v2158_v25, %v2475_v21  ;;  %v2183_v4 = vor.u32 %v2181_v28, %v2180_v27  ;;  %v2185_v47 = vrot.slane %v2180_v27, 4  ;;  %v1365_v46 = vpop.permute.xlu1 %1364  ;;  %v2163_v36 = vrot.slane %v2161_v31, 7 }
 0x19b   : > { %2477 = vst [vmem:[#allocation3 + $0xc] sm:$0xf] %v2476_v33  ;;  %v1647_v42 = vsel %vm1617_vm15, %v1614_v62, %v1363_v34  ;;  %v1649_v55 = vsel %vm1617_vm15, %v1616_v63, %v1365_v46  ;;  %v2502_v62 = vld [vmem:[#allocation3 + $0x38] sm:$0x1]  ;;  %vm9104_vm15 = vmmov %vm9102_vm2 }
 0x19c   : > { %v2184_v38 = vsel %vm6760_vm7, %v2176_v32, %v2183_v4  ;;  %v2489_v57 = vsel %vm7556_vm4, %v2185_v47, %v2488_v30  ;;  %v2166_v40 = vor.u32 %v2164_v35, %v2163_v36  ;;  %v2168_v41 = vrot.slane %v2163_v36, 4 }
 0x19d   : > { %2487 = vst.msk [vmem:[#allocation3 + $0x1c] sm:$0xf] %vm2000_vm9, %v2184_v38  ;;  %2490 = vst [vmem:[#allocation3 + $0x20] sm:$0x1] %v2489_v57  ;;  %v1400_v43 = vpop.permute.xlu0 %1399 }
 0x19e   : > { %v1402_v45 = vpop.permute.xlu1 %1401  ;;  %v2167_v52 = vsel %vm6760_vm7, %v2159_v39, %v2166_v40  ;;  %v2482_v53 = vsel %vm7556_vm4, %v2168_v41, %v2481_v61  ;;  %v1680_v1 = vsel %vm1650_vm0, %v1647_v42, %v1400_v43  ;;  %v2498_v41 = vld [vmem:[#allocation3 + $0x30] sm:$0xf] }
 0x19f   : > { %2478 = vst.msk [vmem:[#allocation3 + $0x10] sm:$0xf] %vm2000_vm9, %v2167_v52  ;;  %2483 = vst [vmem:[#allocation3 + $0x14] sm:$0x1] %v2482_v53  ;;  %v1682_v26 = vsel %vm1650_vm0, %v1649_v55, %v1402_v45  ;;  %v2491_v53 = vld [vmem:[#allocation3 + $0x24] sm:$0xf] }
 0x1a1   : > { %v1447_v50 = vpop.permute.xlu0 %1446 }
 0x1a2   : > { %v1449_v5 = vpop.permute.xlu1 %1448  ;;  %v1713_v59 = vsel %vm1683_vm1, %v1680_v1, %v1447_v50 }
 0x1a3   : > { %v1715_v8 = vsel %vm1683_vm1, %v1682_v26, %v1449_v5  ;;  %vm9105_vm1 = vmmov %vm9102_vm2 }
 0x1a4   : > { %v6426_v3 = vld [vmem:[#allocation3 + $0x18] sm:$0xff]   ;;  %v6427_v7 = vld [vmem:[#allocation3 + $0x20] ss:$0 sps:$4 sm:$0x11]   ;;  %vm9107_vm10 = vmmov %vm9105_vm1 }
 0x1a5   : > { %v1482_v6 = vpop.permute.xlu0 %1481  ;;  %3092 = vrot.lane.b32.xlu1 %v6426_v3, %s6549_s13  ;;  %3209 = vrot.lane.b32.xlu0 %v6426_v3, %s6554_s11  ;;  %v3011_v58 = vrot.slane %v6426_v3, 1  ;;  %v2808_v9 = vshll.u32 %v6426_v3, 16  ;;  %v3012_v13 = vrot.slane %v6427_v7, 1  ;;  %v2806_v20 = vshrl.u32 %v6426_v3, 16 }
 0x1a6   : > { %v1484_v0 = vpop.permute.xlu1 %1483  ;;  %v1746_v37 = vsel %vm1716_vm3, %v1713_v59, %v1482_v6  ;;  %v7596_v11 = vld [vmem:[#allocation3 + $0xc] sm:$0xff]   ;;  %v7599_v15 = vld [vmem:[#allocation3 + $0x14] ss:$0 sps:$4 sm:$0x11]   ;;  %v2813_v12 = vshll.u32 %v6427_v7, 16 }
 0x1a7   : > { %v1748_v10 = vsel %vm1716_vm3, %v1715_v8, %v1484_v0  ;;  %6283 = vmatprep.mubr.msk.bf16.mxu0 %vm1770_vm8, %v1746_v37  ;;  %v3013_v17 = vsel %vm1166_vm6, %v3011_v58, %v3012_v13  ;;  %v3008_v18 = vrot.slane %v7596_v11, 1  ;;  %v2810_v49 = vrot.slane %v2808_v9, 1  ;;  %v2495_v7 = vld [vmem:[#allocation3 + $0x2c] sm:$0x1] }
 0x1a8   : > { %6284 = vmatmul.mubr.msk.bf16.gmra.mxu0 %vm1770_vm8, %v1748_v10  ;;  %v3009_v19 = vrot.slane %v7599_v15, 1  ;;  %v2815_v31 = vrot.slane %v2813_v12, 1  ;;  %v2796_v58 = vshll.u32 %v7596_v11, 16  ;;  %vm9106_vm8 = vmmov %vm9105_vm1 }
 0x1a9   : > { %3174 = vrot.lane.b32.xlu1 %v3013_v17, %s6555_s12  ;;  %3090 = vrot.lane.b32.xlu0 %v7596_v11, %s6549_s13  ;;  %v2811_v25 = vor.u32 %v2810_v49, %v2806_v20 }
 0x1aa   : > { %v3010_v24 = vsel %vm1166_vm6, %v3008_v18, %v3009_v19  ;;  %v2798_v13 = vrot.slane %v2796_v58, 1  ;;  %v2801_v18 = vshll.u32 %v7599_v15, 16  ;;  %v2516_v58 = vld [vmem:[#allocation3 + $0x50] sm:$0x1] }
 0x1ab   : > { %v6261_v29 = vpop.f32.mrf.mxu0  ;;  %v2816_v47 = vsel %vm9102_vm2, %v2811_v25, %v2815_v31  ;;  %vm9108_vm2 = vmmov %vm9105_vm1 }
 0x1ac   : > { %v1866_v21 = vadd.f32 %v6261_v29, %v7534_v48  ;;  %v2803_v29 = vrot.slane %v2801_v18, 1 }
 0x1ad   : > { %v1857_v22 = vpop.f32.mrf.mxu0  ;;  %3055 = vrot.lane.b32.xlu1 %v3010_v24, %s6552_s16  ;;  %3291 = vrot.lane.b32.xlu0 %v3013_v17, %s6556_s14 }
 0x1ae   : > { %v1974_v27 = vmax.f32 %v1866_v21, 0.0  ;;  %v1858_v28 = vadd.f32 %v7534_v48, %v1857_v22 }
 0x1af   : > { %v6262_v30 = vpop.f32.mrf.mxu0 }
 0x1b0   : > { %v6183_v34 = vpack.c.bf16 %v1974_v27, %v1974_v27  ;;  %v1972_v32 = vmax.f32 %v1858_v28, 0.0  ;;  %v1869_v33 = vadd.f32 %v6262_v30, %v7534_v48 }
 0x1b1   : > { %v1860_v4 = vpop.f32.mrf.mxu0  ;;  %3139 = vrot.lane.b32.xlu1 %v2816_v47, %s6551_s15  ;;  %3057 = vrot.lane.b32.xlu0 %v3013_v17, %s6552_s16  ;;  %v2794_v17 = vshrl.u32 %v7596_v11, 16 }
 0x1b2   : > { %v2204_v46 = vshrl.u32 %v6183_v34, 16  ;;  %v6181_v36 = vpack.c.bf16 %v1972_v32, %v1972_v32  ;;  %v1975_v35 = vmax.f32 %v1869_v33, 0.0  ;;  %v1861_v38 = vadd.f32 %v7534_v48, %v1860_v4 }
 0x1b3   : > { %v2207_v61 = vshll.u32 %v6183_v34, 16  ;;  %v2799_v19 = vor.u32 %v2798_v13, %v2794_v17 }
 0x1b4   : > { %v2206_v57 = vrot.slane %v2204_v46, 7  ;;  %v2187_v39 = vshrl.u32 %v6181_v36, 16  ;;  %v6184_v40 = vpack.c.bf16 %v1975_v35, %v1975_v35  ;;  %v1973_v43 = vmax.f32 %v1861_v38, 0.0 }
 0x1b5   : > { %v2190_v51 = vshll.u32 %v6181_v36, 16  ;;  %2977 = vrot.lane.b32.xlu1 %v2816_v47, %s6546_s10  ;;  %3172 = vrot.lane.b32.xlu0 %v3010_v24, %s6555_s12  ;;  %v2804_v20 = vsel %vm9103_vm11, %v2799_v19, %v2803_v29  ;;  %v6446_v24 = vld [vmem:[%s9081_s3 + $0x20] ss:$0 sps:$4 sm:$0xff]   ;;  %v6449_v36 = vld [vmem:[%s9081_s3 + $0x18] sm:$0xff]   ;;  %vm9109_vm11 = vmmov %vm9105_vm1 }
 0x1b6   : > { %v2209_v44 = vor.u32 %v2207_v61, %v2206_v57  ;;  %v2189_v45 = vrot.slane %v2187_v39, 7  ;;  %v2212_v52 = vshrl.u32 %v6184_v40, 16  ;;  %v6182_v54 = vpack.c.bf16 %v1973_v43, %v1973_v43  ;;  %6330 = vmatprep.subr.msk.bf16.mxu1 %vm3649_vm13, %v6446_v24 }
 0x1b7   : > { %v2215_v60 = vshll.u32 %v6184_v40, 16  ;;  %v2210_v63 = vrot.slane %v2206_v57, 4  ;;  %v3651_v32 = vsel %vm3649_vm13, %v6446_v24, 0  ;;  %vm3451_vm13 = vcmask 326656  }
 0x1b8   : > { %v2499_v56 = vsel %vm7548_vm5, %v2209_v44, %v2498_v41  ;;  %v2192_v2 = vor.u32 %v2190_v51, %v2189_v45  ;;  %v2214_v50 = vrot.slane %v2212_v52, 7  ;;  %v2195_v5 = vshrl.u32 %v6182_v54, 16  ;;  %6288 = vmatpush3.bf16.msra.mxu1 %v3651_v32 }
 0x1b9   : > { %2500 = vst [vmem:[#allocation3 + $0x30] sm:$0xf] %v2499_v56  ;;  %3256 = vrot.lane.b32.xlu0 %v2816_v47, %s6557_s17  ;;  %v2198_v26 = vshll.u32 %v6182_v54, 16  ;;  %v2193_v8 = vrot.slane %v2189_v45, 4  ;;  %6289 = vmatprep.subr.bf16.mxu1 %v6449_v36 }
 0x1ba   : > { %v2492_v42 = vsel %vm7548_vm5, %v2192_v2, %v2491_v53  ;;  %v2217_v55 = vor.u32 %v2215_v60, %v2214_v50  ;;  %v2219_v1 = vrot.slane %v2214_v50, 4  ;;  %v2197_v3 = vrot.slane %v2195_v5, 7  ;;  %v6450_v2 = vld [vmem:[%s9081_s3 + $0x10] sm:$0xff]   ;;  %v2512_v50 = vld [vmem:[#allocation3 + $0x48] sm:$0xf] }
 0x1bb   : > { %2493 = vst [vmem:[#allocation3 + $0x24] sm:$0xf] %v2492_v42 }
 0x1bc   : > { %v2218_v59 = vsel %vm6760_vm7, %v2210_v63, %v2217_v55  ;;  %v2503_v6 = vsel %vm7556_vm4, %v2219_v1, %v2502_v62  ;;  %v2200_v0 = vor.u32 %v2198_v26, %v2197_v3  ;;  %v2202_v37 = vrot.slane %v2197_v3, 4  ;;  %6290 = vmatpush3.bf16.msra.mxu1 %v6449_v36  ;;  %v2505_v3 = vld [vmem:[#allocation3 + $0x3c] sm:$0xf] }
 0x1bd   : > { %2501 = vst.msk [vmem:[#allocation3 + $0x34] sm:$0xf] %vm2000_vm9, %v2218_v59  ;;  %2504 = vst [vmem:[#allocation3 + $0x38] sm:$0x1] %v2503_v6  ;;  %6291 = vmatprep.subr.bf16.mxu1 %v6450_v2 }
 0x1be   : > { %v2201_v9 = vsel %vm6760_vm7, %v2193_v8, %v2200_v0  ;;  %v2496_v10 = vsel %vm7556_vm4, %v2202_v37, %v2495_v7  ;;  %v6451_v37 = vld [vmem:[%s9081_s3 + $0x8] sm:$0xff]  }
 0x1bf   : > { %2494 = vst.msk [vmem:[#allocation3 + $0x28] sm:$0xf] %vm2000_vm9, %v2201_v9  ;;  %2497 = vst [vmem:[#allocation3 + $0x2c] sm:$0x1] %v2496_v10 }
 0x1c0   : > { %6292 = vmatpush3.bf16.msra.mxu1 %v6450_v2 }
 0x1c1   : > { %6293 = vmatprep.subr.bf16.mxu1 %v6451_v37 }
 0x1c4   : > { %v6430_v49 = vld [vmem:[#allocation3 + $0x30] sm:$0xff]   ;;  %v6432_v12 = vld [vmem:[#allocation3 + $0x38] ss:$0 sps:$4 sm:$0x11]   ;;  %6294 = vmatpush3.bf16.msra.mxu1 %v6451_v37 }
 0x1c5   : > { %3096 = vrot.lane.b32.xlu1 %v6430_v49, %s6549_s13  ;;  %3213 = vrot.lane.b32.xlu0 %v6430_v49, %s6554_s11  ;;  %v3017_v15 = vrot.slane %v6430_v49, 1  ;;  %v3018_v27 = vrot.slane %v6432_v12, 1  ;;  %v2832_v30 = vshll.u32 %v6430_v49, 16  ;;  %v2830_v45 = vshrl.u32 %v6430_v49, 16 }
 0x1c6   : > { %v7643_v11 = vld [vmem:[#allocation3 + $0x24] sm:$0xff]   ;;  %v7648_v28 = vld [vmem:[#allocation3 + $0x2c] ss:$0 sps:$4 sm:$0x11]   ;;  %v2837_v51 = vshll.u32 %v6432_v12, 16 }
 0x1c7   : > { %v3019_v38 = vsel %vm1166_vm6, %v3017_v15, %v3018_v27  ;;  %v3014_v57 = vrot.slane %v7643_v11, 1  ;;  %v3015_v61 = vrot.slane %v7648_v28, 1  ;;  %v2834_v39 = vrot.slane %v2832_v30, 1 }
 0x1c8   : > { %v2839_v59 = vrot.slane %v2837_v51, 1  ;;  %v2820_v27 = vshll.u32 %v7643_v11, 16  ;;  %v2818_v32 = vshrl.u32 %v7643_v11, 16 }
 0x1c9   : > { %2975 = vrot.lane.b32.xlu1 %v2804_v20, %s6546_s10  ;;  %3137 = vrot.lane.b32.xlu0 %v2804_v20, %s6551_s15  ;;  %v3016_v62 = vsel %vm1166_vm6, %v3014_v57, %v3015_v61  ;;  %v2835_v5 = vor.u32 %v2834_v39, %v2830_v45 }
 0x1cb   : > { %v6265_v21 = vpop.f32.mrf.mxu0  ;;  %v2840_v10 = vsel %vm9104_vm15, %v2835_v5, %v2839_v59  ;;  %vm3484_vm15 = vcmask 392192  }
 0x1cc   : > { %v1882_v22 = vadd.f32 %v6265_v21, %v7534_v48  ;;  %v2509_v21 = vld [vmem:[#allocation3 + $0x44] sm:$0x1] }
 0x1cd   : > { %v1873_v25 = vpop.f32.mrf.mxu0  ;;  %3211 = vrot.lane.b32.xlu1 %v7643_v11, %s6554_s11  ;;  %3094 = vrot.lane.b32.xlu0 %v7643_v11, %s6549_s13 }
 0x1ce   : > { %v1978_v31 = vmax.f32 %v1882_v22, 0.0  ;;  %v1874_v34 = vadd.f32 %v7534_v48, %v1873_v25  ;;  %v6452_v22 = vld [vmem:[%s9081_s3] sm:$0xff]  }
 0x1cf   : > { %v6266_v33 = vpop.f32.mrf.mxu0  ;;  %6295 = vmatprep.subr.bf16.mxu1 %v6452_v22 }
 0x1d0   : > { %v6187_v4 = vpack.c.bf16 %v1978_v31, %v1978_v31  ;;  %v1976_v47 = vmax.f32 %v1874_v34, 0.0  ;;  %v1885_v46 = vadd.f32 %v6266_v33, %v7534_v48  ;;  %6296 = vmatpush3.bf16.msra.mxu1 %v6452_v22  ;;  %v2822_v34 = vrot.slane %v2820_v27, 1 }
 0x1d1   : > { %v1876_v35 = vpop.f32.mrf.mxu0  ;;  %3178 = vrot.lane.b32.xlu1 %v3019_v38, %s6555_s12  ;;  %3295 = vrot.lane.b32.xlu0 %v3019_v38, %s6556_s14  ;;  %v2825_v33 = vshll.u32 %v7648_v28, 16 }
 0x1d2   : > { %v2238_v40 = vshrl.u32 %v6187_v4, 16  ;;  %v6185_v41 = vpack.c.bf16 %v1976_v47, %v1976_v47  ;;  %v1979_v43 = vmax.f32 %v1885_v46, 0.0  ;;  %v1877_v44 = vadd.f32 %v7534_v48, %v1876_v35 }
 0x1d3   : > { %v2241_v53 = vshll.u32 %v6187_v4, 16  ;;  %v2823_v47 = vor.u32 %v2822_v34, %v2818_v32  ;;  %v2827_v46 = vrot.slane %v2825_v33, 1  ;;  %v2523_v33 = vld [vmem:[#allocation3 + $0x5c] sm:$0x1] }
 0x1d4   : > { %v2240_v52 = vrot.slane %v2238_v40, 7  ;;  %v2221_v54 = vshrl.u32 %v6185_v41, 16  ;;  %v6188_v56 = vpack.c.bf16 %v1979_v43, %v1979_v43  ;;  %v1977_v60 = vmax.f32 %v1877_v44, 0.0 }
 0x1d5   : > { %v2224_v55 = vshll.u32 %v6185_v41, 16  ;;  %3059 = vrot.lane.b32.xlu1 %v3016_v62, %s6552_s16  ;;  %3061 = vrot.lane.b32.xlu0 %v3019_v38, %s6552_s16  ;;  %v2828_v36 = vsel %vm9105_vm1, %v2823_v47, %v2827_v46  ;;  %vm3517_vm1 = vcmask 457728  }
 0x1d6   : > { %v2243_v63 = vor.u32 %v2241_v53, %v2240_v52  ;;  %v2223_v42 = vrot.slane %v2221_v54, 7  ;;  %v2246_v1 = vshrl.u32 %v6188_v56, 16  ;;  %v6186_v26 = vpack.c.bf16 %v1977_v60, %v1977_v60 }
 0x1d7   : > { %v2249_v0 = vshll.u32 %v6188_v56, 16  ;;  %v2244_v13 = vrot.slane %v2240_v52, 4 }
 0x1d8   : > { %v2513_v6 = vsel %vm7548_vm5, %v2243_v63, %v2512_v50  ;;  %v2226_v7 = vor.u32 %v2224_v55, %v2223_v42  ;;  %v2248_v8 = vrot.slane %v2246_v1, 7  ;;  %v2229_v9 = vshrl.u32 %v6186_v26, 16  ;;  %v2526_v1 = vld [vmem:[#allocation3 + $0x60] sm:$0xf] }
 0x1d9   : > { %2514 = vst [vmem:[#allocation3 + $0x48] sm:$0xf] %v2513_v6  ;;  %3143 = vrot.lane.b32.xlu1 %v2840_v10, %s6551_s15  ;;  %3293 = vrot.lane.b32.xlu0 %v3016_v62, %s6556_s14  ;;  %v2232_v29 = vshll.u32 %v6186_v26, 16  ;;  %v2227_v15 = vrot.slane %v2223_v42, 4 }
 0x1da   : > { %v2506_v17 = vsel %vm7548_vm5, %v2226_v7, %v2505_v3  ;;  %v2251_v18 = vor.u32 %v2249_v0, %v2248_v8  ;;  %v2253_v49 = vrot.slane %v2248_v8, 4  ;;  %v2231_v19 = vrot.slane %v2229_v9, 7 }
 0x1db   : > { %2507 = vst [vmem:[#allocation3 + $0x3c] sm:$0xf] %v2506_v17 }
 0x1dc   : > { %v2252_v20 = vsel %vm6760_vm7, %v2244_v13, %v2251_v18  ;;  %v2517_v12 = vsel %vm7556_vm4, %v2253_v49, %v2516_v58  ;;  %v2234_v24 = vor.u32 %v2232_v29, %v2231_v19  ;;  %v2236_v25 = vrot.slane %v2231_v19, 4  ;;  %v2519_v58 = vld [vmem:[#allocation3 + $0x54] sm:$0xf]  ;;  %v2530_v29 = vld [vmem:[#allocation3 + $0x68] sm:$0x1] }
 0x1dd   : > { %2515 = vst.msk [vmem:[#allocation3 + $0x4c] sm:$0xf] %vm2000_vm9, %v2252_v20  ;;  %2518 = vst [vmem:[#allocation3 + $0x50] sm:$0x1] %v2517_v12  ;;  %2981 = vrot.lane.b32.xlu1 %v2840_v10, %s6546_s10  ;;  %3176 = vrot.lane.b32.xlu0 %v3016_v62, %s6555_s12 }
 0x1de   : > { %v2235_v30 = vsel %vm6760_vm7, %v2227_v15, %v2234_v24  ;;  %v2510_v31 = vsel %vm7556_vm4, %v2236_v25, %v2509_v21 }
 0x1df   : > { %2508 = vst.msk [vmem:[#allocation3 + $0x40] sm:$0xf] %vm2000_vm9, %v2235_v30  ;;  %2511 = vst [vmem:[#allocation3 + $0x44] sm:$0x1] %v2510_v31 }
 0x1e1   : > { %3260 = vrot.lane.b32.xlu0 %v2840_v10, %s6557_s17 }
 0x1e4   : > { %v6434_v4 = vld [vmem:[#allocation3 + $0x48] sm:$0xff]   ;;  %v7703_v35 = vld [vmem:[#allocation3 + $0x50] ss:$0 sps:$4 sm:$0x11]  }
 0x1e5   : > { %3100 = vrot.lane.b32.xlu1 %v6434_v4, %s6549_s13  ;;  %3217 = vrot.lane.b32.xlu0 %v6434_v4, %s6554_s11  ;;  %v3023_v61 = vrot.slane %v6434_v4, 1  ;;  %v3024_v39 = vrot.slane %v7703_v35, 1  ;;  %v2856_v56 = vshll.u32 %v6434_v4, 16  ;;  %v2854_v10 = vshrl.u32 %v6434_v4, 16 }
 0x1e6   : > { %v7708_v57 = vld [vmem:[#allocation3 + $0x3c] sm:$0xff]   ;;  %v7717_v54 = vld [vmem:[#allocation3 + $0x44] ss:$0 sps:$4 sm:$0x11]   ;;  %v2861_v13 = vshll.u32 %v7703_v35, 16 }
 0x1e7   : > { %v3025_v53 = vsel %vm1166_vm6, %v3023_v61, %v3024_v39  ;;  %v3020_v26 = vrot.slane %v7708_v57, 1  ;;  %v3021_v59 = vrot.slane %v7717_v54, 1  ;;  %v2858_v6 = vrot.slane %v2856_v56, 1 }
 0x1e8   : > { %v2863_v31 = vrot.slane %v2861_v13, 1  ;;  %v2844_v4 = vshll.u32 %v7708_v57, 16  ;;  %v2842_v61 = vshrl.u32 %v7708_v57, 16  ;;  %v2849_v39 = vshll.u32 %v7717_v54, 16  ;;  %v2540_v13 = vld [vmem:[#allocation3 + $0x78] sm:$0xf] }
 0x1e9   : > { %3258 = vrot.lane.b32.xlu1 %v2828_v36, %s6557_s17  ;;  %3141 = vrot.lane.b32.xlu0 %v2828_v36, %s6551_s15  ;;  %v3022_v12 = vsel %vm1166_vm6, %v3020_v26, %v3021_v59  ;;  %v2859_v21 = vor.u32 %v2858_v6, %v2854_v10 }
 0x1eb   : > { %v6269_v38 = vpop.f32.mrf.mxu0  ;;  %v2864_v35 = vsel %vm9106_vm8, %v2859_v21, %v2863_v31  ;;  %vm9110_vm8 = vmmov %vm9108_vm2 }
 0x1ec   : > { %v1898_v11 = vadd.f32 %v6269_v38, %v7534_v48 }
 0x1ed   : > { %v1889_v28 = vpop.f32.mrf.mxu0  ;;  %2979 = vrot.lane.b32.xlu1 %v2828_v36, %s6546_s10  ;;  %3098 = vrot.lane.b32.xlu0 %v7708_v57, %s6549_s13 }
 0x1ee   : > { %v1982_v40 = vmax.f32 %v1898_v11, 0.0  ;;  %v1890_v41 = vadd.f32 %v7534_v48, %v1889_v28  ;;  %v2846_v28 = vrot.slane %v2844_v4, 1 }
 0x1ef   : > { %v6270_v43 = vpop.f32.mrf.mxu0 }
 0x1f0   : > { %v6191_v44 = vpack.c.bf16 %v1982_v40, %v1982_v40  ;;  %v1980_v45 = vmax.f32 %v1890_v41, 0.0  ;;  %v1901_v51 = vadd.f32 %v6270_v43, %v7534_v48  ;;  %v2847_v41 = vor.u32 %v2846_v28, %v2842_v61 }
 0x1f1   : > { %v1892_v52 = vpop.f32.mrf.mxu0  ;;  %3215 = vrot.lane.b32.xlu1 %v7708_v57, %s6554_s11  ;;  %3299 = vrot.lane.b32.xlu0 %v3025_v53, %s6556_s14  ;;  %v2851_v43 = vrot.slane %v2849_v39, 1 }
 0x1f2   : > { %v2272_v2 = vshrl.u32 %v6191_v44, 16  ;;  %v6189_v50 = vpack.c.bf16 %v1980_v45, %v1980_v45  ;;  %v1983_v60 = vmax.f32 %v1901_v51, 0.0  ;;  %v1893_v62 = vadd.f32 %v7534_v48, %v1892_v52 }
 0x1f3   : > { %v2275_v63 = vshll.u32 %v6191_v44, 16  ;;  %v2852_v44 = vsel %vm9107_vm10, %v2847_v41, %v2851_v43  ;;  %v2537_v41 = vld [vmem:[#allocation3 + $0x74] sm:$0x1]  ;;  %vm3550_vm10 = vcmask 523264  }
 0x1f4   : > { %v2274_v5 = vrot.slane %v2272_v2, 7  ;;  %v2255_v42 = vshrl.u32 %v6189_v50, 16  ;;  %v6192_v55 = vpack.c.bf16 %v1983_v60, %v1983_v60  ;;  %v1981_v3 = vmax.f32 %v1893_v62, 0.0 }
 0x1f5   : > { %v2258_v0 = vshll.u32 %v6189_v50, 16  ;;  %3182 = vrot.lane.b32.xlu1 %v3025_v53, %s6555_s12  ;;  %3065 = vrot.lane.b32.xlu0 %v3025_v53, %s6552_s16  ;;  %v7767_v53 = vpop.permute.xlu0 %2973 }
 0x1f6   : > { %v2277_v7 = vor.u32 %v2275_v63, %v2274_v5  ;;  %v2257_v8 = vrot.slane %v2255_v42, 7  ;;  %v2280_v37 = vshrl.u32 %v6192_v55, 16  ;;  %v6190_v9 = vpack.c.bf16 %v1981_v3, %v1981_v3 }
 0x1f7   : > { %v2283_v19 = vshll.u32 %v6192_v55, 16  ;;  %v2278_v22 = vrot.slane %v2274_v5, 4 }
 0x1f8   : > { %v2527_v17 = vsel %vm7548_vm5, %v2277_v7, %v2526_v1  ;;  %v2260_v18 = vor.u32 %v2258_v0, %v2257_v8  ;;  %v2282_v49 = vrot.slane %v2280_v37, 7  ;;  %v2263_v20 = vshrl.u32 %v6190_v9, 16 }
 0x1f9   : > { %2528 = vst [vmem:[#allocation3 + $0x60] sm:$0xf] %v2527_v17  ;;  %3063 = vrot.lane.b32.xlu1 %v3022_v12, %s6552_s16  ;;  %3297 = vrot.lane.b32.xlu0 %v3022_v12, %s6556_s14  ;;  %v2266_v30 = vshll.u32 %v6190_v9, 16  ;;  %v2261_v47 = vrot.slane %v2257_v8, 4  ;;  %v7783_v8 = vpop.permute.xlu0 %3053 }
 0x1fa   : > { %v2520_v15 = vsel %vm7548_vm5, %v2260_v18, %v2519_v58  ;;  %v2285_v24 = vor.u32 %v2283_v19, %v2282_v49  ;;  %v2287_v25 = vrot.slane %v2282_v49, 4  ;;  %v2265_v27 = vrot.slane %v2263_v20, 7 }
 0x1fb   : > { %2521 = vst [vmem:[#allocation3 + $0x54] sm:$0xf] %v2520_v15 }
 0x1fc   : > { %v2286_v34 = vsel %vm6760_vm7, %v2278_v22, %v2285_v24  ;;  %v2531_v32 = vsel %vm7556_vm4, %v2287_v25, %v2530_v29  ;;  %v2268_v46 = vor.u32 %v2266_v30, %v2265_v27  ;;  %v2270_v36 = vrot.slane %v2265_v27, 4 }
 0x1fd   : > { %2529 = vst.msk [vmem:[#allocation3 + $0x64] sm:$0xf] %vm2000_vm9, %v2286_v34  ;;  %2532 = vst [vmem:[#allocation3 + $0x68] sm:$0x1] %v2531_v32  ;;  %3147 = vrot.lane.b32.xlu1 %v2864_v35, %s6551_s15  ;;  %3180 = vrot.lane.b32.xlu0 %v3022_v12, %s6555_s12  ;;  %v2544_v32 = vld [vmem:[#allocation3 + $0x80] sm:$0x1] }
 0x1fe   : > { %v2269_v38 = vsel %vm6760_vm7, %v2261_v47, %v2268_v46  ;;  %v2524_v11 = vsel %vm7556_vm4, %v2270_v36, %v2523_v33 }
 0x1ff   : > { %2522 = vst.msk [vmem:[#allocation3 + $0x58] sm:$0xf] %vm2000_vm9, %v2269_v38  ;;  %2525 = vst [vmem:[#allocation3 + $0x5c] sm:$0x1] %v2524_v11 }
 0x201   : > { %2985 = vrot.lane.b32.xlu1 %v2864_v35, %s6546_s10  ;;  %3264 = vrot.lane.b32.xlu0 %v2864_v35, %s6557_s17 }
 0x204   : > { %v7753_v40 = vld [vmem:[#allocation3 + $0x60] sm:$0xff]   ;;  %v7760_v45 = vld [vmem:[#allocation3 + $0x68] ss:$0 sps:$4 sm:$0x11]  }
 0x205   : > { %3104 = vrot.lane.b32.xlu1 %v7753_v40, %s6549_s13  ;;  %3221 = vrot.lane.b32.xlu0 %v7753_v40, %s6554_s11  ;;  %v3029_v56 = vrot.slane %v7753_v40, 1  ;;  %v3030_v2 = vrot.slane %v7760_v45, 1  ;;  %v2880_v26 = vshll.u32 %v7753_v40, 16  ;;  %v2878_v15 = vshrl.u32 %v7753_v40, 16 }
 0x206   : > { %v7765_v52 = vld [vmem:[#allocation3 + $0x54] sm:$0xff]   ;;  %v7777_v3 = vld [vmem:[#allocation3 + $0x5c] ss:$0 sps:$4 sm:$0x11]   ;;  %v2885_v24 = vshll.u32 %v7760_v45, 16 }
 0x207   : > { %v3031_v1 = vsel %vm1166_vm6, %v3029_v56, %v3030_v2  ;;  %v3026_v18 = vrot.slane %v7765_v52, 1  ;;  %v3027_v49 = vrot.slane %v7777_v3, 1  ;;  %v2882_v19 = vrot.slane %v2880_v26, 1 }
 0x208   : > { %v2887_v61 = vrot.slane %v2885_v24, 1  ;;  %v2868_v45 = vshll.u32 %v7765_v52, 16 }
 0x209   : > { %3262 = vrot.lane.b32.xlu1 %v2852_v44, %s6557_s17  ;;  %3145 = vrot.lane.b32.xlu0 %v2852_v44, %s6551_s15  ;;  %v3028_v4 = vsel %vm1166_vm6, %v3026_v18, %v3027_v49  ;;  %v2883_v47 = vor.u32 %v2882_v19, %v2878_v15 }
 0x20b   : > { %v6273_v57 = vpop.f32.mrf.mxu0  ;;  %v2888_v56 = vsel %vm9108_vm2, %v2883_v47, %v2887_v61  ;;  %vm3616_vm2 = vcmask 588800  }
 0x20c   : > { %v1914_v51 = vadd.f32 %v6273_v57, %v7534_v48 }
 0x20d   : > { %v1905_v54 = vpop.f32.mrf.mxu0  ;;  %2983 = vrot.lane.b32.xlu1 %v2852_v44, %s6546_s10  ;;  %3102 = vrot.lane.b32.xlu0 %v7765_v52, %s6549_s13 }
 0x20e   : > { %v1986_v50 = vmax.f32 %v1914_v51, 0.0  ;;  %v1906_v60 = vadd.f32 %v7534_v48, %v1905_v54 }
 0x20f   : > { %v6274_v62 = vpop.f32.mrf.mxu0 }
 0x210   : > { %v6195_v5 = vpack.c.bf16 %v1986_v50, %v1986_v50  ;;  %v1984_v63 = vmax.f32 %v1906_v60, 0.0  ;;  %v1917_v42 = vadd.f32 %v6274_v62, %v7534_v48  ;;  %v2870_v60 = vrot.slane %v2868_v45, 1 }
 0x211   : > { %v1908_v55 = vpop.f32.mrf.mxu0  ;;  %3219 = vrot.lane.b32.xlu1 %v7765_v52, %s6554_s11  ;;  %3303 = vrot.lane.b32.xlu0 %v3031_v1, %s6556_s14 }
 0x212   : > { %v2306_v59 = vshrl.u32 %v6195_v5, 16  ;;  %v6193_v6 = vpack.c.bf16 %v1984_v63, %v1984_v63  ;;  %v1987_v7 = vmax.f32 %v1917_v42, 0.0  ;;  %v1909_v0 = vadd.f32 %v7534_v48, %v1908_v55  ;;  %v2533_v48 = vld [vmem:[#allocation3 + $0x6c] sm:$0xf] }
 0x213   : > { %v2309_v58 = vshll.u32 %v6195_v5, 16  ;;  %v2866_v63 = vshrl.u32 %v7765_v52, 16  ;;  %v2873_v42 = vshll.u32 %v7777_v3, 16  ;;  %v7845_v3 = vld [vmem:[%s9080_s2] ss:$0 sm:$0xff] }
 0x214   : > { %v2308_v37 = vrot.slane %v2306_v59, 7  ;;  %v2289_v9 = vshrl.u32 %v6193_v6, 16  ;;  %v6196_v10 = vpack.c.bf16 %v1987_v7, %v1987_v7  ;;  %v1985_v17 = vmax.f32 %v1909_v0, 0.0 }
 0x215   : > { %v2292_v12 = vshll.u32 %v6193_v6, 16  ;;  %3186 = vrot.lane.b32.xlu1 %v3031_v1, %s6555_s12  ;;  %3069 = vrot.lane.b32.xlu0 %v3031_v1, %s6552_s16  ;;  %v2871_v1 = vor.u32 %v2870_v60, %v2866_v63  ;;  %v2875_v26 = vrot.slane %v2873_v42, 1 }
 0x216   : > { %v2311_v29 = vor.u32 %v2309_v58, %v2308_v37  ;;  %v2291_v20 = vrot.slane %v2289_v9, 7  ;;  %v2314_v21 = vshrl.u32 %v6196_v10, 16  ;;  %v6194_v22 = vpack.c.bf16 %v1985_v17, %v1985_v17 }
 0x217   : > { %v2317_v31 = vshll.u32 %v6196_v10, 16  ;;  %v7794_v34 = vpop.permute.xlu0 %3209  ;;  %v2312_v46 = vrot.slane %v2308_v37, 4  ;;  %v7805_v43 = vpop.permute.xlu1 %3092  ;;  %v2876_v7 = vsel %vm9109_vm11, %v2871_v1, %v2875_v26  ;;  %vm9111_vm11 = vmmov %vm9110_vm8 }
 0x218   : > { %v2541_v25 = vsel %vm7548_vm5, %v2311_v29, %v2540_v13  ;;  %v2294_v27 = vor.u32 %v2292_v12, %v2291_v20  ;;  %v2316_v30 = vrot.slane %v2314_v21, 7  ;;  %v2297_v33 = vshrl.u32 %v6194_v22, 16 }
 0x219   : > { %2542 = vst [vmem:[#allocation3 + $0x78] sm:$0xf] %v2541_v25  ;;  %3067 = vrot.lane.b32.xlu1 %v3028_v4, %s6552_s16  ;;  %3301 = vrot.lane.b32.xlu0 %v3028_v4, %s6556_s14  ;;  %v2300_v28 = vshll.u32 %v6194_v22, 16  ;;  %v2295_v57 = vrot.slane %v2291_v20, 4  ;;  %v6471_v20 = vld [vmem:[#allocation3] sm:$0xff]  }
 0x21a   : > { %v2534_v36 = vsel %vm7548_vm5, %v2294_v27, %v2533_v48  ;;  %v2319_v35 = vor.u32 %v2317_v31, %v2316_v30  ;;  %v2321_v38 = vrot.slane %v2316_v30, 4  ;;  %v2299_v11 = vrot.slane %v2297_v33, 7 }
 0x21b   : > { %2535 = vst [vmem:[#allocation3 + $0x6c] sm:$0xf] %v2534_v36  ;;  %v7807_v44 = vpop.permute.xlu0 %3090  ;;  %v7819_v62 = vpop.permute.xlu1 %3174  ;;  %v3324_v12 = vsel %vm1518_vm12, %v6471_v20, %v7767_v53 }
 0x21c   : > { %v2320_v39 = vsel %vm6760_vm7, %v2312_v46, %v2319_v35  ;;  %v2545_v40 = vsel %vm7556_vm4, %v2321_v38, %v2544_v32  ;;  %v2302_v51 = vor.u32 %v2300_v28, %v2299_v11  ;;  %v2304_v54 = vrot.slane %v2299_v11, 4 }
 0x21d   : > { %2543 = vst.msk [vmem:[#allocation3 + $0x7c] sm:$0xf] %vm2000_vm9, %v2320_v39  ;;  %2546 = vst [vmem:[#allocation3 + $0x80] sm:$0x1] %v2545_v40  ;;  %3151 = vrot.lane.b32.xlu1 %v2888_v56, %s6551_s15  ;;  %3184 = vrot.lane.b32.xlu0 %v3028_v4, %s6555_s12  ;;  %v3356_v32 = vsel %vm1584_vm14, %v3324_v12, %v7783_v8  ;;  %v2554_v39 = vld [vmem:[#allocation3 + $0x90] sm:$0xf] }
 0x21e   : > { %v2303_v2 = vsel %vm6760_vm7, %v2295_v57, %v2302_v51  ;;  %v2538_v50 = vsel %vm7556_vm4, %v2304_v54, %v2537_v41 }
 0x21f   : > { %2536 = vst.msk [vmem:[#allocation3 + $0x70] sm:$0xf] %vm2000_vm9, %v2303_v2  ;;  %2539 = vst [vmem:[#allocation3 + $0x74] sm:$0x1] %v2538_v50  ;;  %v7821_v5 = vpop.permute.xlu0 %3291  ;;  %v7833_v59 = vpop.permute.xlu1 %3055  ;;  %v2547_v50 = vld [vmem:[#allocation3 + $0x84] sm:$0xf] }
 0x221   : > { %2989 = vrot.lane.b32.xlu1 %v2888_v56, %s6546_s10  ;;  %3268 = vrot.lane.b32.xlu0 %v2888_v56, %s6557_s17 }
 0x223   : > { %v7835_v6 = vpop.permute.xlu0 %3057  ;;  %v7854_v18 = vpop.permute.xlu1 %3139 }
 0x224   : > { %v7827_v55 = vld [vmem:[#allocation3 + $0x78] sm:$0xff]   ;;  %v7838_v0 = vld [vmem:[#allocation3 + $0x80] ss:$0 sps:$4 sm:$0x11]  }
 0x225   : > { %3108 = vrot.lane.b32.xlu1 %v7827_v55, %s6549_s13  ;;  %3225 = vrot.lane.b32.xlu0 %v7827_v55, %s6554_s11  ;;  %v3035_v10 = vrot.slane %v7827_v55, 1  ;;  %v3036_v13 = vrot.slane %v7838_v0, 1  ;;  %v2904_v48 = vshll.u32 %v7827_v55, 16  ;;  %v2902_v45 = vshrl.u32 %v7827_v55, 16 }
 0x226   : > { %v7848_v58 = vld [vmem:[#allocation3 + $0x6c] sm:$0xff]   ;;  %v7852_v17 = vld [vmem:[#allocation3 + $0x74] ss:$0 sps:$4 sm:$0x11]   ;;  %v2909_v57 = vshll.u32 %v7838_v0, 16 }
 0x227   : > { %v7856_v49 = vpop.permute.xlu0 %3172  ;;  %v7867_v27 = vsel %vm1166_vm6, %v3035_v10, %v3036_v13  ;;  %v3032_v30 = vrot.slane %v7848_v58, 1  ;;  %v3033_v31 = vrot.slane %v7852_v17, 1  ;;  %v2906_v46 = vrot.slane %v2904_v48, 1  ;;  %v7879_v35 = vpop.permute.xlu1 %2977 }
 0x228   : > { %v2892_v36 = vshll.u32 %v7848_v58, 16  ;;  %v2911_v10 = vrot.slane %v2909_v57, 1  ;;  %v2890_v13 = vshrl.u32 %v7848_v58, 16 }
 0x229   : > { %3266 = vrot.lane.b32.xlu1 %v2876_v7, %s6557_s17  ;;  %3149 = vrot.lane.b32.xlu0 %v2876_v7, %s6551_s15  ;;  %v3034_v41 = vsel %vm1166_vm6, %v3032_v30, %v3033_v31  ;;  %v2907_v63 = vor.u32 %v2906_v46, %v2902_v45  ;;  %v2551_v30 = vld [vmem:[#allocation3 + $0x8c] sm:$0x1] }
 0x22a   : > { %v2894_v42 = vrot.slane %v2892_v36, 1 }
 0x22b   : > { %v6277_v52 = vpop.f32.mrf.mxu0  ;;  %v7881_v28 = vpop.permute.xlu0 %3256 }
 0x22c   : > { %v1930_v37 = vadd.f32 %v7845_v3, %v6277_v52 }
 0x22d   : > { %v1921_v9 = vpop.f32.mrf.mxu0  ;;  %2987 = vrot.lane.b32.xlu1 %v2876_v7, %s6546_s10  ;;  %3106 = vrot.lane.b32.xlu0 %v7848_v58, %s6549_s13 }
 0x22e   : > { %v1990_v19 = vmax.f32 %v1930_v37, 0.0  ;;  %v1922_v29 = vadd.f32 %v7845_v3, %v1921_v9  ;;  %v2558_v37 = vld [vmem:[#allocation3 + $0x98] sm:$0x1] }
 0x22f   : > { %v6278_v21 = vpop.f32.mrf.mxu0 }
 0x230   : > { %v6199_v22 = vpack.c.bf16 %v1990_v19, %v1990_v19  ;;  %v1988_v15 = vmax.f32 %v1922_v29, 0.0  ;;  %v1933_v24 = vadd.f32 %v7845_v3, %v6278_v21  ;;  %v3388_v21 = vsel %vm1650_vm0, %v3356_v32, %v7807_v44 }
 0x231   : > { %v1924_v25 = vpop.f32.mrf.mxu0  ;;  %3223 = vrot.lane.b32.xlu1 %v7848_v58, %s6554_s11  ;;  %3307 = vrot.lane.b32.xlu0 %v7867_v27, %s6556_s14 }
 0x232   : > { %v2340_v33 = vshrl.u32 %v6199_v22, 16  ;;  %v6197_v53 = vpack.c.bf16 %v1988_v15, %v1988_v15  ;;  %v1991_v4 = vmax.f32 %v1933_v24, 0.0  ;;  %v1925_v47 = vadd.f32 %v7845_v3, %v1924_v25 }
 0x233   : > { %v2343_v11 = vshll.u32 %v6199_v22, 16  ;;  %v2897_v15 = vshll.u32 %v7852_v17, 16 }
 0x234   : > { %v2342_v38 = vrot.slane %v2340_v33, 7  ;;  %v2323_v8 = vshrl.u32 %v6197_v53, 16  ;;  %v6200_v61 = vpack.c.bf16 %v1991_v4, %v1991_v4  ;;  %v1989_v40 = vmax.f32 %v1925_v47, 0.0 }
 0x235   : > { %v2326_v56 = vshll.u32 %v6197_v53, 16  ;;  %3190 = vrot.lane.b32.xlu1 %v7867_v27, %s6555_s12  ;;  %3305 = vrot.lane.b32.xlu0 %v3034_v41, %s6556_s14  ;;  %v2912_v53 = vsel %vm9110_vm8, %v2907_v63, %v2911_v10  ;;  %v2895_v4 = vor.u32 %v2894_v42, %v2890_v13 }
 0x236   : > { %v2345_v51 = vor.u32 %v2343_v11, %v2342_v38  ;;  %v2325_v54 = vrot.slane %v2323_v8, 7  ;;  %v2348_v2 = vshrl.u32 %v6200_v61, 16  ;;  %v6198_v60 = vpack.c.bf16 %v1989_v40, %v1989_v40 }
 0x237   : > { %v2351_v7 = vshll.u32 %v6200_v61, 16  ;;  %v7891_v0 = vpop.permute.xlu1 %3096  ;;  %v7893_v52 = vpop.permute.xlu0 %3213  ;;  %v2346_v19 = vrot.slane %v2342_v38, 4  ;;  %v2899_v11 = vrot.slane %v2897_v15, 1 }
 0x238   : > { %v2555_v1 = vsel %vm7548_vm5, %v2345_v51, %v2554_v39  ;;  %v2328_v55 = vor.u32 %v2326_v56, %v2325_v54  ;;  %v2350_v26 = vrot.slane %v2348_v2, 7  ;;  %v2331_v9 = vshrl.u32 %v6198_v60, 16  ;;  %v6472_v2 = vld [vmem:[#allocation3 + $0xc] sm:$0xff]  }
 0x239   : > { %2556 = vst [vmem:[#allocation3 + $0x90] sm:$0xf] %v2555_v1  ;;  %3071 = vrot.lane.b32.xlu1 %v3034_v41, %s6552_s16  ;;  %3188 = vrot.lane.b32.xlu0 %v3034_v41, %s6555_s12  ;;  %v2334_v22 = vshll.u32 %v6198_v60, 16  ;;  %v2329_v47 = vrot.slane %v2325_v54, 4  ;;  %v2900_v40 = vsel %vm9111_vm11, %v2895_v4, %v2899_v11  ;;  %v2568_v11 = vld [vmem:[#allocation3 + $0xa8] sm:$0xf]  ;;  %vm9112_vm11 = vmmov %vm9110_vm8 }
 0x23a   : > { %v2548_v29 = vsel %vm7548_vm5, %v2328_v55, %v2547_v50  ;;  %v2353_v20 = vor.u32 %v2351_v7, %v2350_v26  ;;  %v2355_v12 = vrot.slane %v2350_v26, 4  ;;  %v2333_v48 = vrot.slane %v2331_v9, 7 }
 0x23b   : > { %2549 = vst [vmem:[#allocation3 + $0x84] sm:$0xf] %v2548_v29  ;;  %v2976_v31 = vpop.permute.xlu1 %2975  ;;  %v3138_v33 = vpop.permute.xlu0 %3137 }
 0x23c   : > { %v2354_v24 = vsel %vm6760_vm7, %v2346_v19, %v2353_v20  ;;  %v2559_v25 = vsel %vm7556_vm4, %v2355_v12, %v2558_v37  ;;  %v2336_v44 = vor.u32 %v2334_v22, %v2333_v48  ;;  %v2338_v32 = vrot.slane %v2333_v48, 4 }
 0x23d   : > { %2557 = vst.msk [vmem:[#allocation3 + $0x94] sm:$0xf] %vm2000_vm9, %v2354_v24  ;;  %2560 = vst [vmem:[#allocation3 + $0x98] sm:$0x1] %v2559_v25  ;;  %v3420_v17 = vsel %vm1716_vm3, %v3388_v21, %v3138_v33  ;;  %3155 = vrot.lane.b32.xlu1 %v2912_v53, %s6551_s15  ;;  %3272 = vrot.lane.b32.xlu0 %v2912_v53, %s6557_s17  ;;  %v3326_v50 = vsel %vm1518_vm12, %v6472_v2, %v2976_v31  ;;  %v2561_v2 = vld [vmem:[#allocation3 + $0x9c] sm:$0xf] }
 0x23e   : > { %v3453_v46 = vsel %vm3451_vm13, %v3420_v17, %v7856_v49  ;;  %v2337_v36 = vsel %vm6760_vm7, %v2329_v47, %v2336_v44  ;;  %v2552_v38 = vsel %vm7556_vm4, %v2338_v32, %v2551_v30  ;;  %v3358_v26 = vsel %vm1584_vm14, %v3326_v50, %v7833_v59  ;;  %v6473_v30 = vld [vmem:[#allocation3 + $0x18] sm:$0xff]  }
 0x23f   : > { %v3486_v8 = vsel %vm3484_vm15, %v3453_v46, %v7794_v34  ;;  %2550 = vst.msk [vmem:[#allocation3 + $0x88] sm:$0xf] %vm2000_vm9, %v2337_v36  ;;  %2553 = vst [vmem:[#allocation3 + $0x8c] sm:$0x1] %v2552_v38  ;;  %v7921_v61 = vpop.permute.xlu1 %3211  ;;  %v7923_v49 = vpop.permute.xlu0 %3094  ;;  %v3390_v59 = vsel %vm1650_vm0, %v3358_v26, %v7805_v43  ;;  %v3328_v31 = vsel %vm1518_vm12, %v6473_v30, %v7879_v35 }
 0x240   : > { %v3519_v39 = vsel %vm3517_vm1, %v3486_v8, %v7881_v28  ;;  %v3422_v43 = vsel %vm1716_vm3, %v3390_v59, %v7854_v18 }
 0x241   : > { %v3552_v41 = vsel %vm3550_vm10, %v3519_v39, %v7821_v5  ;;  %2993 = vrot.lane.b32.xlu1 %v2912_v53, %s6546_s10  ;;  %3153 = vrot.lane.b32.xlu0 %v2900_v40, %s6551_s15 }
 0x242   : > { %6297 = vmatprep.mubr.msk.bf16.mxu1 %vm3616_vm2, %v3552_v41 }
 0x243   : > { %v7933_v34 = vpop.permute.xlu1 %3178  ;;  %v7935_v45 = vpop.permute.xlu0 %3295 }
 0x244   : > { %v7964_v12 = vld [vmem:[#allocation3 + $0x90] sm:$0xff]  }
 0x245   : > { %3270 = vrot.lane.b32.xlu1 %v2900_v40, %s6557_s17 }
 0x246   : > { %v7938_v57 = vld [vmem:[#allocation3 + $0x84] sm:$0xff]   ;;  %v6448_v54 = vld [vmem:[#allocation3 + $0x8c] ss:$0 sps:$4 sm:$0x11]  }
 0x247   : > { %v7940_v28 = vpop.permute.xlu1 %3059  ;;  %v7942_v51 = vpop.permute.xlu0 %3061  ;;  %v3038_v5 = vrot.slane %v7938_v57, 1  ;;  %v2916_v56 = vshll.u32 %v7938_v57, 16  ;;  %v3039_v60 = vrot.slane %v6448_v54, 1  ;;  %v2914_v29 = vshrl.u32 %v7938_v57, 16 }
 0x248   : > { %v2921_v20 = vshll.u32 %v6448_v54, 16 }
 0x249   : > { %2991 = vrot.lane.b32.xlu1 %v2900_v40, %s6546_s10  ;;  %v7950_v1 = vsel %vm1166_vm6, %v3038_v5, %v3039_v60  ;;  %v2918_v37 = vrot.slane %v2916_v56, 1  ;;  %v3455_v5 = vsel %vm3451_vm13, %v3422_v43, %v7819_v62  ;;  %v3360_v56 = vsel %vm1584_vm14, %v3328_v31, %v7835_v6  ;;  %v7993_v60 = vld [vmem:[#allocation3 + $0x98] ss:$0 sps:$4 sm:$0x11]   ;;  %v2572_v6 = vld [vmem:[#allocation3 + $0xb0] sm:$0x1] }
 0x24a   : > { %3309 = vrot.lane.b32.xlu0 %v7950_v1, %s6556_s14  ;;  %v2923_v44 = vrot.slane %v2921_v20, 1  ;;  %v3392_v62 = vsel %vm1650_vm0, %v3360_v56, %v7923_v49 }
 0x24b   : > { %v6281_v63 = vpop.f32.mrf.mxu0  ;;  %v7952_v55 = vpop.permute.xlu0 %3293  ;;  %v2919_v25 = vor.u32 %v2918_v37, %v2914_v29  ;;  %v2926_v29 = vshrl.u32 %v7964_v12, 16 }
 0x24c   : > { %v1946_v42 = vadd.f32 %v7845_v3, %v6281_v63  ;;  %v7958_v10 = vpop.permute.xlu1 %3143 }
 0x24d   : > { %v1937_v7 = vpop.f32.mrf.mxu0  ;;  %3227 = vrot.lane.b32.xlu1 %v7938_v57, %s6554_s11  ;;  %v2924_v18 = vsel %vm9110_vm8, %v2919_v25, %v2923_v44  ;;  %v2933_v25 = vshll.u32 %v7993_v60, 16 }
 0x24e   : > { %v1994_v9 = vmax.f32 %v1946_v42, 0.0  ;;  %v1938_v13 = vadd.f32 %v7845_v3, %v1937_v7  ;;  %3073 = vrot.lane.b32.xlu0 %v7867_v27, %s6552_s16  ;;  %v2928_v27 = vshll.u32 %v7964_v12, 16 }
 0x24f   : > { %v6282_v19 = vpop.f32.mrf.mxu0  ;;  %v7969_v15 = vpop.permute.xlu0 %3176 }
 0x250   : > { %v6203_v21 = vpack.c.bf16 %v1994_v9, %v1994_v9  ;;  %v1992_v48 = vmax.f32 %v1938_v13, 0.0  ;;  %v1949_v22 = vadd.f32 %v7845_v3, %v6282_v19  ;;  %v7981_v38 = vpop.permute.xlu1 %2981  ;;  %v2930_v63 = vrot.slane %v2928_v27, 1 }
 0x251   : > { %v1940_v24 = vpop.f32.mrf.mxu0  ;;  %3075 = vrot.lane.b32.xlu1 %v7950_v1, %s6552_s16 }
 0x252   : > { %v2374_v33 = vshrl.u32 %v6203_v21, 16  ;;  %v6201_v53 = vpack.c.bf16 %v1992_v48, %v1992_v48  ;;  %v1995_v4 = vmax.f32 %v1949_v22, 0.0  ;;  %v1941_v47 = vadd.f32 %v7845_v3, %v1940_v24  ;;  %3110 = vrot.lane.b32.xlu0 %v7938_v57, %s6549_s13 }
 0x253   : > { %v2377_v17 = vshll.u32 %v6203_v21, 16  ;;  %v7983_v35 = vpop.permute.xlu0 %3260  ;;  %v3488_v22 = vsel %vm3484_vm15, %v3455_v5, %v7921_v61 }
 0x254   : > { %v2376_v32 = vrot.slane %v2374_v33, 7  ;;  %v2357_v46 = vshrl.u32 %v6201_v53, 16  ;;  %v6204_v36 = vpack.c.bf16 %v1995_v4, %v1995_v4  ;;  %v1993_v8 = vmax.f32 %v1941_v47, 0.0 }
 0x255   : > { %v2360_v41 = vshll.u32 %v6201_v53, 16  ;;  %3274 = vrot.lane.b32.xlu1 %v2924_v18, %s6557_s17  ;;  %v2565_v53 = vld [vmem:[#allocation3 + $0xa4] sm:$0x1]  ;;  %v2931_v47 = vor.u32 %v2930_v63, %v2926_v29 }
 0x256   : > { %v2379_v39 = vor.u32 %v2377_v17, %v2376_v32  ;;  %v2359_v40 = vrot.slane %v2357_v46, 7  ;;  %v2382_v54 = vshrl.u32 %v6204_v36, 16  ;;  %v6202_v50 = vpack.c.bf16 %v1993_v8, %v1993_v8  ;;  %3157 = vrot.lane.b32.xlu0 %v2924_v18, %s6551_s15 }
 0x257   : > { %v2385_v37 = vshll.u32 %v6204_v36, 16  ;;  %v7997_v9 = vpop.permute.xlu1 %3100  ;;  %v7999_v13 = vpop.permute.xlu0 %3217  ;;  %v2380_v20 = vrot.slane %v2376_v32, 4  ;;  %v2935_v8 = vrot.slane %v2933_v25, 1 }
 0x258   : > { %v2569_v42 = vsel %vm7548_vm5, %v2379_v39, %v2568_v11  ;;  %v2362_v26 = vor.u32 %v2360_v41, %v2359_v40  ;;  %v2384_v7 = vrot.slane %v2382_v54, 7  ;;  %v2365_v19 = vshrl.u32 %v6202_v50, 16 }
 0x259   : > { %2570 = vst [vmem:[#allocation3 + $0xa8] sm:$0xf] %v2569_v42  ;;  %2995 = vrot.lane.b32.xlu1 %v2924_v18, %s6546_s10  ;;  %v2368_v24 = vshll.u32 %v6202_v50, 16  ;;  %v2363_v30 = vrot.slane %v2359_v40, 4  ;;  %v8041_v39 = vsel %vm9112_vm11, %v2931_v47, %v2935_v8  ;;  %v3041_v40 = vrot.slane %v7964_v12, 1 }
 0x25a   : > { %v2562_v59 = vsel %vm7548_vm5, %v2362_v26, %v2561_v2  ;;  %v2387_v21 = vor.u32 %v2385_v37, %v2384_v7  ;;  %v2389_v48 = vrot.slane %v2384_v7, 4  ;;  %v2367_v49 = vrot.slane %v2365_v19, 7  ;;  %3192 = vrot.lane.b32.xlu0 %v7950_v1, %s6555_s12 }
 0x25b   : > { %2563 = vst [vmem:[#allocation3 + $0x9c] sm:$0xf] %v2562_v59  ;;  %v3259_v4 = vpop.permute.xlu1 %3258  ;;  %v3142_v43 = vpop.permute.xlu0 %3141  ;;  %v3042_v41 = vrot.slane %v7993_v60, 1  ;;  %v6474_v59 = vld [vmem:[#allocation3 + $0x24] sm:$0xff]   ;;  %vm5703_vm11 = vcmask 1041409  }
 0x25c   : > { %v2388_v31 = vsel %vm6760_vm7, %v2380_v20, %v2387_v21  ;;  %v2573_v33 = vsel %vm7556_vm4, %v2389_v48, %v2572_v6  ;;  %v2370_v61 = vor.u32 %v2368_v24, %v2367_v49  ;;  %v2372_v44 = vrot.slane %v2367_v49, 4 }
 0x25d   : > { %2571 = vst.msk [vmem:[#allocation3 + $0xac] sm:$0xf] %vm2000_vm9, %v2388_v31  ;;  %2574 = vst [vmem:[#allocation3 + $0xb0] sm:$0x1] %v2573_v33  ;;  %v3521_v27 = vsel %vm3517_vm1, %v3488_v22, %v3259_v4  ;;  %v3424_v32 = vsel %vm1716_vm3, %v3392_v62, %v3142_v43  ;;  %3112 = vrot.lane.b32.xlu1 %v7964_v12, %s6549_s13  ;;  %v3043_v5 = vsel %vm1166_vm6, %v3041_v40, %v3042_v41 }
 0x25e   : > { %v3457_v17 = vsel %vm3451_vm13, %v3424_v32, %v7969_v15  ;;  %v3554_v46 = vsel %vm3550_vm10, %v3521_v27, %v7952_v55  ;;  %v2371_v36 = vsel %vm6760_vm7, %v2363_v30, %v2370_v61  ;;  %v2566_v11 = vsel %vm7556_vm4, %v2372_v44, %v2565_v53  ;;  %3229 = vrot.lane.b32.xlu0 %v7964_v12, %s6554_s11 }
 0x25f   : > { %v3490_v1 = vsel %vm3484_vm15, %v3457_v17, %v7893_v52  ;;  %6298 = vmatmul.mubr.msk.bf16.vlgmr.msra.gmra.mxu1 %vm3616_vm2, %v3554_v46  ;;  %2564 = vst.msk [vmem:[#allocation3 + $0xa0] sm:$0xf] %vm2000_vm9, %v2371_v36  ;;  %2567 = vst [vmem:[#allocation3 + $0xa4] sm:$0x1] %v2566_v11  ;;  %v2980_v15 = vpop.permute.xlu1 %2979  ;;  %v8034_v18 = vpop.permute.xlu0 %3098 }
 0x260   : > { %v3523_v55 = vsel %vm3517_vm1, %v3490_v1, %v7983_v35  ;;  %v3330_v21 = vsel %vm1518_vm12, %v6474_v59, %v2980_v15  ;;  %v2582_v15 = vld [vmem:[#allocation3 + $0xc0] sm:$0xf] }
 0x261   : > { %v3556_v52 = vsel %vm3550_vm10, %v3523_v55, %v7935_v45  ;;  %3159 = vrot.lane.b32.xlu1 %v8041_v39, %s6551_s15  ;;  %v3362_v43 = vsel %vm1584_vm14, %v3330_v21, %v7940_v28 }
 0x262   : > { %6301 = vmatprep.mubr.msk.bf16.mxu1 %vm3616_vm2, %v3556_v52  ;;  %3276 = vrot.lane.b32.xlu0 %v8041_v39, %s6557_s17  ;;  %v3394_v28 = vsel %vm1650_vm0, %v3362_v43, %v7891_v0 }
 0x263   : > { %v8050_v54 = vpop.permute.xlu1 %3215  ;;  %v8052_v35 = vpop.permute.xlu0 %3299 }
 0x265   : > { %3194 = vrot.lane.b32.xlu1 %v3043_v5, %s6555_s12 }
 0x266   : > { %v8058_v45 = vld [vmem:[#allocation3 + $0x9c] sm:$0xff]   ;;  %v6456_v50 = vld [vmem:[#allocation3 + $0xa4] ss:$0 sps:$4 sm:$0x11]   ;;  %3311 = vrot.lane.b32.xlu0 %v3043_v5, %s6556_s14 }
 0x267   : > { %v8060_v2 = vpop.permute.xlu1 %3182  ;;  %v8064_v63 = vpop.permute.xlu0 %3065  ;;  %v3044_v42 = vrot.slane %v8058_v45, 1  ;;  %v2940_v26 = vshll.u32 %v8058_v45, 16  ;;  %v3045_v37 = vrot.slane %v6456_v50, 1  ;;  %v2945_v62 = vshll.u32 %v6456_v50, 16 }
 0x268   : > { %v6285_v56 = vpop.f32.mrf.mxu0  ;;  %v2938_v29 = vshrl.u32 %v8058_v45, 16 }
 0x269   : > { %v1962_v60 = vadd.f32 %v7845_v3, %v6285_v56  ;;  %3231 = vrot.lane.b32.xlu1 %v8058_v45, %s6554_s11  ;;  %v2942_v20 = vrot.slane %v2940_v26, 1  ;;  %v8074_v22 = vsel %vm1166_vm6, %v3044_v42, %v3045_v37  ;;  %v2947_v4 = vrot.slane %v2945_v62, 1  ;;  %v2575_v56 = vld [vmem:[#allocation3 + $0xb4] sm:$0xf]  ;;  %v8097_v42 = vld [vmem:[#allocation3 + $0xa8] sm:$0xff]  }
 0x26a   : > { %v1953_v7 = vpop.f32.mrf.mxu0  ;;  %3313 = vrot.lane.b32.xlu0 %v8074_v22, %s6556_s14  ;;  %v3426_v62 = vsel %vm1716_vm3, %v3394_v28, %v7958_v10  ;;  %v2952_v10 = vshll.u32 %v8097_v42, 16  ;;  %v2950_v28 = vshrl.u32 %v8097_v42, 16 }
 0x26b   : > { %v1998_v6 = vmax.f32 %v1962_v60, 0.0  ;;  %v1954_v19 = vadd.f32 %v7845_v3, %v1953_v7  ;;  %v8076_v49 = vpop.permute.xlu1 %3063  ;;  %v8081_v31 = vpop.permute.xlu0 %3297  ;;  %v2943_v33 = vor.u32 %v2942_v20, %v2938_v29 }
 0x26c   : > { %v6286_v48 = vpop.f32.mrf.mxu0 }
 0x26d   : > { %v6207_v24 = vpack.c.bf16 %v1998_v6, %v1998_v6  ;;  %v1996_v25 = vmax.f32 %v1954_v19, 0.0  ;;  %v1965_v30 = vadd.f32 %v7845_v3, %v6286_v48  ;;  %v2948_v32 = vsel %vm9110_vm8, %v2943_v33, %v2947_v4  ;;  %v2586_v6 = vld [vmem:[#allocation3 + $0xc8] sm:$0x1]  ;;  %v6475_v48 = vld [vmem:[#allocation3 + $0x30] sm:$0xff]   ;;  %v2579_v4 = vld [vmem:[#allocation3 + $0xbc] sm:$0x1] }
 0x26e   : > { %v1956_v53 = vpop.f32.mrf.mxu0  ;;  %3278 = vrot.lane.b32.xlu1 %v2948_v32, %s6557_s17  ;;  %3077 = vrot.lane.b32.xlu0 %v3043_v5, %s6552_s16  ;;  %v3459_v33 = vsel %vm3451_vm13, %v3426_v62, %v7933_v34  ;;  %v6458_v34 = vld [vmem:[#allocation3 + $0xb0] ss:$0 sps:$4 sm:$0x11]  }
 0x26f   : > { %v2408_v47 = vshrl.u32 %v6207_v24, 16  ;;  %v6205_v61 = vpack.c.bf16 %v1996_v25, %v1996_v25  ;;  %v1999_v44 = vmax.f32 %v1965_v30, 0.0  ;;  %v1957_v27 = vadd.f32 %v7845_v3, %v1956_v53  ;;  %v8087_v17 = vpop.permute.xlu1 %3147  ;;  %v8091_v8 = vpop.permute.xlu0 %3180 }
 0x270   : > { %v2411_v36 = vshll.u32 %v6207_v24, 16 }
 0x271   : > { %v2410_v46 = vrot.slane %v2408_v47, 7  ;;  %v2391_v11 = vshrl.u32 %v6205_v61, 16  ;;  %v6208_v1 = vpack.c.bf16 %v1999_v44, %v1999_v44  ;;  %v1997_v55 = vmax.f32 %v1957_v27, 0.0 }
 0x272   : > { %v2394_v40 = vshll.u32 %v6205_v61, 16  ;;  %2997 = vrot.lane.b32.xlu1 %v8041_v39, %s6546_s10  ;;  %3114 = vrot.lane.b32.xlu0 %v8058_v45, %s6549_s13  ;;  %v3332_v39 = vsel %vm1518_vm12, %v6475_v48, %v7981_v38  ;;  %v3492_v27 = vsel %vm3484_vm15, %v3459_v33, %v8050_v54 }
 0x273   : > { %v2413_v3 = vor.u32 %v2411_v36, %v2410_v46  ;;  %v2393_v52 = vrot.slane %v2391_v11, 7  ;;  %v2416_v41 = vshrl.u32 %v6208_v1, 16  ;;  %v6206_v50 = vpack.c.bf16 %v1997_v55, %v1997_v55  ;;  %v8095_v60 = vpop.permute.xlu1 %2985  ;;  %v3265_v0 = vpop.permute.xlu0 %3264 }
 0x274   : > { %v2419_v37 = vshll.u32 %v6208_v1, 16  ;;  %v2414_v29 = vrot.slane %v2410_v46, 4  ;;  %v3364_v44 = vsel %vm1584_vm14, %v3332_v39, %v7942_v51  ;;  %v2954_v11 = vrot.slane %v2952_v10, 1 }
 0x275   : > { %v2583_v5 = vsel %vm7548_vm5, %v2413_v3, %v2582_v15  ;;  %v2396_v26 = vor.u32 %v2394_v40, %v2393_v52  ;;  %v2418_v7 = vrot.slane %v2416_v41, 7  ;;  %v2399_v19 = vshrl.u32 %v6206_v50, 16 }
 0x276   : > { %2584 = vst [vmem:[#allocation3 + $0xc0] sm:$0xf] %v2583_v5  ;;  %v2402_v25 = vshll.u32 %v6206_v50, 16  ;;  %2999 = vrot.lane.b32.xlu1 %v2948_v32, %s6546_s10  ;;  %3161 = vrot.lane.b32.xlu0 %v2948_v32, %s6551_s15  ;;  %v2397_v43 = vrot.slane %v2393_v52, 4  ;;  %v3396_v1 = vsel %vm1650_vm0, %v3364_v44, %v8034_v18  ;;  %v2957_v18 = vshll.u32 %v6458_v34, 16 }
 0x277   : > { %v2576_v20 = vsel %vm7548_vm5, %v2396_v26, %v2575_v56  ;;  %v2421_v59 = vor.u32 %v2419_v37, %v2418_v7  ;;  %v2423_v21 = vrot.slane %v2418_v7, 4  ;;  %v2401_v24 = vrot.slane %v2399_v19, 7  ;;  %v8111_v30 = vpop.permute.xlu1 %3104  ;;  %v8122_v38 = vpop.permute.xlu0 %3221  ;;  %vm9113_vm5 = vmmov %vm9110_vm8 }
 0x278   : > { %2577 = vst [vmem:[#allocation3 + $0xb4] sm:$0xf] %v2576_v20  ;;  %v2955_v3 = vor.u32 %v2954_v11, %v2950_v28  ;;  %v3047_v41 = vrot.slane %v8097_v42, 1  ;;  %v3048_v50 = vrot.slane %v6458_v34, 1  ;;  %vm5705_vm8 = vcmask 1042434  }
 0x279   : > { %v2422_v14 = vsel %vm6760_vm7, %v2414_v29, %v2421_v59  ;;  %v2587_v53 = vsel %vm7556_vm4, %v2423_v21, %v2586_v6  ;;  %v2404_v47 = vor.u32 %v2402_v25, %v2401_v24  ;;  %v2406_v61 = vrot.slane %v2401_v24, 4  ;;  %v6476_v24 = vld [vmem:[#allocation3 + $0x3c] sm:$0xff]  }
 0x27a   : > { %2585 = vst.msk [vmem:[#allocation3 + $0xc4] sm:$0xf] %vm2000_vm9, %v2422_v14  ;;  %2588 = vst [vmem:[#allocation3 + $0xc8] sm:$0x1] %v2587_v53  ;;  %3079 = vrot.lane.b32.xlu1 %v8074_v22, %s6552_s16  ;;  %3196 = vrot.lane.b32.xlu0 %v8074_v22, %s6555_s12  ;;  %v3049_v37 = vsel %vm1166_vm6, %v3047_v41, %v3048_v50 }
 0x27b   : > { %v2405_v46 = vsel %vm6760_vm7, %v2397_v43, %v2404_v47  ;;  %v2580_v32 = vsel %vm7556_vm4, %v2406_v61, %v2579_v4  ;;  %v3263_v36 = vpop.permute.xlu1 %3262  ;;  %v3146_v51 = vpop.permute.xlu0 %3145  ;;  %vm9114_vm7 = vmmov %vm9113_vm5 }
 0x27c   : > { %2578 = vst.msk [vmem:[#allocation3 + $0xb8] sm:$0xf] %vm2000_vm9, %v2405_v46  ;;  %2581 = vst [vmem:[#allocation3 + $0xbc] sm:$0x1] %v2580_v32  ;;  %v3525_v16 = vsel %vm3517_vm1, %v3492_v27, %v3263_v36  ;;  %v3428_v23 = vsel %vm1716_vm3, %v3396_v1, %v3146_v51  ;;  %v6477_v32 = vld [vmem:[#allocation3 + $0x48] sm:$0xff]  }
 0x27d   : > { %v3558_v54 = vsel %vm3550_vm10, %v3525_v16, %v8081_v31  ;;  %v3461_v15 = vsel %vm3451_vm13, %v3428_v23, %v8091_v8  ;;  %v2959_v8 = vrot.slane %v2957_v18, 1  ;;  %v3336_v36 = vsel %vm1518_vm12, %v6477_v32, %v8095_v60  ;;  %vm9115_vm9 = vmmov %vm9113_vm5 }
 0x27e   : > { %6302 = vmatmul.mubr.msk.bf16.gmra.mxu1 %vm3616_vm2, %v3558_v54  ;;  %v3494_v55 = vsel %vm3484_vm15, %v3461_v15, %v7999_v13  ;;  %3116 = vrot.lane.b32.xlu1 %v8097_v42, %s6549_s13  ;;  %vm9116_vm4 = vmmov %vm9113_vm5 }
 0x27f   : > { %v2984_v22 = vpop.permute.xlu1 %2983  ;;  %3233 = vrot.lane.b32.xlu0 %v8097_v42, %s6554_s11  ;;  %v3103_v31 = vpop.permute.xlu0 %3102  ;;  %v3527_v52 = vsel %vm3517_vm1, %v3494_v55, %v3265_v0  ;;  %v2960_v13 = vsel %vm9113_vm5, %v2955_v3, %v2959_v8  ;;  %vm5709_vm5 = vcmask 1044484  }
 0x280   : > { %v3560_v40 = vsel %vm3550_vm10, %v3527_v52, %v8052_v35  ;;  %v3334_v25 = vsel %vm1518_vm12, %v6476_v24, %v2984_v22 }
 0x281   : > { %6305 = vmatprep.mubr.msk.bf16.mxu1 %vm3616_vm2, %v3560_v40  ;;  %v3366_v14 = vsel %vm1584_vm14, %v3334_v25, %v8076_v49  ;;  %v6461_v34 = vld [vmem:[#allocation3 + $0xc0] sm:$0xff]   ;;  %v6462_v1 = vld [vmem:[#allocation3 + $0xc8] ss:$0 sps:$4 sm:$0x11]  }
 0x282   : > { %3163 = vrot.lane.b32.xlu1 %v2960_v13, %s6551_s15  ;;  %v3398_v47 = vsel %vm1650_vm0, %v3366_v14, %v7997_v9  ;;  %v3128_v46 = vshll.u32 %v6461_v34, 16  ;;  %v3126_v15 = vshrl.u32 %v6461_v34, 16  ;;  %v3133_v55 = vshll.u32 %v6462_v1, 16 }
 0x283   : > { %v3220_v56 = vpop.permute.xlu1 %3219  ;;  %v8160_v5 = vld [vmem:[#allocation3 + $0xb4] sm:$0xff]   ;;  %3280 = vrot.lane.b32.xlu0 %v2960_v13, %s6557_s17  ;;  %v8164_v26 = vpop.permute.xlu0 %3303  ;;  %v6460_v7 = vld [vmem:[#allocation3 + $0xbc] ss:$0 sps:$4 sm:$0x11]   ;;  %v3430_v44 = vsel %vm1716_vm3, %v3398_v47, %v8087_v17  ;;  %v3368_v17 = vsel %vm1584_vm14, %v3336_v36, %v8064_v63  ;;  %v6463_v63 = vld [vmem:[#allocation3 + $0xcc] sm:$0xff]  }
 0x284   : > { %v2964_v35 = vshll.u32 %v8160_v5, 16  ;;  %v3050_v62 = vrot.slane %v8160_v5, 1  ;;  %v3051_v6 = vrot.slane %v6460_v7, 1  ;;  %v2962_v20 = vshrl.u32 %v8160_v5, 16 }
 0x285   : > { %v2969_v59 = vshll.u32 %v6460_v7, 16  ;;  %v3463_v9 = vsel %vm3451_vm13, %v3430_v44, %v8060_v2  ;;  %v3130_v23 = vrot.slane %v3128_v46, 1  ;;  %v3400_v54 = vsel %vm1650_vm0, %v3368_v17, %v3103_v31  ;;  %v6479_v46 = vld [vmem:[#allocation3 + $0x60] sm:$0xff]  }
 0x286   : > { %v2966_v19 = vrot.slane %v2964_v35, 1  ;;  %3198 = vrot.lane.b32.xlu1 %v3049_v37, %s6555_s12  ;;  %v3052_v21 = vsel %vm1166_vm6, %v3050_v62, %v3051_v6  ;;  %v3496_v16 = vsel %vm3484_vm15, %v3463_v9, %v3220_v56  ;;  %v6464_v56 = vld [vmem:[#allocation3 + $0xd4] ss:$0 sps:$4 sm:$0x11]   ;;  %v3247_v50 = vshll.u32 %v6463_v63, 16 }
 0x287   : > { %v8168_v0 = vpop.permute.xlu1 %3186  ;;  %3315 = vrot.lane.b32.xlu0 %v3049_v37, %s6556_s14  ;;  %v8173_v29 = vpop.permute.xlu0 %3069  ;;  %v2971_v33 = vrot.slane %v2969_v59, 1  ;;  %v3131_v52 = vor.u32 %v3130_v23, %v3126_v15  ;;  %v3169_v35 = vrot.slane %v6461_v34, 1  ;;  %v3245_v6 = vshrl.u32 %v6463_v63, 16 }
 0x288   : > { %v2967_v39 = vor.u32 %v2966_v19, %v2962_v20  ;;  %v3249_v19 = vrot.slane %v3247_v50, 1  ;;  %v3252_v20 = vshll.u32 %v6464_v56, 16  ;;  %v3288_v47 = vrot.slane %v6463_v63, 1 }
 0x28a   : > { %3235 = vrot.lane.b32.xlu1 %v8160_v5, %s6554_s11  ;;  %v2972_v53 = vsel %vm9114_vm7, %v2967_v39, %v2971_v33  ;;  %v3250_v25 = vor.u32 %v3249_v19, %v3245_v6  ;;  %vm5711_vm7 = vcmask 1045509  }
 0x28b   : > { %v8177_v48 = vpop.permute.xlu1 %3067  ;;  %3317 = vrot.lane.b32.xlu0 %v3052_v21, %s6556_s14  ;;  %v3302_v10 = vpop.permute.xlu0 %3301 }
 0x28e   : > { %3282 = vrot.lane.b32.xlu1 %v2972_v53, %s6557_s17 }
 0x28f   : > { %v8186_v4 = vpop.permute.xlu1 %3151  ;;  %3081 = vrot.lane.b32.xlu0 %v3049_v37, %s6552_s16  ;;  %v3185_v43 = vpop.permute.xlu0 %3184  ;;  %v3170_v37 = vrot.slane %v6462_v1, 1 }
 0x292   : > { %3001 = vrot.lane.b32.xlu1 %v2960_v13, %s6546_s10  ;;  %v3135_v13 = vrot.slane %v3133_v55, 1 }
 0x293   : > { %v8192_v61 = vpop.permute.xlu1 %2989  ;;  %3118 = vrot.lane.b32.xlu0 %v8160_v5, %s6549_s13  ;;  %v3269_v49 = vpop.permute.xlu0 %3268 }
 0x294   : > { %v3136_v7 = vsel %vm9115_vm9, %v3131_v52, %v3135_v13  ;;  %v3340_v32 = vsel %vm1518_vm12, %v6479_v46, %v8192_v61  ;;  %vm5713_vm9 = vcmask 1046534  }
 0x295   : > { %v3372_v1 = vsel %vm1584_vm14, %v3340_v32, %v8173_v29 }
 0x296   : > { %3003 = vrot.lane.b32.xlu1 %v2972_v53, %s6546_s10 }
 0x297   : > { %v8199_v27 = vpop.permute.xlu1 %3108  ;;  %3165 = vrot.lane.b32.xlu0 %v2972_v53, %s6551_s15  ;;  %v8207_v11 = vpop.permute.xlu0 %3225 }
 0x29a   : > { %3083 = vrot.lane.b32.xlu1 %v3052_v21, %s6552_s16 }
 0x29b   : > { %v3267_v51 = vpop.permute.xlu1 %3266  ;;  %3200 = vrot.lane.b32.xlu0 %v3052_v21, %s6555_s12  ;;  %v3150_v60 = vpop.permute.xlu0 %3149  ;;  %v6478_v21 = vld [vmem:[#allocation3 + $0x54] sm:$0xff]  }
 0x29c   : > { %v3529_v2 = vsel %vm3517_vm1, %v3496_v16, %v3267_v51  ;;  %v3432_v28 = vsel %vm1716_vm3, %v3400_v54, %v3150_v60 }
 0x29d   : > { %v3562_v18 = vsel %vm3550_vm10, %v3529_v2, %v3302_v10  ;;  %v3465_v22 = vsel %vm3451_vm13, %v3432_v28, %v3185_v43  ;;  %v3254_v10 = vrot.slane %v3252_v20, 1 }
 0x29e   : > { %6306 = vmatmul.mubr.msk.bf16.gmra.mxu1 %vm3616_vm2, %v3562_v18  ;;  %v3498_v3 = vsel %vm3484_vm15, %v3465_v22, %v8122_v38  ;;  %3120 = vrot.lane.b32.xlu1 %v6461_v34, %s6549_s13 }
 0x29f   : > { %v2988_v31 = vpop.permute.xlu1 %2987  ;;  %3237 = vrot.lane.b32.xlu0 %v6461_v34, %s6554_s11  ;;  %v3107_v40 = vpop.permute.xlu0 %3106  ;;  %v3531_v8 = vsel %vm3517_vm1, %v3498_v3, %v3269_v49  ;;  %v3255_v43 = vsel %vm9116_vm4, %v3250_v25, %v3254_v10  ;;  %v3289_v34 = vrot.slane %v6464_v56, 1  ;;  %vm5715_vm4 = vcmask 1047559  }
 0x2a0   : > { %v3564_v41 = vsel %vm3550_vm10, %v3531_v8, %v8164_v26  ;;  %v3171_v26 = vsel %vm1166_vm6, %v3169_v35, %v3170_v37  ;;  %v3338_v39 = vsel %vm1518_vm12, %v6478_v21, %v2988_v31  ;;  %v3404_v16 = vsel %vm1650_vm0, %v3372_v1, %v3107_v40 }
 0x2a1   : > { %6309 = vmatprep.mubr.msk.bf16.mxu1 %vm3616_vm2, %v3564_v41  ;;  %v3370_v33 = vsel %vm1584_vm14, %v3338_v39, %v8177_v48  ;;  %v3290_v9 = vsel %vm1166_vm6, %v3288_v47, %v3289_v34  ;;  %vm4550_vm6 = vcmask 58368  }
 0x2a2   : > { %3167 = vrot.lane.b32.xlu1 %v3136_v7, %s6551_s15  ;;  %v3402_v49 = vsel %vm1650_vm0, %v3370_v33, %v8111_v30 }
 0x2a3   : > { %v3224_v38 = vpop.permute.xlu1 %3223  ;;  %3284 = vrot.lane.b32.xlu0 %v3136_v7, %s6557_s17  ;;  %v3308_v62 = vpop.permute.xlu0 %3307  ;;  %v3434_v48 = vsel %vm1716_vm3, %v3402_v49, %v8186_v4 }
 0x2a4   : > { %v3467_v30 = vsel %vm3451_vm13, %v3434_v48, %v8168_v0 }
 0x2a5   : > { %v3500_v4 = vsel %vm3484_vm15, %v3467_v30, %v3224_v38 }
 0x2a6   : > { %3202 = vrot.lane.b32.xlu1 %v3171_v26, %s6555_s12 }
 0x2a7   : > { %v3191_v59 = vpop.permute.xlu1 %3190  ;;  %3319 = vrot.lane.b32.xlu0 %v3171_v26, %s6556_s14  ;;  %v3306_v24 = vpop.permute.xlu0 %3305 }
 0x2aa   : > { %3239 = vrot.lane.b32.xlu1 %v6463_v63, %s6554_s11 }
 0x2ab   : > { %v3072_v14 = vpop.permute.xlu1 %3071  ;;  %v3189_v53 = vpop.permute.xlu0 %3188 }
 0x2ae   : > { %3286 = vrot.lane.b32.xlu1 %v3255_v43, %s6557_s17 }
 0x2af   : > { %v3156_v44 = vpop.permute.xlu1 %3155  ;;  %v3273_v36 = vpop.permute.xlu0 %3272 }
 0x2b2   : > { %3321 = vrot.lane.b32.xlu1 %v3290_v9, %s6556_s14 }
 0x2b3   : > { %v2994_v17 = vpop.permute.xlu1 %2993  ;;  %v3154_v61 = vpop.permute.xlu0 %3153 }
 0x2b4   : > { %v3436_v51 = vsel %vm1716_vm3, %v3404_v16, %v3154_v61 }
 0x2b5   : > { %v3469_v23 = vsel %vm3451_vm13, %v3436_v51, %v3189_v53 }
 0x2b6   : > { %v3502_v54 = vsel %vm3484_vm15, %v3469_v23, %v8207_v11 }
 0x2b7   : > { %v3271_v2 = vpop.permute.xlu1 %3270  ;;  %v3535_v60 = vsel %vm3517_vm1, %v3502_v54, %v3273_v36 }
 0x2b8   : > { %v3533_v29 = vsel %vm3517_vm1, %v3500_v4, %v3271_v2  ;;  %v3568_v0 = vsel %vm3550_vm10, %v3535_v60, %v3308_v62  ;;  %v6480_v62 = vld [vmem:[#allocation3 + $0x78] sm:$0xff]  }
 0x2b9   : > { %v3566_v28 = vsel %vm3550_vm10, %v3533_v29, %v3306_v24  ;;  %v3344_v6 = vsel %vm1518_vm12, %v6480_v62, %v2994_v17 }
 0x2ba   : > { %6310 = vmatmul.mubr.msk.bf16.gmra.mxu1 %vm3616_vm2, %v3566_v28 }
 0x2bb   : > { %v2992_v18 = vpop.permute.xlu1 %2991  ;;  %6313 = vmatprep.mubr.msk.bf16.mxu1 %vm3616_vm2, %v3568_v0 }
 0x2bc   : > { %v3342_v15 = vsel %vm1518_vm12, %v7848_v58, %v2992_v18  ;;  %v3310_v63 = vpop.permute.xlu0 %3309 }
 0x2bd   : > { %v3374_v55 = vsel %vm1584_vm14, %v3342_v15, %v3072_v14 }
 0x2be   : > { %v3406_v11 = vsel %vm1650_vm0, %v3374_v55, %v8199_v27 }
 0x2bf   : > { %v3228_v22 = vpop.permute.xlu1 %3227  ;;  %v3438_v3 = vsel %vm1716_vm3, %v3406_v11, %v3156_v44 }
 0x2c0   : > { %v3074_v31 = vpop.permute.xlu0 %3073  ;;  %v3471_v40 = vsel %vm3451_vm13, %v3438_v3, %v3191_v59 }
 0x2c1   : > { %v3504_v41 = vsel %vm3484_vm15, %v3471_v40, %v3228_v22  ;;  %v3376_v19 = vsel %vm1584_vm14, %v3344_v6, %v3074_v31 }
 0x2c3   : > { %v3076_v52 = vpop.permute.xlu1 %3075 }
 0x2c4   : > { %v3111_v8 = vpop.permute.xlu0 %3110 }
 0x2c5   : > { %v3408_v20 = vsel %vm1650_vm0, %v3376_v19, %v3111_v8 }
 0x2c7   : > { %v3275_v13 = vpop.permute.xlu1 %3274 }
 0x2c8   : > { %v3537_v56 = vsel %vm3517_vm1, %v3504_v41, %v3275_v13  ;;  %v3158_v50 = vpop.permute.xlu0 %3157 }
 0x2c9   : > { %v3570_v58 = vsel %vm3550_vm10, %v3537_v56, %v3310_v63  ;;  %v3440_v59 = vsel %vm1716_vm3, %v3408_v20, %v3158_v50 }
 0x2ca   : > { %6314 = vmatmul.mubr.msk.bf16.gmra.mxu1 %vm3616_vm2, %v3570_v58 }
 0x2cb   : > { %v2996_v27 = vpop.permute.xlu1 %2995 }
 0x2cc   : > { %v3193_v7 = vpop.permute.xlu0 %3192  ;;  %v3346_v33 = vsel %vm1518_vm12, %v7938_v57, %v2996_v27 }
 0x2cd   : > { %v3473_v39 = vsel %vm3451_vm13, %v3440_v59, %v3193_v7  ;;  %v3378_v43 = vsel %vm1584_vm14, %v3346_v33, %v3076_v52 }
 0x2cf   : > { %v3113_v38 = vpop.permute.xlu1 %3112 }
 0x2d0   : > { %v3230_v35 = vpop.permute.xlu0 %3229  ;;  %v3410_v34 = vsel %vm1650_vm0, %v3378_v43, %v3113_v38 }
 0x2d1   : > { %v3506_v24 = vsel %vm3484_vm15, %v3473_v39, %v3230_v35  ;;  %v6558_v39 = vmov 1983009808  }
 0x2d3   : > { %v3160_v37 = vpop.permute.xlu1 %3159 }
 0x2d4   : > { %v3277_v26 = vpop.permute.xlu0 %3276  ;;  %v3442_v49 = vsel %vm1716_vm3, %v3410_v34, %v3160_v37 }
 0x2d5   : > { %v3539_v25 = vsel %vm3517_vm1, %v3506_v24, %v3277_v26  ;;  %v3880_v24 = vunpack.c.l.s4 %v6558_v39 }
 0x2d7   : > { %v3195_v21 = vpop.permute.xlu1 %3194 }
 0x2d8   : > { %v3312_v10 = vpop.permute.xlu0 %3311  ;;  %v3475_v44 = vsel %vm3451_vm13, %v3442_v49, %v3195_v21  ;;  %v8329_v49 = vld [vmem:[%s9082_s4] ss:$0 sm:$0xff] }
 0x2d9   : > { %v3572_v14 = vsel %vm3550_vm10, %v3539_v25, %v3312_v10  ;;  %v3882_v25 = vlaneseq }
 0x2da   : > { %6317 = vmatprep.mubr.msk.bf16.mxu1 %vm3616_vm2, %v3572_v14 }
 0x2db   : > { %v3232_v53 = vpop.permute.xlu1 %3231  ;;  %v8323_v34 = vshrl.u32 %v3882_v25, 7 }
 0x2dc   : > { %v3314_v47 = vpop.permute.xlu0 %3313  ;;  %v3508_v46 = vsel %vm3484_vm15, %v3475_v44, %v3232_v53 }
 0x2dd   : > { %9117 = vst [vmem:[#allocation7_spill] sm:$0xff] %v8323_v34 }
 0x2e0   : > { %v3279_v32 = vpop.permute.xlu1 %3278  ;;  %v3078_v36 = vpop.permute.xlu0 %3077 }
 0x2e1   : > { %v3541_v57 = vsel %vm3517_vm1, %v3508_v46, %v3279_v32 }
 0x2e2   : > { %v3574_v48 = vsel %vm3550_vm10, %v3541_v57, %v3314_v47  ;;  %v3881_v47 = vunpack.c.0.s8 %v3880_v24 }
 0x2e3   : > { %6318 = vmatmul.mubr.msk.bf16.gmra.mxu1 %vm3616_vm2, %v3574_v48 }
 0x2e4   : > { %v2998_v9 = vpop.permute.xlu1 %2997  ;;  %v3115_v1 = vpop.permute.xlu0 %3114  ;;  %v8333_v32 = vsub.s32 %v3881_v47, %v8323_v34 }
 0x2e5   : > { %v3348_v30 = vsel %vm1518_vm12, %v7964_v12, %v2998_v9 }
 0x2e6   : > { %v3380_v23 = vsel %vm1584_vm14, %v3348_v30, %v3078_v36 }
 0x2e7   : > { %v3412_v2 = vsel %vm1650_vm0, %v3380_v23, %v3115_v1 }
 0x2e8   : > { %v3000_v17 = vpop.permute.xlu1 %2999  ;;  %v3162_v16 = vpop.permute.xlu0 %3161 }
 0x2e9   : > { %v3444_v28 = vsel %vm1716_vm3, %v3412_v2, %v3162_v16  ;;  %v3350_v63 = vsel %vm1518_vm12, %v8058_v45, %v3000_v17 }
 0x2ec   : > { %v3080_v61 = vpop.permute.xlu1 %3079  ;;  %v3197_v51 = vpop.permute.xlu0 %3196 }
 0x2ed   : > { %v3477_v0 = vsel %vm3451_vm13, %v3444_v28, %v3197_v51  ;;  %v3382_v22 = vsel %vm1584_vm14, %v3350_v63, %v3080_v61 }
 0x2f0   : > { %v3117_v4 = vpop.permute.xlu1 %3116 }
 0x2f1   : > { %v3234_v54 = vpop.permute.xlu0 %3233  ;;  %v3414_v52 = vsel %vm1650_vm0, %v3382_v22, %v3117_v4 }
 0x2f2   : > { %v3510_v18 = vsel %vm3484_vm15, %v3477_v0, %v3234_v54 }
 0x2f4   : > { %v3164_v29 = vpop.permute.xlu1 %3163 }
 0x2f5   : > { %v3281_v60 = vpop.permute.xlu0 %3280  ;;  %v3446_v40 = vsel %vm1716_vm3, %v3414_v52, %v3164_v29 }
 0x2f6   : > { %v3543_v15 = vsel %vm3517_vm1, %v3510_v18, %v3281_v60 }
 0x2f8   : > { %v3199_v55 = vpop.permute.xlu1 %3198 }
 0x2f9   : > { %v3316_v12 = vpop.permute.xlu0 %3315  ;;  %v3479_v8 = vsel %vm3451_vm13, %v3446_v40, %v3199_v55 }
 0x2fa   : > { %v3576_v11 = vsel %vm3550_vm10, %v3543_v15, %v3316_v12 }
 0x2fb   : > { %6321 = vmatprep.mubr.msk.bf16.mxu1 %vm3616_vm2, %v3576_v11 }
 0x2fc   : > { %v3236_v3 = vpop.permute.xlu1 %3235 }
 0x2fd   : > { %v3318_v31 = vpop.permute.xlu0 %3317  ;;  %v3512_v41 = vsel %vm3484_vm15, %v3479_v8, %v3236_v3 }
 0x300   : > { %v3283_v13 = vpop.permute.xlu1 %3282 }
 0x301   : > { %v3082_v56 = vpop.permute.xlu0 %3081  ;;  %v3545_v58 = vsel %vm3517_vm1, %v3512_v41, %v3283_v13 }
 0x302   : > { %v3578_v50 = vsel %vm3550_vm10, %v3545_v58, %v3318_v31 }
 0x303   : > { %6322 = vmatmul.mubr.msk.bf16.gmra.mxu1 %vm3616_vm2, %v3578_v50 }
 0x304   : > { %v3002_v45 = vpop.permute.xlu1 %3001 }
 0x305   : > { %v3119_v27 = vpop.permute.xlu0 %3118  ;;  %v3352_v35 = vsel %vm1518_vm12, %v8097_v42, %v3002_v45 }
 0x306   : > { %v3384_v6 = vsel %vm1584_vm14, %v3352_v35, %v3082_v56 }
 0x307   : > { %v3416_v20 = vsel %vm1650_vm0, %v3384_v6, %v3119_v27 }
 0x308   : > { %v3004_v7 = vpop.permute.xlu1 %3003 }
 0x309   : > { %v3166_v38 = vpop.permute.xlu0 %3165  ;;  %v3354_v57 = vsel %vm1518_vm12, %v8160_v5, %v3004_v7 }
 0x30a   : > { %v3448_v21 = vsel %vm1716_vm3, %v3416_v20, %v3166_v38 }
 0x30c   : > { %v3084_v62 = vpop.permute.xlu1 %3083 }
 0x30d   : > { %v3201_v37 = vpop.permute.xlu0 %3200  ;;  %v3386_v17 = vsel %vm1584_vm14, %v3354_v57, %v3084_v62 }
 0x30e   : > { %v3481_v10 = vsel %vm3451_vm13, %v3448_v21, %v3201_v37 }
 0x310   : > { %v3121_v26 = vpop.permute.xlu1 %3120 }
 0x311   : > { %v3238_v19 = vpop.permute.xlu0 %3237  ;;  %v3418_v16 = vsel %vm1650_vm0, %v3386_v17, %v3121_v26 }
 0x312   : > { %v3514_v33 = vsel %vm3484_vm15, %v3481_v10, %v3238_v19 }
 0x314   : > { %v3168_v53 = vpop.permute.xlu1 %3167 }
 0x315   : > { %v3285_v59 = vpop.permute.xlu0 %3284  ;;  %v3450_v4 = vsel %vm1716_vm3, %v3418_v16, %v3168_v53 }
 0x316   : > { %v3547_v42 = vsel %vm3517_vm1, %v3514_v33, %v3285_v59 }
 0x318   : > { %v3203_v48 = vpop.permute.xlu1 %3202 }
 0x319   : > { %v3320_v14 = vpop.permute.xlu0 %3319  ;;  %v3483_v60 = vsel %vm3451_vm13, %v3450_v4, %v3203_v48 }
 0x31a   : > { %v3580_v43 = vsel %vm3550_vm10, %v3547_v42, %v3320_v14 }
 0x31b   : > { %6325 = vmatprep.mubr.msk.bf16.mxu1 %vm3616_vm2, %v3580_v43 }
 0x31c   : > { %v3240_v15 = vpop.permute.xlu1 %3239 }
 0x31d   : > { %v3516_v16 = vsel %vm3484_vm15, %v3483_v60, %v3240_v15 }
 0x31f   : > { %v6299_v44 = vpop.f32.mrf.mxu1 }
 0x320   : > { %v3696_v46 = vadd.f32 %v6299_v44, %v8329_v49  ;;  %v3287_v20 = vpop.permute.xlu1 %3286 }
 0x321   : > { %v3687_v36 = vpop.f32.mrf.mxu1 }
 0x322   : > { %v3816_v9 = vmax.f32 %v3696_v46, 0.0  ;;  %v3688_v1 = vadd.f32 %v8329_v49, %v3687_v36 }
 0x323   : > { %v6300_v23 = vpop.f32.mrf.mxu1 }
 0x324   : > { %v3912_v30 = vcombine.high %v3816_v9, %v3816_v9  ;;  %v3919_v61 = vrot.slane %v3816_v9, %v8333_v32  ;;  %v3814_v51 = vmax.f32 %v3688_v1, 0.0  ;;  %v3699_v18 = vadd.f32 %v6300_v23, %v8329_v49 }
 0x325   : > { %v3690_v17 = vpop.f32.mrf.mxu1 }
 0x326   : > { %v3926_v54 = vrot.slane %v3912_v30, %v8333_v32  ;;  %v3927_v2 = vcombine.high %v3919_v61, %v3919_v61  ;;  %v4607_v5 = vsel %vm4550_vm6, %v3919_v61, -inf  ;;  %v3878_v29 = vcombine.high %v3814_v51, %v3814_v51 }
 0x327   : > { %v4608_v28 = vrot.slane %v4607_v5, 4  ;;  %v3885_v0 = vrot.slane %v3814_v51, %v8333_v32  ;;  %v3817_v36 = vmax.f32 %v3699_v18, 0.0  ;;  %v3691_v18 = vadd.f32 %v8329_v49, %v3690_v17 }
 0x328   : > { %v3928_v55 = vcombine.high %v3926_v54, %v3926_v54  ;;  %v4614_v12 = vsel %vm4550_vm6, %v3927_v2, -inf  ;;  %v4621_v11 = vsel %vm4550_vm6, %v3926_v54, -inf  ;;  %v3892_v63 = vrot.slane %v3878_v29, %v8333_v32 }
 0x329   : > { %v4609_v22 = vmax.f32 %v4607_v5, %v4608_v28  ;;  %v4615_v3 = vrot.slane %v4614_v12, 4  ;;  %v4622_v31 = vrot.slane %v4621_v11, 4  ;;  %v3893_v52 = vcombine.high %v3885_v0, %v3885_v0  ;;  %v3322_v5 = vpop.permute.xlu1 %3321 }
 0x32a   : > { %v4628_v40 = vsel %vm4550_vm6, %v3928_v55, -inf  ;;  %v3894_v8 = vcombine.high %v3892_v63, %v3892_v63  ;;  %v4551_v41 = vsel %vm4550_vm6, %v3885_v0, -inf  ;;  %v4565_v13 = vsel %vm4550_vm6, %v3892_v63, -inf }
 0x32b   : > { %v4610_v56 = vrot.slane %v4609_v22, 2  ;;  %v4616_v58 = vmax.f32 %v4614_v12, %v4615_v3  ;;  %v4623_v50 = vmax.f32 %v4621_v11, %v4622_v31  ;;  %v4629_v45 = vrot.slane %v4628_v40, 4 }
 0x32c   : > { %v4552_v27 = vrot.slane %v4551_v41, 4  ;;  %v4558_v7 = vsel %vm4550_vm6, %v3893_v52, -inf  ;;  %v4566_v38 = vrot.slane %v4565_v13, 4  ;;  %v4572_v35 = vsel %vm4550_vm6, %v3894_v8, -inf }
 0x32d   : > { %v4611_v37 = vmax.f32 %v4609_v22, %v4610_v56  ;;  %v4617_v62 = vrot.slane %v4616_v58, 2  ;;  %v4624_v6 = vrot.slane %v4623_v50, 2  ;;  %v4630_v19 = vmax.f32 %v4628_v40, %v4629_v45 }
 0x32e   : > { %v4553_v26 = vmax.f32 %v4551_v41, %v4552_v27  ;;  %v4559_v59 = vrot.slane %v4558_v7, 4  ;;  %v4567_v21 = vmax.f32 %v4565_v13, %v4566_v38  ;;  %v4573_v39 = vrot.slane %v4572_v35, 4 }
 0x32f   : > { %v4612_v24 = vrot.slane %v4611_v37, 1  ;;  %v4618_v25 = vmax.f32 %v4616_v58, %v4617_v62  ;;  %v4625_v10 = vmax.f32 %v4623_v50, %v4624_v6  ;;  %v4631_v33 = vrot.slane %v4630_v19, 2 }
 0x330   : > { %v4554_v42 = vrot.slane %v4553_v26, 2  ;;  %v4560_v14 = vmax.f32 %v4558_v7, %v4559_v59  ;;  %v4568_v53 = vrot.slane %v4567_v21, 2  ;;  %v4574_v43 = vmax.f32 %v4572_v35, %v4573_v39 }
 0x331   : > { %v4619_v47 = vrot.slane %v4618_v25, 1  ;;  %v4626_v44 = vrot.slane %v4625_v10, 1  ;;  %v4632_v46 = vmax.f32 %v4630_v19, %v4631_v33  ;;  %v4613_v30 = vmax.f32 %v4611_v37, %v4612_v24 }
 0x332   : > { %v4555_v57 = vmax.f32 %v4553_v26, %v4554_v42  ;;  %v4561_v48 = vrot.slane %v4560_v14, 2  ;;  %v4569_v9 = vmax.f32 %v4567_v21, %v4568_v53  ;;  %v4575_v1 = vrot.slane %v4574_v43, 2 }
 0x333   : > { %v4620_v61 = vmax.f32 %v4618_v25, %v4619_v47  ;;  %v4633_v51 = vrot.slane %v4632_v46, 1  ;;  %v4627_v29 = vmax.f32 %v4625_v10, %v4626_v44  ;;  %v3549_v28 = vsel %vm3517_vm1, %v3516_v16, %v3287_v20 }
 0x334   : > { %v4556_v23 = vrot.slane %v4555_v57, 1  ;;  %v4562_v4 = vmax.f32 %v4560_v14, %v4561_v48  ;;  %v4570_v54 = vrot.slane %v4569_v9, 1  ;;  %v4576_v2 = vmax.f32 %v4574_v43, %v4575_v1 }
 0x335   : > { %v3929_v0 = vcombine.high %v3817_v36, %v3817_v36  ;;  %v5448_v60 = vsel %vm1518_vm12, %v4613_v30, -inf  ;;  %v3936_v15 = vrot.slane %v3817_v36, %v8333_v32  ;;  %v3582_v3 = vsel %vm3550_vm10, %v3549_v28, %v3322_v5 }
 0x336   : > { %v4557_v55 = vmax.f32 %v4555_v57, %v4556_v23  ;;  %v4563_v12 = vrot.slane %v4562_v4, 1  ;;  %v4571_v11 = vmax.f32 %v4569_v9, %v4570_v54  ;;  %v4577_v63 = vrot.slane %v4576_v2, 1  ;;  %6326 = vmatmul.mubr.msk.bf16.gmra.mxu1 %vm3616_vm2, %v3582_v3 }
 0x337   : > { %v3943_v22 = vrot.slane %v3929_v0, %v8333_v32  ;;  %v4634_v31 = vmax.f32 %v4632_v46, %v4633_v51  ;;  %v5451_v52 = vsel %vm1518_vm12, %v4620_v61, -inf  ;;  %v5454_v41 = vsel %vm1518_vm12, %v4627_v29, -inf }
 0x338   : > { %v4564_v40 = vmax.f32 %v4562_v4, %v4563_v12  ;;  %v4578_v8 = vmax.f32 %v4576_v2, %v4577_v63  ;;  %v5447_v13 = vsel %vm1518_vm12, %v4557_v55, -inf  ;;  %v3944_v56 = vcombine.high %v3936_v15, %v3936_v15 }
 0x339   : > { %v3945_v58 = vcombine.high %v3943_v22, %v3943_v22  ;;  %v5453_v45 = vsel %vm1518_vm12, %v4571_v11, -inf  ;;  %v4635_v27 = vsel %vm4550_vm6, %v3936_v15, -inf  ;;  %v4649_v7 = vsel %vm4550_vm6, %v3943_v22, -inf }
 0x33a   : > { %v5450_v50 = vsel %vm1518_vm12, %v4564_v40, -inf  ;;  %v5456_v35 = vsel %vm1518_vm12, %v4578_v8, -inf  ;;  %v4636_v37 = vrot.slane %v4635_v27, 4  ;;  %v4642_v62 = vsel %vm4550_vm6, %v3944_v56, -inf }
 0x33b   : > { %v5452_v38 = vmax.f32 %v5450_v50, %v5451_v52  ;;  %v4643_v6 = vrot.slane %v4642_v62, 4  ;;  %v4650_v19 = vrot.slane %v4649_v7, 4  ;;  %v4656_v20 = vsel %vm4550_vm6, %v3945_v58, -inf }
 0x33c   : > { %v3815_v26 = vmax.f32 %v3691_v18, 0.0  ;;  %vm5707_vm2 = vcmask 1043459   ;;  %v5457_v59 = vsel %vm1518_vm12, %v4634_v31, -inf  ;;  %v5449_v21 = vmax.f32 %v5447_v13, %v5448_v60 }
 0x33d   : > { %v4637_v39 = vmax.f32 %v4635_v27, %v4636_v37  ;;  %v4657_v24 = vrot.slane %v4656_v20, 4  ;;  %v5455_v25 = vmax.f32 %v5453_v45, %v5454_v41  ;;  %v4644_v10 = vmax.f32 %v4642_v62, %v4643_v6 }
 0x33e   : > { %v4651_v33 = vmax.f32 %v4649_v7, %v4650_v19  ;;  %v3895_v42 = vcombine.high %v3815_v26, %v3815_v26  ;;  %v5458_v14 = vmax.f32 %v5456_v35, %v5457_v59  ;;  %v3902_v47 = vrot.slane %v3815_v26, %v8333_v32  ;;  %v6303_v16 = vpop.f32.mrf.mxu1 }
 0x33f   : > { %v4638_v53 = vrot.slane %v4637_v39, 2  ;;  %v4658_v43 = vmax.f32 %v4656_v20, %v4657_v24  ;;  %v5704_v44 = vsel %vm5703_vm11, %v5452_v38, %v5449_v21  ;;  %v4645_v46 = vrot.slane %v4644_v10, 2 }
 0x340   : > { %v4652_v36 = vrot.slane %v4651_v33, 2  ;;  %v3909_v57 = vrot.slane %v3895_v42, %v8333_v32  ;;  %v3910_v1 = vcombine.high %v3902_v47, %v3902_v47  ;;  %v4579_v17 = vsel %vm4550_vm6, %v3902_v47, -inf  ;;  %v3703_v60 = vpop.f32.mrf.mxu1 }
 0x341   : > { %v4639_v48 = vmax.f32 %v4637_v39, %v4638_v53  ;;  %v4659_v9 = vrot.slane %v4658_v43, 2  ;;  %v4646_v30 = vmax.f32 %v4644_v10, %v4645_v46  ;;  %v4580_v23 = vrot.slane %v4579_v17, 4 }
 0x342   : > { %v4653_v61 = vmax.f32 %v4651_v33, %v4652_v36  ;;  %v3911_v51 = vcombine.high %v3909_v57, %v3909_v57  ;;  %v5706_v4 = vsel %vm5705_vm8, %v5455_v25, %v5704_v44  ;;  %v4586_v2 = vsel %vm4550_vm6, %v3910_v1, -inf  ;;  %v6304_v7 = vpop.f32.mrf.mxu1 }
 0x343   : > { %v4660_v54 = vmax.f32 %v4658_v43, %v4659_v9  ;;  %v4593_v5 = vsel %vm4550_vm6, %v3909_v57, -inf  ;;  %v4640_v29 = vrot.slane %v4639_v48, 1  ;;  %v4647_v28 = vrot.slane %v4646_v30, 1 }
 0x344   : > { %v4581_v0 = vmax.f32 %v4579_v17, %v4580_v23  ;;  %v4587_v18 = vrot.slane %v4586_v2, 4  ;;  %v4654_v55 = vrot.slane %v4653_v61, 1  ;;  %v4594_v12 = vrot.slane %v4593_v5, 4 }
 0x345   : > { %v4600_v11 = vsel %vm4550_vm6, %v3911_v51, -inf  ;;  %v3712_v63 = vadd.f32 %v6303_v16, %v8329_v49  ;;  %v4661_v15 = vrot.slane %v4660_v54, 1  ;;  %v8384_v40 = vsel %vm5707_vm2, %v5458_v14, %v5706_v4 }
 0x346   : > { %v4582_v22 = vrot.slane %v4581_v0, 2  ;;  %v4588_v3 = vmax.f32 %v4586_v2, %v4587_v18  ;;  %v4595_v31 = vmax.f32 %v4593_v5, %v4594_v12  ;;  %v4601_v52 = vrot.slane %v4600_v11, 4 }
 0x347   : > { %v4641_v8 = vmax.f32 %v4639_v48, %v4640_v29  ;;  %v4648_v41 = vmax.f32 %v4646_v30, %v4647_v28  ;;  %v4655_v58 = vmax.f32 %v4653_v61, %v4654_v55  ;;  %v3820_v27 = vmax.f32 %v3712_v63, 0.0 }
 0x348   : > { %v4583_v13 = vmax.f32 %v4581_v0, %v4582_v22  ;;  %v4589_v56 = vrot.slane %v4588_v3, 2  ;;  %v4596_v50 = vrot.slane %v4595_v31, 2  ;;  %v4602_v45 = vmax.f32 %v4600_v11, %v4601_v52 }
 0x349   : > { %v4662_v38 = vmax.f32 %v4660_v54, %v4661_v15  ;;  %v3704_v62 = vadd.f32 %v8329_v49, %v3703_v60  ;;  %v3980_v20 = vcombine.high %v3820_v27, %v3820_v27  ;;  %v3987_v26 = vrot.slane %v3820_v27, %v8333_v32 }
 0x34a   : > { %v4584_v35 = vrot.slane %v4583_v13, 1  ;;  %v4590_v37 = vmax.f32 %v4588_v3, %v4589_v56  ;;  %v4597_v6 = vmax.f32 %v4595_v31, %v4596_v50  ;;  %v4603_v19 = vrot.slane %v4602_v45, 2 }
 0x34b   : > { %v3818_v39 = vmax.f32 %v3704_v62, 0.0  ;;  %v3715_v24 = vadd.f32 %v6304_v7, %v8329_v49  ;;  %v3994_v33 = vrot.slane %v3980_v20, %v8333_v32  ;;  %v3995_v42 = vcombine.high %v3987_v26, %v3987_v26 }
 0x34c   : > { %v4585_v59 = vmax.f32 %v4583_v13, %v4584_v35  ;;  %v4591_v21 = vrot.slane %v4590_v37, 1  ;;  %v4598_v25 = vrot.slane %v4597_v6, 1  ;;  %v4604_v10 = vmax.f32 %v4602_v45, %v4603_v19 }
 0x34d   : > { %v5460_v14 = vsel %vm1518_vm12, %v4641_v8, -inf  ;;  %v8392_v53 = vsel %vm1518_vm12, %v4648_v41, -inf  ;;  %v4719_v47 = vsel %vm4550_vm6, %v3987_v26, -inf  ;;  %v3996_v57 = vcombine.high %v3994_v33, %v3994_v33 }
 0x34e   : > { %v4592_v43 = vmax.f32 %v4590_v37, %v4591_v21  ;;  %v4599_v44 = vmax.f32 %v4597_v6, %v4598_v25  ;;  %v4605_v46 = vrot.slane %v4604_v10, 1  ;;  %v5459_v36 = vsel %vm1518_vm12, %v4585_v59, -inf }
 0x34f   : > { %v4720_v9 = vrot.slane %v4719_v47, 4  ;;  %v4726_v1 = vsel %vm4550_vm6, %v3995_v42, -inf  ;;  %v4733_v17 = vsel %vm4550_vm6, %v3994_v33, -inf  ;;  %v8402_v16 = vsel %vm1518_vm12, %v4655_v58, -inf }
 0x350   : > { %v8397_v48 = vsel %vm1518_vm12, %v4592_v43, -inf  ;;  %v8405_v30 = vsel %vm1518_vm12, %v4662_v38, -inf  ;;  %v3946_v61 = vcombine.high %v3818_v39, %v3818_v39  ;;  %v3821_v51 = vmax.f32 %v3715_v24, 0.0 }
 0x351   : > { %v5461_v23 = vmax.f32 %v5459_v36, %v5460_v14  ;;  %v4721_v4 = vmax.f32 %v4719_v47, %v4720_v9  ;;  %v4727_v54 = vrot.slane %v4726_v1, 4  ;;  %v4734_v2 = vrot.slane %v4733_v17, 4 }
 0x352   : > { %v4606_v5 = vmax.f32 %v4604_v10, %v4605_v46  ;;  %v5464_v29 = vmax.f32 %v8397_v48, %v8392_v53  ;;  %v4740_v28 = vsel %vm4550_vm6, %v3996_v57, -inf  ;;  %v3953_v0 = vrot.slane %v3818_v39, %v8333_v32 }
 0x353   : > { %v8412_v18 = vsel %vm1518_vm12, %v4599_v44, -inf  ;;  %v4722_v55 = vrot.slane %v4721_v4, 2  ;;  %v4728_v12 = vmax.f32 %v4726_v1, %v4727_v54  ;;  %v4735_v11 = vmax.f32 %v4733_v17, %v4734_v2  ;;  %v3706_v54 = vpop.f32.mrf.mxu1 }
 0x354   : > { %v4741_v63 = vrot.slane %v4740_v28, 4  ;;  %v3960_v60 = vrot.slane %v3946_v61, %v8333_v32  ;;  %v3961_v15 = vcombine.high %v3953_v0, %v3953_v0  ;;  %v4663_v22 = vsel %vm4550_vm6, %v3953_v0, -inf }
 0x355   : > { %v4723_v3 = vmax.f32 %v4721_v4, %v4722_v55  ;;  %v4729_v31 = vrot.slane %v4728_v12, 2  ;;  %v4736_v52 = vrot.slane %v4735_v11, 2  ;;  %v4664_v8 = vrot.slane %v4663_v22, 4 }
 0x356   : > { %v4742_v41 = vmax.f32 %v4740_v28, %v4741_v63  ;;  %v3962_v13 = vcombine.high %v3960_v60, %v3960_v60  ;;  %v4670_v56 = vsel %vm4550_vm6, %v3961_v15, -inf  ;;  %v4677_v58 = vsel %vm4550_vm6, %v3960_v60, -inf }
 0x357   : > { %v4724_v50 = vrot.slane %v4723_v3, 1  ;;  %v4730_v45 = vmax.f32 %v4728_v12, %v4729_v31  ;;  %v4737_v27 = vmax.f32 %v4735_v11, %v4736_v52  ;;  %v4665_v7 = vmax.f32 %v4663_v22, %v4664_v8 }
 0x358   : > { %v4743_v38 = vrot.slane %v4742_v41, 2  ;;  %v4671_v35 = vrot.slane %v4670_v56, 4  ;;  %v4678_v37 = vrot.slane %v4677_v58, 4  ;;  %v4684_v62 = vsel %vm4550_vm6, %v3962_v13, -inf }
 0x359   : > { %v4725_v6 = vmax.f32 %v4723_v3, %v4724_v50  ;;  %v4731_v19 = vrot.slane %v4730_v45, 1  ;;  %v4738_v20 = vrot.slane %v4737_v27, 1  ;;  %v4666_v26 = vrot.slane %v4665_v7, 2 }
 0x35a   : > { %v4744_v59 = vmax.f32 %v4742_v41, %v4743_v38  ;;  %v4672_v21 = vmax.f32 %v4670_v56, %v4671_v35  ;;  %v4679_v39 = vmax.f32 %v4677_v58, %v4678_v37  ;;  %v4685_v24 = vrot.slane %v4684_v62, 4 }
 0x35b   : > { %v8423_v10 = vsel %vm5709_vm5, %v5461_v23, %v8384_v40  ;;  %v4732_v33 = vmax.f32 %v4730_v45, %v4731_v19  ;;  %v4667_v42 = vmax.f32 %v4665_v7, %v4666_v26  ;;  %v4739_v14 = vmax.f32 %v4737_v27, %v4738_v20 }
 0x35c   : > { %v4673_v43 = vrot.slane %v4672_v21, 2  ;;  %v4680_v47 = vrot.slane %v4679_v39, 2  ;;  %v4686_v44 = vmax.f32 %v4684_v62, %v4685_v24  ;;  %v8426_v46 = vsel %vm1518_vm12, %v4606_v5, -inf }
 0x35d   : > { %v5472_v36 = vsel %vm1518_vm12, %v4725_v6, -inf  ;;  %v4668_v57 = vrot.slane %v4667_v42, 1  ;;  %v3997_v9 = vcombine.high %v3821_v51, %v3821_v51  ;;  %v4745_v1 = vrot.slane %v4744_v59, 1 }
 0x35e   : > { %v4674_v17 = vmax.f32 %v4672_v21, %v4673_v43  ;;  %v4681_v61 = vmax.f32 %v4679_v39, %v4680_v47  ;;  %v4687_v4 = vrot.slane %v4686_v44, 2  ;;  %v5475_v40 = vsel %vm1518_vm12, %v4732_v33, -inf }
 0x35f   : > { %v4669_v23 = vmax.f32 %v4667_v42, %v4668_v57  ;;  %v4004_v2 = vrot.slane %v3821_v51, %v8333_v32  ;;  %v4011_v28 = vrot.slane %v3997_v9, %v8333_v32  ;;  %v5478_v0 = vsel %vm1518_vm12, %v4739_v14, -inf }
 0x360   : > { %v4675_v5 = vrot.slane %v4674_v17, 1  ;;  %v4682_v55 = vrot.slane %v4681_v61, 1  ;;  %v4688_v12 = vmax.f32 %v4686_v44, %v4687_v4  ;;  %v3707_v15 = vadd.f32 %v8329_v49, %v3706_v54 }
 0x361   : > { %v4012_v11 = vcombine.high %v4004_v2, %v4004_v2  ;;  %v4013_v63 = vcombine.high %v4011_v28, %v4011_v28  ;;  %v4747_v60 = vsel %vm4550_vm6, %v4004_v2, -inf  ;;  %v5471_v52 = vsel %vm1518_vm12, %v4669_v23, -inf }
 0x362   : > { %v4676_v22 = vmax.f32 %v4674_v17, %v4675_v5  ;;  %v4683_v3 = vmax.f32 %v4681_v61, %v4682_v55  ;;  %v4689_v31 = vrot.slane %v4688_v12, 1  ;;  %v4748_v51 = vrot.slane %v4747_v60, 4  ;;  %v6307_v17 = vpop.f32.mrf.mxu1 }
 0x363   : > { %v4754_v8 = vsel %vm4550_vm6, %v4012_v11, -inf  ;;  %v4761_v41 = vsel %vm4550_vm6, %v4011_v28, -inf  ;;  %v4768_v13 = vsel %vm4550_vm6, %v4013_v63, -inf  ;;  %v4746_v27 = vmax.f32 %v4744_v59, %v4745_v1 }
 0x364   : > { %v4690_v56 = vmax.f32 %v4688_v12, %v4689_v31  ;;  %v5474_v58 = vsel %vm1518_vm12, %v4676_v22, -inf  ;;  %v5477_v50 = vsel %vm1518_vm12, %v4683_v3, -inf  ;;  %v4755_v45 = vrot.slane %v4754_v8, 4 }
 0x365   : > { %v5476_v7 = vmax.f32 %v5474_v58, %v5475_v40  ;;  %v4749_v38 = vmax.f32 %v4747_v60, %v4748_v51  ;;  %v4762_v35 = vrot.slane %v4761_v41, 4  ;;  %v5473_v37 = vmax.f32 %v5471_v52, %v5472_v36 }
 0x366   : > { %v4756_v62 = vmax.f32 %v4754_v8, %v4755_v45  ;;  %v4769_v6 = vrot.slane %v4768_v13, 4  ;;  %v3819_v19 = vmax.f32 %v3707_v15, 0.0  ;;  %v5479_v20 = vmax.f32 %v5477_v50, %v5478_v0  ;;  %v3719_v8 = vpop.f32.mrf.mxu1 }
 0x367   : > { %v5480_v26 = vsel %vm1518_vm12, %v4690_v56, -inf  ;;  %v4750_v21 = vrot.slane %v4749_v38, 2  ;;  %v4763_v39 = vmax.f32 %v4761_v41, %v4762_v35  ;;  %v5717_v24 = vsel %vm5703_vm11, %v5476_v7, %v5473_v37 }
 0x368   : > { %v4757_v33 = vrot.slane %v4756_v62, 2  ;;  %v4770_v42 = vmax.f32 %v4768_v13, %v4769_v6  ;;  %v3963_v14 = vcombine.high %v3819_v19, %v3819_v19  ;;  %v5481_v43 = vsel %vm1518_vm12, %v4746_v27, -inf }
 0x369   : > { %v4751_v59 = vmax.f32 %v4749_v38, %v4750_v21  ;;  %v4764_v47 = vrot.slane %v4763_v39, 2  ;;  %v3970_v44 = vrot.slane %v3819_v19, %v8333_v32  ;;  %v5482_v36 = vmax.f32 %v5480_v26, %v5481_v43 }
 0x36a   : > { %v4758_v57 = vmax.f32 %v4756_v62, %v4757_v33  ;;  %v4771_v9 = vrot.slane %v4770_v42, 2  ;;  %v3977_v1 = vrot.slane %v3963_v14, %v8333_v32  ;;  %v5718_v61 = vsel %vm5705_vm8, %v5479_v20, %v5717_v24 }
 0x36b   : > { %v4765_v4 = vmax.f32 %v4763_v39, %v4764_v47  ;;  %v3978_v54 = vcombine.high %v3970_v44, %v3970_v44  ;;  %v4691_v40 = vsel %vm4550_vm6, %v3970_v44, -inf  ;;  %v4752_v23 = vrot.slane %v4751_v59, 1 }
 0x36c   : > { %v4772_v2 = vmax.f32 %v4770_v42, %v4771_v9  ;;  %v3979_v28 = vcombine.high %v3977_v1, %v3977_v1  ;;  %v4692_v0 = vrot.slane %v4691_v40, 4  ;;  %v4759_v5 = vrot.slane %v4758_v57, 1 }
 0x36d   : > { %v4698_v55 = vsel %vm4550_vm6, %v3978_v54, -inf  ;;  %v4705_v12 = vsel %vm4550_vm6, %v3977_v1, -inf  ;;  %v3728_v11 = vadd.f32 %v6307_v17, %v8329_v49  ;;  %v8456_v63 = vsel %vm5711_vm7, %v5464_v29, %v8423_v10 }
 0x36e   : > { %v4766_v60 = vrot.slane %v4765_v4, 1  ;;  %v4693_v15 = vmax.f32 %v4691_v40, %v4692_v0  ;;  %v4699_v22 = vrot.slane %v4698_v55, 4  ;;  %v4706_v31 = vrot.slane %v4705_v12, 4 }
 0x36f   : > { %v4712_v52 = vsel %vm4550_vm6, %v3979_v28, -inf  ;;  %v8462_v51 = vsel %vm5707_vm2, %v5482_v36, %v5718_v61  ;;  %v4753_v41 = vmax.f32 %v4751_v59, %v4752_v23  ;;  %v4773_v13 = vrot.slane %v4772_v2, 1 }
 0x370   : > { %v4694_v56 = vrot.slane %v4693_v15, 2  ;;  %v4700_v53 = vmax.f32 %v4698_v55, %v4699_v22  ;;  %v4760_v48 = vmax.f32 %v4758_v57, %v4759_v5  ;;  %v4707_v29 = vmax.f32 %v4705_v12, %v4706_v31 }
 0x371   : > { %v4713_v10 = vrot.slane %v4712_v52, 4  ;;  %v3824_v58 = vmax.f32 %v3728_v11, 0.0  ;;  %v4767_v50 = vmax.f32 %v4765_v4, %v4766_v60  ;;  %v3720_v7 = vadd.f32 %v8329_v49, %v3719_v8  ;;  %v6308_v4 = vpop.f32.mrf.mxu1 }
 0x372   : > { %v4695_v45 = vmax.f32 %v4693_v15, %v4694_v56  ;;  %v4701_v27 = vrot.slane %v4700_v53, 2  ;;  %v4708_v38 = vrot.slane %v4707_v29, 2  ;;  %v4774_v6 = vmax.f32 %v4772_v2, %v4773_v13 }
 0x373   : > { %v4714_v35 = vmax.f32 %v4712_v52, %v4713_v10  ;;  %v4048_v37 = vcombine.high %v3824_v58, %v3824_v58  ;;  %v4055_v62 = vrot.slane %v3824_v58, %v8333_v32  ;;  %v8467_v19 = vsel %vm1518_vm12, %v4753_v41, -inf }
 0x374   : > { %v4696_v20 = vrot.slane %v4695_v45, 1  ;;  %v4702_v26 = vmax.f32 %v4700_v53, %v4701_v27  ;;  %v4709_v21 = vmax.f32 %v4707_v29, %v4708_v38  ;;  %v3822_v59 = vmax.f32 %v3720_v7, 0.0 }
 0x375   : > { %v4715_v39 = vrot.slane %v4714_v35, 2  ;;  %v4062_v24 = vrot.slane %v4048_v37, %v8333_v32  ;;  %v4063_v33 = vcombine.high %v4055_v62, %v4055_v62  ;;  %v4831_v43 = vsel %vm4550_vm6, %v4055_v62, -inf }
 0x376   : > { %v4697_v42 = vmax.f32 %v4695_v45, %v4696_v20  ;;  %v4703_v14 = vrot.slane %v4702_v26, 1  ;;  %v4710_v47 = vrot.slane %v4709_v21, 1  ;;  %v4832_v57 = vrot.slane %v4831_v43, 4 }
 0x377   : > { %v4716_v44 = vmax.f32 %v4714_v35, %v4715_v39  ;;  %v4064_v36 = vcombine.high %v4062_v24, %v4062_v24  ;;  %v8472_v9 = vsel %vm1518_vm12, %v4760_v48, -inf  ;;  %v4838_v17 = vsel %vm4550_vm6, %v4063_v33, -inf }
 0x378   : > { %v4704_v1 = vmax.f32 %v4702_v26, %v4703_v14  ;;  %v4845_v61 = vsel %vm4550_vm6, %v4062_v24, -inf  ;;  %v4711_v54 = vmax.f32 %v4709_v21, %v4710_v47  ;;  %v5483_v23 = vsel %vm1518_vm12, %v4697_v42, -inf }
 0x379   : > { %v4717_v40 = vrot.slane %v4716_v44, 1  ;;  %v4833_v2 = vmax.f32 %v4831_v43, %v4832_v57  ;;  %v4839_v0 = vrot.slane %v4838_v17, 4  ;;  %v4846_v5 = vrot.slane %v4845_v61, 4 }
 0x37a   : > { %v8478_v28 = vsel %vm1518_vm12, %v4704_v1, -inf  ;;  %v4852_v55 = vsel %vm4550_vm6, %v4064_v36, -inf  ;;  %v8482_v12 = vsel %vm1518_vm12, %v4767_v50, -inf  ;;  %v8485_v11 = vsel %vm1518_vm12, %v4774_v6, -inf }
 0x37b   : > { %v4014_v60 = vcombine.high %v3822_v59, %v3822_v59  ;;  %v3731_v15 = vadd.f32 %v6308_v4, %v8329_v49  ;;  %v5485_v22 = vmax.f32 %v5483_v23, %v8467_v19  ;;  %v4834_v31 = vrot.slane %v4833_v2, 2 }
 0x37c   : > { %v4840_v52 = vmax.f32 %v4838_v17, %v4839_v0  ;;  %v4847_v8 = vmax.f32 %v4845_v61, %v4846_v5  ;;  %v4718_v41 = vmax.f32 %v4716_v44, %v4717_v40  ;;  %v5488_v13 = vmax.f32 %v8478_v28, %v8472_v9 }
 0x37d   : > { %v4853_v56 = vrot.slane %v4852_v55, 4  ;;  %v4021_v53 = vrot.slane %v3822_v59, %v8333_v32  ;;  %v8493_v48 = vsel %vm1518_vm12, %v4711_v54, -inf  ;;  %v4835_v29 = vmax.f32 %v4833_v2, %v4834_v31 }
 0x37e   : > { %v4841_v10 = vrot.slane %v4840_v52, 2  ;;  %v4848_v58 = vrot.slane %v4847_v8, 2  ;;  %v4028_v45 = vrot.slane %v4014_v60, %v8333_v32  ;;  %v8504_v44 = vsel %vm5709_vm5, %v5485_v22, %v8462_v51 }
 0x37f   : > { %v4854_v50 = vmax.f32 %v4852_v55, %v4853_v56  ;;  %v4029_v27 = vcombine.high %v4021_v53, %v4021_v53  ;;  %v4775_v7 = vsel %vm4550_vm6, %v4021_v53, -inf  ;;  %v4836_v38 = vrot.slane %v4835_v29, 1 }
 0x380   : > { %v4842_v35 = vmax.f32 %v4840_v52, %v4841_v10  ;;  %v4849_v37 = vmax.f32 %v4847_v8, %v4848_v58  ;;  %v4776_v62 = vrot.slane %v4775_v7, 4  ;;  %v4030_v19 = vcombine.high %v4028_v45, %v4028_v45 }
 0x381   : > { %v4855_v6 = vrot.slane %v4854_v50, 2  ;;  %v4782_v20 = vsel %vm4550_vm6, %v4029_v27, -inf  ;;  %v4789_v26 = vsel %vm4550_vm6, %v4028_v45, -inf  ;;  %v4837_v21 = vmax.f32 %v4835_v29, %v4836_v38  ;;  %v3722_v29 = vpop.f32.mrf.mxu1 }
 0x382   : > { %v4843_v39 = vrot.slane %v4842_v35, 1  ;;  %v4850_v24 = vrot.slane %v4849_v37, 1  ;;  %v4777_v33 = vmax.f32 %v4775_v7, %v4776_v62  ;;  %v4783_v14 = vrot.slane %v4782_v20, 4 }
 0x383   : > { %v4856_v42 = vmax.f32 %v4854_v50, %v4855_v6  ;;  %v4790_v43 = vrot.slane %v4789_v26, 4  ;;  %v4796_v59 = vsel %vm4550_vm6, %v4030_v19, -inf  ;;  %v8507_v54 = vsel %vm1518_vm12, %v4718_v41, -inf }
 0x384   : > { %v4844_v36 = vmax.f32 %v4842_v35, %v4843_v39  ;;  %v4778_v57 = vrot.slane %v4777_v33, 2  ;;  %v4851_v1 = vmax.f32 %v4849_v37, %v4850_v24  ;;  %v4784_v17 = vmax.f32 %v4782_v20, %v4783_v14 }
 0x385   : > { %v4791_v61 = vmax.f32 %v4789_v26, %v4790_v43  ;;  %v4797_v4 = vrot.slane %v4796_v59, 4  ;;  %v5496_v40 = vsel %vm1518_vm12, %v4837_v21, -inf  ;;  %v3825_v2 = vmax.f32 %v3731_v15, 0.0 }
 0x386   : > { %v4779_v23 = vmax.f32 %v4777_v33, %v4778_v57  ;;  %v4857_v0 = vrot.slane %v4856_v42, 1  ;;  %v4785_v5 = vrot.slane %v4784_v17, 2  ;;  %v5499_v51 = vsel %vm1518_vm12, %v4844_v36, -inf }
 0x387   : > { %v4792_v55 = vrot.slane %v4791_v61, 2  ;;  %v4798_v60 = vmax.f32 %v4796_v59, %v4797_v4  ;;  %v4065_v31 = vcombine.high %v3825_v2, %v3825_v2  ;;  %v4072_v52 = vrot.slane %v3825_v2, %v8333_v32 }
 0x388   : > { %v4780_v22 = vrot.slane %v4779_v23, 1  ;;  %v5502_v8 = vsel %vm1518_vm12, %v4851_v1, -inf  ;;  %v4786_v56 = vmax.f32 %v4784_v17, %v4785_v5  ;;  %v3723_v6 = vadd.f32 %v8329_v49, %v3722_v29 }
 0x389   : > { %v4793_v53 = vmax.f32 %v4791_v61, %v4792_v55  ;;  %v4799_v41 = vrot.slane %v4798_v60, 2  ;;  %v4079_v58 = vrot.slane %v4065_v31, %v8333_v32  ;;  %v4080_v15 = vcombine.high %v4072_v52, %v4072_v52 }
 0x38a   : > { %v4781_v10 = vmax.f32 %v4779_v23, %v4780_v22  ;;  %v4859_v50 = vsel %vm4550_vm6, %v4072_v52, -inf  ;;  %v4787_v45 = vrot.slane %v4786_v56, 1  ;;  %v4858_v1 = vmax.f32 %v4856_v42, %v4857_v0 }
 0x38b   : > { %v4794_v27 = vrot.slane %v4793_v53, 1  ;;  %v4800_v7 = vmax.f32 %v4798_v60, %v4799_v41  ;;  %v4860_v38 = vrot.slane %v4859_v50, 4  ;;  %v4081_v35 = vcombine.high %v4079_v58, %v4079_v58 }
 0x38c   : > { %v4866_v37 = vsel %vm4550_vm6, %v4080_v15, -inf  ;;  %v4873_v62 = vsel %vm4550_vm6, %v4079_v58, -inf  ;;  %v4788_v19 = vmax.f32 %v4786_v56, %v4787_v45  ;;  %v5495_v21 = vsel %vm1518_vm12, %v4781_v10, -inf  ;;  %v6311_v10 = vpop.f32.mrf.mxu1 }
 0x38d   : > { %v4795_v20 = vmax.f32 %v4793_v53, %v4794_v27  ;;  %v4801_v26 = vrot.slane %v4800_v7, 1  ;;  %v4861_v39 = vmax.f32 %v4859_v50, %v4860_v38  ;;  %v4867_v24 = vrot.slane %v4866_v37, 4 }
 0x38e   : > { %v4874_v33 = vrot.slane %v4873_v62, 4  ;;  %v4880_v14 = vsel %vm4550_vm6, %v4081_v35, -inf  ;;  %v5498_v59 = vsel %vm1518_vm12, %v4788_v19, -inf  ;;  %v5497_v23 = vmax.f32 %v5495_v21, %v5496_v40 }
 0x38f   : > { %v4802_v43 = vmax.f32 %v4800_v7, %v4801_v26  ;;  %v5501_v36 = vsel %vm1518_vm12, %v4795_v20, -inf  ;;  %v4881_v57 = vrot.slane %v4880_v14, 4  ;;  %v5500_v17 = vmax.f32 %v5498_v59, %v5499_v51 }
 0x390   : > { %v4862_v61 = vrot.slane %v4861_v39, 2  ;;  %v4868_v4 = vmax.f32 %v4866_v37, %v4867_v24  ;;  %v4875_v2 = vmax.f32 %v4873_v62, %v4874_v33  ;;  %v3823_v55 = vmax.f32 %v3723_v6, 0.0 }
 0x391   : > { %v4882_v5 = vmax.f32 %v4880_v14, %v4881_v57  ;;  %v5503_v60 = vmax.f32 %v5501_v36, %v5502_v8  ;;  %v5504_v22 = vsel %vm1518_vm12, %v4802_v43, -inf  ;;  %v5724_v56 = vsel %vm5703_vm11, %v5500_v17, %v5497_v23 }
 0x392   : > { %v4863_v31 = vmax.f32 %v4861_v39, %v4862_v61  ;;  %v4869_v52 = vrot.slane %v4868_v4, 2  ;;  %v4876_v53 = vrot.slane %v4875_v2, 2  ;;  %v4031_v29 = vcombine.high %v3823_v55, %v3823_v55 }
 0x393   : > { %v4883_v41 = vrot.slane %v4882_v5, 2  ;;  %v5505_v42 = vsel %vm1518_vm12, %v4858_v1, -inf  ;;  %v4038_v40 = vrot.slane %v3823_v55, %v8333_v32  ;;  %v5725_v45 = vsel %vm5705_vm8, %v5503_v60, %v5724_v56 }
 0x394   : > { %v4864_v0 = vrot.slane %v4863_v31, 1  ;;  %v4870_v51 = vmax.f32 %v4868_v4, %v4869_v52  ;;  %v5506_v58 = vmax.f32 %v5504_v22, %v5505_v42  ;;  %v4877_v15 = vmax.f32 %v4875_v2, %v4876_v53  ;;  %v3735_v4 = vpop.f32.mrf.mxu1 }
 0x395   : > { %v4884_v50 = vmax.f32 %v4882_v5, %v4883_v41  ;;  %v4045_v8 = vrot.slane %v4031_v29, %v8333_v32  ;;  %v4046_v27 = vcombine.high %v4038_v40, %v4038_v40  ;;  %v4803_v7 = vsel %vm4550_vm6, %v4038_v40, -inf  ;;  %v8554_v29 = vld [vmem:[%s9082_s4] ss:$0 sm:$0xff] }
 0x396   : > { %v3744_v38 = vadd.f32 %v6311_v10, %v8329_v49  ;;  %v4865_v35 = vmax.f32 %v4863_v31, %v4864_v0  ;;  %v4871_v37 = vrot.slane %v4870_v51, 1  ;;  %v4804_v6 = vrot.slane %v4803_v7, 4 }
 0x397   : > { %v4047_v62 = vcombine.high %v4045_v8, %v4045_v8  ;;  %v8537_v20 = vsel %vm5711_vm7, %v5488_v13, %v8504_v44  ;;  %v4810_v26 = vsel %vm4550_vm6, %v4046_v27, -inf  ;;  %v4817_v21 = vsel %vm4550_vm6, %v4045_v8, -inf }
 0x398   : > { %v4878_v39 = vrot.slane %v4877_v15, 1  ;;  %v4885_v49 = vrot.slane %v4884_v50, 1  ;;  %v4805_v24 = vmax.f32 %v4803_v7, %v4804_v6  ;;  %v4811_v33 = vrot.slane %v4810_v26, 4 }
 0x399   : > { %v4818_v14 = vrot.slane %v4817_v21, 4  ;;  %v4824_v43 = vsel %vm4550_vm6, %v4047_v62, -inf  ;;  %v8543_v59 = vsel %vm5707_vm2, %v5506_v58, %v5725_v45  ;;  %v3828_v36 = vmax.f32 %v3744_v38, 0.0 }
 0x39a   : > { %v4872_v57 = vmax.f32 %v4870_v51, %v4871_v37  ;;  %v8546_v9 = vsel %vm1518_vm12, %v4865_v35, -inf  ;;  %v4806_v28 = vrot.slane %v4805_v24, 2  ;;  %v4812_v13 = vmax.f32 %v4810_v26, %v4811_v33 }
 0x39b   : > { %v4819_v44 = vmax.f32 %v4817_v21, %v4818_v14  ;;  %v4825_v1 = vrot.slane %v4824_v43, 4  ;;  %v4116_v17 = vcombine.high %v3828_v36, %v3828_v36  ;;  %v4123_v61 = vrot.slane %v3828_v36, %v8333_v32 }
 0x39c   : > { %v4879_v23 = vmax.f32 %v4877_v15, %v4878_v39  ;;  %v4886_v2 = vmax.f32 %v4884_v50, %v4885_v49  ;;  %v4807_v5 = vmax.f32 %v4805_v24, %v4806_v28  ;;  %v4813_v55 = vrot.slane %v4812_v13, 2  ;;  %v6312_v24 = vpop.f32.mrf.mxu1 }
 0x39d   : > { %v4820_v60 = vrot.slane %v4819_v44, 2  ;;  %v4826_v22 = vmax.f32 %v4824_v43, %v4825_v1  ;;  %v4130_v31 = vrot.slane %v4116_v17, %v8333_v32  ;;  %v4131_v52 = vcombine.high %v4123_v61, %v4123_v61 }
 0x39e   : > { %v4808_v56 = vrot.slane %v4807_v5, 1  ;;  %v4814_v53 = vmax.f32 %v4812_v13, %v4813_v55  ;;  %v4943_v41 = vsel %vm4550_vm6, %v4123_v61, -inf  ;;  %v3736_v10 = vadd.f32 %v8554_v29, %v3735_v4 }
 0x39f   : > { %v4821_v42 = vmax.f32 %v4819_v44, %v4820_v60  ;;  %v4827_v0 = vrot.slane %v4826_v22, 2  ;;  %v4132_v51 = vcombine.high %v4130_v31, %v4130_v31  ;;  %v4944_v40 = vrot.slane %v4943_v41, 4 }
 0x3a0   : > { %v4809_v58 = vmax.f32 %v4807_v5, %v4808_v56  ;;  %v4815_v15 = vrot.slane %v4814_v53, 1  ;;  %v4950_v50 = vsel %vm4550_vm6, %v4131_v52, -inf  ;;  %v4957_v8 = vsel %vm4550_vm6, %v4130_v31, -inf }
 0x3a1   : > { %v4822_v45 = vrot.slane %v4821_v42, 1  ;;  %v4828_v27 = vmax.f32 %v4826_v22, %v4827_v0  ;;  %v4945_v7 = vmax.f32 %v4943_v41, %v4944_v40  ;;  %v4951_v38 = vrot.slane %v4950_v50, 4 }
 0x3a2   : > { %v4816_v35 = vmax.f32 %v4814_v53, %v4815_v15  ;;  %v5507_v37 = vsel %vm1518_vm12, %v4809_v58, -inf  ;;  %v4958_v62 = vrot.slane %v4957_v8, 4  ;;  %v4964_v6 = vsel %vm4550_vm6, %v4132_v51, -inf }
 0x3a3   : > { %v4823_v26 = vmax.f32 %v4821_v42, %v4822_v45  ;;  %v4829_v21 = vrot.slane %v4828_v27, 1  ;;  %v4946_v39 = vrot.slane %v4945_v7, 2  ;;  %v3826_v49 = vmax.f32 %v3736_v10, 0.0 }
 0x3a4   : > { %v8562_v33 = vsel %vm1518_vm12, %v4816_v35, -inf  ;;  %v4952_v14 = vmax.f32 %v4950_v50, %v4951_v38  ;;  %v4959_v43 = vmax.f32 %v4957_v8, %v4958_v62  ;;  %v4965_v36 = vrot.slane %v4964_v6, 4  ;;  %v3738_v8 = vpop.f32.mrf.mxu1 }
 0x3a5   : > { %v8565_v28 = vsel %vm1518_vm12, %v4872_v57, -inf  ;;  %v8568_v13 = vsel %vm1518_vm12, %v4879_v23, -inf  ;;  %v8571_v44 = vsel %vm1518_vm12, %v4886_v2, -inf  ;;  %v5509_v1 = vmax.f32 %v5507_v37, %v8546_v9 }
 0x3a6   : > { %v4947_v17 = vmax.f32 %v4945_v7, %v4946_v39  ;;  %v4953_v61 = vrot.slane %v4952_v14, 2  ;;  %v4960_v4 = vrot.slane %v4959_v43, 2  ;;  %v3747_v5 = vadd.f32 %v8554_v29, %v6312_v24 }
 0x3a7   : > { %v8575_v55 = vmax.f32 %v4828_v27, %v4829_v21  ;;  %v5512_v60 = vmax.f32 %v8562_v33, %v8565_v28  ;;  %v4966_v57 = vmax.f32 %v4964_v6, %v4965_v36  ;;  %v4082_v22 = vcombine.high %v3826_v49, %v3826_v49 }
 0x3a8   : > { %v8580_v23 = vsel %vm1518_vm12, %v4823_v26, -inf  ;;  %v4948_v31 = vrot.slane %v4947_v17, 1  ;;  %v4954_v2 = vmax.f32 %v4952_v14, %v4953_v61  ;;  %v4961_v52 = vmax.f32 %v4959_v43, %v4960_v4 }
 0x3a9   : > { %v8584_v9 = vsel %vm5709_vm5, %v5509_v1, %v8543_v59  ;;  %v4967_v56 = vrot.slane %v4966_v57, 2  ;;  %v4089_v53 = vrot.slane %v3826_v49, %v8333_v32  ;;  %v4096_v41 = vrot.slane %v4082_v22, %v8333_v32 }
 0x3aa   : > { %v4949_v10 = vmax.f32 %v4947_v17, %v4948_v31  ;;  %v4955_v42 = vrot.slane %v4954_v2, 1  ;;  %v4962_v0 = vrot.slane %v4961_v52, 1  ;;  %v3829_v51 = vmax.f32 %v3747_v5, 0.0 }
 0x3ab   : > { %v4968_v40 = vmax.f32 %v4966_v57, %v4967_v56  ;;  %v4097_v58 = vcombine.high %v4089_v53, %v4089_v53  ;;  %v4098_v15 = vcombine.high %v4096_v41, %v4096_v41  ;;  %v4887_v50 = vsel %vm4550_vm6, %v4089_v53, -inf }
 0x3ac   : > { %v4956_v59 = vmax.f32 %v4954_v2, %v4955_v42  ;;  %v4963_v27 = vmax.f32 %v4961_v52, %v4962_v0  ;;  %v4888_v7 = vrot.slane %v4887_v50, 4  ;;  %v4901_v37 = vsel %vm4550_vm6, %v4096_v41, -inf }
 0x3ad   : > { %v4969_v38 = vrot.slane %v4968_v40, 1  ;;  %v4894_v35 = vsel %vm4550_vm6, %v4097_v58, -inf  ;;  %v4908_v62 = vsel %vm4550_vm6, %v4098_v15, -inf  ;;  %v8595_v6 = vsel %vm1518_vm12, %v4949_v10, -inf }
 0x3ae   : > { %v4889_v26 = vmax.f32 %v4887_v50, %v4888_v7  ;;  %v4895_v21 = vrot.slane %v4894_v35, 4  ;;  %v3739_v39 = vadd.f32 %v8554_v29, %v3738_v8  ;;  %v5523_v49 = vsel %vm1518_vm12, %v4956_v59, -inf }
 0x3af   : > { %v4902_v24 = vrot.slane %v4901_v37, 4  ;;  %v4909_v14 = vrot.slane %v4908_v62, 4  ;;  %v4133_v43 = vcombine.high %v3829_v51, %v3829_v51  ;;  %v8600_v36 = vsel %vm1518_vm12, %v4963_v27, -inf }
 0x3b0   : > { %v4890_v1 = vrot.slane %v4889_v26, 2  ;;  %v4896_v17 = vmax.f32 %v4894_v35, %v4895_v21  ;;  %v4140_v61 = vrot.slane %v3829_v51, %v8333_v32  ;;  %v4970_v4 = vmax.f32 %v4968_v40, %v4969_v38 }
 0x3b1   : > { %v4903_v5 = vmax.f32 %v4901_v37, %v4902_v24  ;;  %v4910_v57 = vmax.f32 %v4908_v62, %v4909_v14  ;;  %v4147_v22 = vrot.slane %v4133_v43, %v8333_v32 }
 0x3b2   : > { %v4891_v31 = vmax.f32 %v4889_v26, %v4890_v1  ;;  %v4897_v2 = vrot.slane %v4896_v17, 2  ;;  %v4148_v52 = vcombine.high %v4140_v61, %v4140_v61  ;;  %v4971_v56 = vsel %vm4550_vm6, %v4140_v61, -inf }
 0x3b3   : > { %v4904_v53 = vrot.slane %v4903_v5, 2  ;;  %v4911_v41 = vrot.slane %v4910_v57, 2  ;;  %v4149_v10 = vcombine.high %v4147_v22, %v4147_v22  ;;  %v4972_v42 = vrot.slane %v4971_v56, 4 }
 0x3b4   : > { %v4892_v0 = vrot.slane %v4891_v31, 1  ;;  %v4898_v58 = vmax.f32 %v4896_v17, %v4897_v2  ;;  %v4978_v15 = vsel %vm4550_vm6, %v4148_v52, -inf  ;;  %v4985_v51 = vsel %vm4550_vm6, %v4147_v22, -inf }
 0x3b5   : > { %v4905_v40 = vmax.f32 %v4903_v5, %v4904_v53  ;;  %v4912_v50 = vmax.f32 %v4910_v57, %v4911_v41  ;;  %v4973_v8 = vmax.f32 %v4971_v56, %v4972_v42  ;;  %v4979_v59 = vrot.slane %v4978_v15, 4 }
 0x3b6   : > { %v4893_v27 = vmax.f32 %v4891_v31, %v4892_v0  ;;  %v4899_v7 = vrot.slane %v4898_v58, 1  ;;  %v4986_v38 = vrot.slane %v4985_v51, 4  ;;  %v4992_v35 = vsel %vm4550_vm6, %v4149_v10, -inf }
 0x3b7   : > { %v4906_v37 = vrot.slane %v4905_v40, 1  ;;  %v4913_v62 = vrot.slane %v4912_v50, 1  ;;  %v4974_v26 = vrot.slane %v4973_v8, 2  ;;  %v4980_v21 = vmax.f32 %v4978_v15, %v4979_v59 }
 0x3b8   : > { %v4900_v24 = vmax.f32 %v4898_v58, %v4899_v7  ;;  %v5519_v14 = vsel %vm1518_vm12, %v4893_v27, -inf  ;;  %v4987_v43 = vmax.f32 %v4985_v51, %v4986_v38  ;;  %v4993_v1 = vrot.slane %v4992_v35, 4 }
 0x3b9   : > { %v4907_v17 = vmax.f32 %v4905_v40, %v4906_v37  ;;  %v4914_v61 = vmax.f32 %v4912_v50, %v4913_v62  ;;  %v4975_v5 = vmax.f32 %v4973_v8, %v4974_v26  ;;  %v3827_v57 = vmax.f32 %v3739_v39, 0.0  ;;  %v6315_v8 = vpop.f32.mrf.mxu1 }
 0x3ba   : > { %v5522_v22 = vsel %vm1518_vm12, %v4900_v24, -inf  ;;  %v4981_v31 = vrot.slane %v4980_v21, 2  ;;  %v4988_v2 = vrot.slane %v4987_v43, 2  ;;  %v4994_v52 = vmax.f32 %v4992_v35, %v4993_v1 }
 0x3bb   : > { %v5521_v56 = vmax.f32 %v5519_v14, %v8595_v6  ;;  %v5524_v53 = vmax.f32 %v5522_v22, %v5523_v49  ;;  %v5525_v41 = vsel %vm1518_vm12, %v4907_v17, -inf  ;;  %v4976_v10 = vrot.slane %v4975_v5, 1 }
 0x3bc   : > { %v8614_v42 = vsel %vm1518_vm12, %v8575_v55, -inf  ;;  %v5527_v0 = vmax.f32 %v5525_v41, %v8600_v36  ;;  %v4982_v58 = vmax.f32 %v4980_v21, %v4981_v31  ;;  %v4989_v15 = vmax.f32 %v4987_v43, %v4988_v2  ;;  %v3751_v21 = vpop.f32.mrf.mxu1 }
 0x3bd   : > { %v5528_v39 = vsel %vm1518_vm12, %v4914_v61, -inf  ;;  %v5731_v51 = vsel %vm5703_vm11, %v5524_v53, %v5521_v56  ;;  %v4995_v40 = vrot.slane %v4994_v52, 2  ;;  %v4099_v50 = vcombine.high %v3827_v57, %v3827_v57 }
 0x3be   : > { %v8624_v6 = vsel %vm5711_vm7, %v5512_v60, %v8584_v9  ;;  %v4977_v55 = vmax.f32 %v4975_v5, %v4976_v10  ;;  %v4983_v49 = vrot.slane %v4982_v58, 1  ;;  %v4106_v36 = vrot.slane %v3827_v57, %v8333_v32 }
 0x3bf   : > { %v5529_v27 = vsel %vm1518_vm12, %v4970_v4, -inf  ;;  %v4990_v7 = vrot.slane %v4989_v15, 1  ;;  %v4113_v38 = vrot.slane %v4099_v50, %v8333_v32  ;;  %v5732_v37 = vsel %vm5705_vm8, %v5527_v0, %v5731_v51 }
 0x3c0   : > { %v5530_v35 = vmax.f32 %v5528_v39, %v5529_v27  ;;  %v4114_v62 = vcombine.high %v4106_v36, %v4106_v36  ;;  %v4915_v33 = vsel %vm4550_vm6, %v4106_v36, -inf  ;;  %v4996_v28 = vmax.f32 %v4994_v52, %v4995_v40  ;;  %v6316_v39 = vpop.f32.mrf.mxu1 }
 0x3c1   : > { %v4115_v60 = vcombine.high %v4113_v38, %v4113_v38  ;;  %v4916_v9 = vrot.slane %v4915_v33, 4  ;;  %v4929_v26 = vsel %vm4550_vm6, %v4113_v38, -inf  ;;  %v4984_v24 = vmax.f32 %v4982_v58, %v4983_v49 }
 0x3c2   : > { %v8635_v14 = vsel %vm1518_vm12, %v4977_v55, -inf  ;;  %v4922_v4 = vsel %vm4550_vm6, %v4114_v62, -inf  ;;  %v4930_v43 = vrot.slane %v4929_v26, 4  ;;  %v4991_v1 = vmax.f32 %v4989_v15, %v4990_v7 }
 0x3c3   : > { %v4917_v17 = vmax.f32 %v4915_v33, %v4916_v9  ;;  %v4923_v61 = vrot.slane %v4922_v4, 4  ;;  %v4936_v5 = vsel %vm4550_vm6, %v4115_v60, -inf  ;;  %v3760_v31 = vadd.f32 %v8554_v29, %v6315_v8 }
 0x3c4   : > { %v4931_v57 = vmax.f32 %v4929_v26, %v4930_v43  ;;  %v4937_v22 = vrot.slane %v4936_v5, 4  ;;  %v3752_v2 = vadd.f32 %v8554_v29, %v3751_v21  ;;  %v4997_v52 = vrot.slane %v4996_v28, 1 }
 0x3c5   : > { %v4918_v56 = vrot.slane %v4917_v17, 2  ;;  %v4924_v53 = vmax.f32 %v4922_v4, %v4923_v61  ;;  %v8642_v41 = vsel %vm5707_vm2, %v5530_v35, %v5732_v37  ;;  %v8645_v10 = vsel %vm1518_vm12, %v4984_v24, -inf }
 0x3c6   : > { %v4932_v0 = vrot.slane %v4931_v57, 2  ;;  %v4938_v58 = vmax.f32 %v4936_v5, %v4937_v22  ;;  %v3832_v15 = vmax.f32 %v3760_v31, 0.0  ;;  %v8648_v51 = vsel %vm1518_vm12, %v4991_v1, -inf  ;;  %v3754_v31 = vpop.f32.mrf.mxu1 }
 0x3c7   : > { %v4919_v40 = vmax.f32 %v4917_v17, %v4918_v56  ;;  %v4925_v50 = vrot.slane %v4924_v53, 2  ;;  %v3830_v8 = vmax.f32 %v3752_v2, 0.0  ;;  %v4998_v7 = vmax.f32 %v4996_v28, %v4997_v52 }
 0x3c8   : > { %v4933_v55 = vmax.f32 %v4931_v57, %v4932_v0  ;;  %v4939_v49 = vrot.slane %v4938_v58, 2  ;;  %v4184_v36 = vcombine.high %v3832_v15, %v3832_v15  ;;  %v4191_v27 = vrot.slane %v3832_v15, %v8333_v32 }
 0x3c9   : > { %v4920_v38 = vrot.slane %v4919_v40, 1  ;;  %v4926_v35 = vmax.f32 %v4924_v53, %v4925_v50  ;;  %v3763_v37 = vadd.f32 %v8554_v29, %v6316_v39  ;;  %v4150_v4 = vcombine.high %v3830_v8, %v3830_v8 }
 0x3ca   : > { %v4934_v62 = vrot.slane %v4933_v55, 1  ;;  %v4940_v33 = vmax.f32 %v4938_v58, %v4939_v49  ;;  %v4198_v60 = vrot.slane %v4184_v36, %v8333_v32  ;;  %v4199_v9 = vcombine.high %v4191_v27, %v4191_v27 }
 0x3cb   : > { %v4921_v26 = vmax.f32 %v4919_v40, %v4920_v38  ;;  %v4927_v21 = vrot.slane %v4926_v35, 1  ;;  %v5055_v24 = vsel %vm4550_vm6, %v4191_v27, -inf  ;;  %v8658_v2 = vsel %vm1518_vm12, %v4998_v7, -inf }
 0x3cc   : > { %v4935_v43 = vmax.f32 %v4933_v55, %v4934_v62  ;;  %v4941_v1 = vrot.slane %v4940_v33, 1  ;;  %v4200_v17 = vcombine.high %v4198_v60, %v4198_v60  ;;  %v5056_v61 = vrot.slane %v5055_v24, 4 }
 0x3cd   : > { %v4928_v5 = vmax.f32 %v4926_v35, %v4927_v21  ;;  %v5531_v28 = vsel %vm1518_vm12, %v4921_v26, -inf  ;;  %v5062_v57 = vsel %vm4550_vm6, %v4199_v9, -inf  ;;  %v5069_v22 = vsel %vm4550_vm6, %v4198_v60, -inf }
 0x3ce   : > { %v5057_v52 = vmax.f32 %v5055_v24, %v5056_v61  ;;  %v4157_v56 = vrot.slane %v3830_v8, %v8333_v32  ;;  %v3833_v53 = vmax.f32 %v3763_v37, 0.0  ;;  %v8662_v0 = vsel %vm1518_vm12, %v4935_v43, -inf }
 0x3cf   : > { %v5063_v58 = vrot.slane %v5062_v57, 4  ;;  %v5070_v15 = vrot.slane %v5069_v22, 4  ;;  %v4164_v39 = vrot.slane %v4150_v4, %v8333_v32  ;;  %v4942_v40 = vmax.f32 %v4940_v33, %v4941_v1 }
 0x3d0   : > { %v5533_v50 = vmax.f32 %v5531_v28, %v8635_v14  ;;  %v5058_v55 = vrot.slane %v5057_v52, 2  ;;  %v3755_v49 = vadd.f32 %v8554_v29, %v3754_v31  ;;  %v5534_v36 = vsel %vm1518_vm12, %v4928_v5, -inf }
 0x3d1   : > { %v5064_v27 = vmax.f32 %v5062_v57, %v5063_v58  ;;  %v5071_v7 = vmax.f32 %v5069_v22, %v5070_v15  ;;  %v5076_v8 = vsel %vm4550_vm6, %v4200_v17, -inf  ;;  %v4165_v62 = vcombine.high %v4157_v56, %v4157_v56 }
 0x3d2   : > { %v5059_v35 = vmax.f32 %v5057_v52, %v5058_v55  ;;  %v5077_v37 = vrot.slane %v5076_v8, 4  ;;  %v4166_v33 = vcombine.high %v4164_v39, %v4164_v39  ;;  %v4999_v14 = vsel %vm4550_vm6, %v4157_v56, -inf }
 0x3d3   : > { %v5065_v60 = vrot.slane %v5064_v27, 2  ;;  %v5072_v9 = vrot.slane %v5071_v7, 2  ;;  %v5536_v26 = vmax.f32 %v5534_v36, %v8645_v10  ;;  %v5000_v24 = vrot.slane %v4999_v14, 4 }
 0x3d4   : > { %v5078_v21 = vmax.f32 %v5076_v8, %v5077_v37  ;;  %v5006_v4 = vsel %vm4550_vm6, %v4165_v62, -inf  ;;  %v5013_v61 = vsel %vm4550_vm6, %v4164_v39, -inf  ;;  %v8676_v5 = vsel %vm1518_vm12, %v4942_v40, -inf }
 0x3d5   : > { %v5066_v43 = vmax.f32 %v5064_v27, %v5065_v60  ;;  %v5073_v1 = vmax.f32 %v5071_v7, %v5072_v9  ;;  %v5007_v17 = vrot.slane %v5006_v4, 4  ;;  %v5001_v57 = vmax.f32 %v4999_v14, %v5000_v24 }
 0x3d6   : > { %v5079_v28 = vrot.slane %v5078_v21, 2  ;;  %v5014_v22 = vrot.slane %v5013_v61, 4  ;;  %v5734_v31 = vsel %vm5709_vm5, %v5533_v50, %v8642_v41  ;;  %v5060_v52 = vrot.slane %v5059_v35, 1 }
 0x3d7   : > { %v5008_v10 = vmax.f32 %v5006_v4, %v5007_v17  ;;  %v5020_v56 = vsel %vm4550_vm6, %v4166_v33, -inf  ;;  %v5067_v58 = vrot.slane %v5066_v43, 1  ;;  %v5002_v55 = vrot.slane %v5001_v57, 2 }
 0x3d8   : > { %v5080_v15 = vmax.f32 %v5078_v21, %v5079_v28  ;;  %v5015_v36 = vmax.f32 %v5013_v61, %v5014_v22  ;;  %v5074_v27 = vrot.slane %v5073_v1, 1  ;;  %v5021_v7 = vrot.slane %v5020_v56, 4 }
 0x3d9   : > { %v5009_v40 = vrot.slane %v5008_v10, 2  ;;  %v5003_v37 = vmax.f32 %v5001_v57, %v5002_v55  ;;  %v4201_v60 = vcombine.high %v3833_v53, %v3833_v53  ;;  %v8684_v41 = vsel %vm5711_vm7, %v5536_v26, %v5734_v31 }
 0x3da   : > { %v5081_v8 = vrot.slane %v5080_v15, 1  ;;  %v5016_v62 = vrot.slane %v5015_v36, 2  ;;  %v5061_v50 = vmax.f32 %v5059_v35, %v5060_v52  ;;  %v5022_v33 = vmax.f32 %v5020_v56, %v5021_v7 }
 0x3db   : > { %v5010_v9 = vmax.f32 %v5008_v10, %v5009_v40  ;;  %v5068_v14 = vmax.f32 %v5066_v43, %v5067_v58  ;;  %v5004_v21 = vrot.slane %v5003_v37, 1  ;;  %v4208_v4 = vrot.slane %v3833_v53, %v8333_v32 }
 0x3dc   : > { %v5017_v24 = vmax.f32 %v5015_v36, %v5016_v62  ;;  %v5075_v17 = vmax.f32 %v5073_v1, %v5074_v27  ;;  %v5023_v28 = vrot.slane %v5022_v33, 2  ;;  %v4215_v22 = vrot.slane %v4201_v60, %v8333_v32 }
 0x3dd   : > { %v5011_v61 = vrot.slane %v5010_v9, 1  ;;  %v5082_v59 = vmax.f32 %v5080_v15, %v5081_v8  ;;  %v4216_v55 = vcombine.high %v4208_v4, %v4208_v4  ;;  %v3831_v19 = vmax.f32 %v3755_v49, 0.0 }
 0x3de   : > { %v5018_v57 = vrot.slane %v5017_v24, 1  ;;  %v5005_v39 = vmax.f32 %v5003_v37, %v5004_v21  ;;  %v5024_v31 = vmax.f32 %v5022_v33, %v5023_v28  ;;  %v5083_v35 = vsel %vm4550_vm6, %v4208_v4, -inf }
 0x3df   : > { %v5012_v26 = vmax.f32 %v5010_v9, %v5011_v61  ;;  %v4217_v43 = vcombine.high %v4215_v22, %v4215_v22  ;;  %v5084_v10 = vrot.slane %v5083_v35, 4  ;;  %v5090_v56 = vsel %vm4550_vm6, %v4216_v55, -inf }
 0x3e0   : > { %v5019_v52 = vmax.f32 %v5017_v24, %v5018_v57  ;;  %v5544_v53 = vsel %vm1518_vm12, %v5061_v50, -inf  ;;  %v5547_v1 = vsel %vm1518_vm12, %v5068_v14, -inf  ;;  %v5025_v58 = vrot.slane %v5024_v31, 1 }
 0x3e1   : > { %v5091_v36 = vrot.slane %v5090_v56, 4  ;;  %v5550_v15 = vsel %vm1518_vm12, %v5075_v17, -inf  ;;  %v5546_v49 = vsel %vm1518_vm12, %v5012_v26, -inf  ;;  %v5085_v27 = vmax.f32 %v5083_v35, %v5084_v10  ;;  %v6319_v10 = vpop.f32.mrf.mxu1 }
 0x3e2   : > { %v5097_v40 = vsel %vm4550_vm6, %v4215_v22, -inf  ;;  %v8696_v7 = vsel %vm1518_vm12, %v5082_v59, -inf  ;;  %v5543_v8 = vsel %vm1518_vm12, %v5005_v39, -inf  ;;  %v5549_v60 = vsel %vm1518_vm12, %v5019_v52, -inf }
 0x3e3   : > { %v5092_v37 = vmax.f32 %v5090_v56, %v5091_v36  ;;  %v5098_v62 = vrot.slane %v5097_v40, 4  ;;  %v5086_v50 = vrot.slane %v5085_v27, 2  ;;  %v5104_v9 = vsel %vm4550_vm6, %v4217_v43, -inf }
 0x3e4   : > { %v4167_v33 = vcombine.high %v3831_v19, %v3831_v19  ;;  %v5026_v14 = vmax.f32 %v5024_v31, %v5025_v58  ;;  %v5548_v21 = vmax.f32 %v5546_v49, %v5547_v1  ;;  %v5545_v17 = vmax.f32 %v5543_v8, %v5544_v53 }
 0x3e5   : > { %v5093_v24 = vrot.slane %v5092_v37, 2  ;;  %v5099_v4 = vmax.f32 %v5097_v40, %v5098_v62  ;;  %v5087_v61 = vmax.f32 %v5085_v27, %v5086_v50  ;;  %v5105_v28 = vrot.slane %v5104_v9, 4 }
 0x3e6   : > { %v4174_v59 = vrot.slane %v3831_v19, %v8333_v32  ;;  %v5551_v22 = vmax.f32 %v5549_v60, %v5550_v15  ;;  %v4181_v55 = vrot.slane %v4167_v33, %v8333_v32  ;;  %v8705_v31 = vsel %vm1518_vm12, %v5026_v14, -inf }
 0x3e7   : > { %v5094_v57 = vmax.f32 %v5092_v37, %v5093_v24  ;;  %v5100_v39 = vrot.slane %v5099_v4, 2  ;;  %v5088_v26 = vrot.slane %v5087_v61, 1  ;;  %v5106_v35 = vmax.f32 %v5104_v9, %v5105_v28  ;;  %v3767_v24 = vpop.f32.mrf.mxu1 }
 0x3e8   : > { %v4182_v52 = vcombine.high %v4174_v59, %v4174_v59  ;;  %v5027_v43 = vsel %vm4550_vm6, %v4174_v59, -inf  ;;  %v5738_v56 = vsel %vm5703_vm11, %v5548_v21, %v5545_v17  ;;  %v4183_v53 = vcombine.high %v4181_v55, %v4181_v55 }
 0x3e9   : > { %v5028_v1 = vrot.slane %v5027_v43, 4  ;;  %v5101_v58 = vmax.f32 %v5099_v4, %v5100_v39  ;;  %v5107_v19 = vrot.slane %v5106_v35, 2  ;;  %v5041_v15 = vsel %vm4550_vm6, %v4181_v55, -inf }
 0x3ea   : > { %v5034_v36 = vsel %vm4550_vm6, %v4182_v52, -inf  ;;  %v5095_v49 = vrot.slane %v5094_v57, 1  ;;  %v3776_v8 = vadd.f32 %v8554_v29, %v6319_v10  ;;  %v5089_v37 = vmax.f32 %v5087_v61, %v5088_v26 }
 0x3eb   : > { %v5029_v27 = vmax.f32 %v5027_v43, %v5028_v1  ;;  %v5035_v40 = vrot.slane %v5034_v36, 4  ;;  %v5108_v62 = vmax.f32 %v5106_v35, %v5107_v19  ;;  %v5042_v60 = vrot.slane %v5041_v15, 4 }
 0x3ec   : > { %v5048_v50 = vsel %vm4550_vm6, %v4183_v53, -inf  ;;  %v5554_v9 = vmax.f32 %v8705_v31, %v8696_v7  ;;  %v5739_v33 = vsel %vm5705_vm8, %v5551_v22, %v5738_v56  ;;  %v5102_v4 = vrot.slane %v5101_v58, 1 }
 0x3ed   : > { %v5030_v14 = vrot.slane %v5029_v27, 2  ;;  %v5036_v21 = vmax.f32 %v5034_v36, %v5035_v40  ;;  %v5109_v17 = vrot.slane %v5108_v62, 1  ;;  %v5043_v28 = vmax.f32 %v5041_v15, %v5042_v60 }
 0x3ee   : > { %v5049_v59 = vrot.slane %v5048_v50, 4  ;;  %v5096_v39 = vmax.f32 %v5094_v57, %v5095_v49  ;;  %v3836_v61 = vmax.f32 %v3776_v8, 0.0  ;;  %v8716_v26 = vsel %vm1518_vm12, %v5089_v37, -inf }
 0x3ef   : > { %v5031_v55 = vmax.f32 %v5029_v27, %v5030_v14  ;;  %v5037_v52 = vrot.slane %v5036_v21, 2  ;;  %v5044_v35 = vrot.slane %v5043_v28, 2  ;;  %v3768_v7 = vadd.f32 %v8554_v29, %v3767_v24 }
 0x3f0   : > { %v5050_v43 = vmax.f32 %v5048_v50, %v5049_v59  ;;  %v4252_v31 = vcombine.high %v3836_v61, %v3836_v61  ;;  %v4259_v56 = vrot.slane %v3836_v61, %v8333_v32  ;;  %v5103_v53 = vmax.f32 %v5101_v58, %v5102_v4 }
 0x3f1   : > { %v5032_v10 = vrot.slane %v5031_v55, 1  ;;  %v5038_v22 = vmax.f32 %v5036_v21, %v5037_v52  ;;  %v5110_v1 = vmax.f32 %v5108_v62, %v5109_v17  ;;  %v5045_v19 = vmax.f32 %v5043_v28, %v5044_v35 }
 0x3f2   : > { %v5051_v36 = vrot.slane %v5050_v43, 2  ;;  %v4266_v49 = vrot.slane %v4252_v31, %v8333_v32  ;;  %v4267_v27 = vcombine.high %v4259_v56, %v4259_v56  ;;  %v5167_v37 = vsel %vm4550_vm6, %v4259_v56, -inf }
 0x3f3   : > { %v5033_v57 = vmax.f32 %v5031_v55, %v5032_v10  ;;  %v5039_v15 = vrot.slane %v5038_v22, 1  ;;  %v5046_v40 = vrot.slane %v5045_v19, 1  ;;  %v3834_v60 = vmax.f32 %v3768_v7, 0.0 }
 0x3f4   : > { %v5052_v8 = vmax.f32 %v5050_v43, %v5051_v36  ;;  %v8723_v50 = vsel %vm1518_vm12, %v5096_v39, -inf  ;;  %v5168_v58 = vrot.slane %v5167_v37, 4  ;;  %v4268_v4 = vcombine.high %v4266_v49, %v4266_v49 }
 0x3f5   : > { %v5040_v14 = vmax.f32 %v5038_v22, %v5039_v15  ;;  %v5555_v21 = vsel %vm1518_vm12, %v5033_v57, -inf  ;;  %v5047_v62 = vmax.f32 %v5045_v19, %v5046_v40  ;;  %v5174_v17 = vsel %vm4550_vm6, %v4267_v27, -inf }
 0x3f6   : > { %v5053_v24 = vrot.slane %v5052_v8, 1  ;;  %v5169_v59 = vmax.f32 %v5167_v37, %v5168_v58  ;;  %v5175_v55 = vrot.slane %v5174_v17, 4  ;;  %v5181_v52 = vsel %vm4550_vm6, %v4266_v49, -inf }
 0x3f7   : > { %v8728_v28 = vsel %vm1518_vm12, %v5040_v14, -inf  ;;  %v8732_v61 = vsel %vm1518_vm12, %v5103_v53, -inf  ;;  %v8735_v39 = vsel %vm1518_vm12, %v5110_v1, -inf  ;;  %v5740_v35 = vsel %vm5707_vm2, %v5554_v9, %v5739_v33 }
 0x3f8   : > { %9118 = vst [vmem:[#allocation8_spill] sm:$0xff] %v8735_v39  ;;  %v4218_v43 = vcombine.high %v3834_v60, %v3834_v60  ;;  %v5557_v7 = vmax.f32 %v5555_v21, %v8716_v26  ;;  %v5170_v10 = vrot.slane %v5169_v59, 2  ;;  %v5176_v22 = vmax.f32 %v5174_v17, %v5175_v55 }
 0x3f9   : > { %v5182_v31 = vrot.slane %v5181_v52, 4  ;;  %v5054_v56 = vmax.f32 %v5052_v8, %v5053_v24  ;;  %v5560_v19 = vmax.f32 %v8728_v28, %v8723_v50  ;;  %v5188_v36 = vsel %vm4550_vm6, %v4268_v4, -inf  ;;  %v6320_v24 = vpop.f32.mrf.mxu1 }
 0x3fa   : > { %v4225_v53 = vrot.slane %v3834_v60, %v8333_v32  ;;  %v8744_v57 = vsel %vm1518_vm12, %v5047_v62, -inf  ;;  %v5171_v1 = vmax.f32 %v5169_v59, %v5170_v10  ;;  %v5177_v15 = vrot.slane %v5176_v22, 2 }
 0x3fb   : > { %v5183_v9 = vmax.f32 %v5181_v52, %v5182_v31  ;;  %v5189_v33 = vrot.slane %v5188_v36, 4  ;;  %v4232_v26 = vrot.slane %v4218_v43, %v8333_v32  ;;  %v8751_v4 = vsel %vm5709_vm5, %v5557_v7, %v5740_v35  ;;  %v3770_v35 = vpop.f32.mrf.mxu1 }
 0x3fc   : > { %v4233_v49 = vcombine.high %v4225_v53, %v4225_v53  ;;  %v5111_v27 = vsel %vm4550_vm6, %v4225_v53, -inf  ;;  %v5172_v40 = vrot.slane %v5171_v1, 1  ;;  %v5178_v8 = vmax.f32 %v5176_v22, %v5177_v15 }
 0x3fd   : > { %v5184_v37 = vrot.slane %v5183_v9, 2  ;;  %v5112_v14 = vrot.slane %v5111_v27, 4  ;;  %v5190_v21 = vmax.f32 %v5188_v36, %v5189_v33  ;;  %v4234_v58 = vcombine.high %v4232_v26, %v4232_v26 }
 0x3fe   : > { %v5118_v60 = vsel %vm4550_vm6, %v4233_v49, -inf  ;;  %v5125_v62 = vsel %vm4550_vm6, %v4232_v26, -inf  ;;  %v5179_v17 = vrot.slane %v5178_v8, 1  ;;  %v5173_v36 = vmax.f32 %v5171_v1, %v5172_v40 }
 0x3ff   : > { %v5185_v59 = vmax.f32 %v5183_v9, %v5184_v37  ;;  %v5113_v55 = vmax.f32 %v5111_v27, %v5112_v14  ;;  %v5191_v52 = vrot.slane %v5190_v21, 2  ;;  %v5119_v43 = vrot.slane %v5118_v60, 4 }
 0x400   : > { %v5126_v10 = vrot.slane %v5125_v62, 4  ;;  %v5132_v22 = vsel %vm4550_vm6, %v4234_v58, -inf  ;;  %v8757_v7 = vsel %vm1518_vm12, %v5054_v56, -inf  ;;  %v5180_v9 = vmax.f32 %v5178_v8, %v5179_v17 }
 0x401   : > { %v5186_v53 = vrot.slane %v5185_v59, 1  ;;  %v5114_v15 = vrot.slane %v5113_v55, 2  ;;  %v5192_v33 = vmax.f32 %v5190_v21, %v5191_v52  ;;  %v5120_v26 = vmax.f32 %v5118_v60, %v5119_v43  ;;  %9119 = vst [vmem:[#allocation9_spill] sm:$0xff] %v8757_v7 }
 0x402   : > { %v5127_v49 = vmax.f32 %v5125_v62, %v5126_v10  ;;  %v5133_v38 = vrot.slane %v5132_v22, 4  ;;  %v3779_v37 = vadd.f32 %v8554_v29, %v6320_v24  ;;  %v5568_v1 = vsel %vm1518_vm12, %v5173_v36, -inf }
 0x403   : > { %v5115_v27 = vmax.f32 %v5113_v55, %v5114_v15  ;;  %v5193_v14 = vrot.slane %v5192_v33, 1  ;;  %v5121_v58 = vrot.slane %v5120_v26, 2  ;;  %v3771_v21 = vadd.f32 %v8554_v29, %v3770_v35 }
 0x404   : > { %v5128_v45 = vrot.slane %v5127_v49, 2  ;;  %v5134_v47 = vmax.f32 %v5132_v22, %v5133_v38  ;;  %v3837_v31 = vmax.f32 %v3779_v37, 0.0  ;;  %v5187_v60 = vmax.f32 %v5185_v59, %v5186_v53 }
 0x405   : > { %v5116_v40 = vrot.slane %v5115_v27, 1  ;;  %v5122_v62 = vmax.f32 %v5120_v26, %v5121_v58  ;;  %v5571_v56 = vsel %vm1518_vm12, %v5180_v9, -inf  ;;  %v5194_v55 = vmax.f32 %v5192_v33, %v5193_v14 }
 0x406   : > { %v5129_v52 = vmax.f32 %v5127_v49, %v5128_v45  ;;  %v5135_v43 = vrot.slane %v5134_v47, 2  ;;  %v4269_v17 = vcombine.high %v3837_v31, %v3837_v31  ;;  %v4276_v24 = vrot.slane %v3837_v31, %v8333_v32 }
 0x407   : > { %v5117_v8 = vmax.f32 %v5115_v27, %v5116_v40  ;;  %v5123_v10 = vrot.slane %v5122_v62, 1  ;;  %v3835_v35 = vmax.f32 %v3771_v21, 0.0  ;;  %v5574_v40 = vsel %vm1518_vm12, %v5187_v60, -inf }
 0x408   : > { %v5130_v15 = vrot.slane %v5129_v52, 1  ;;  %v5136_v38 = vmax.f32 %v5134_v47, %v5135_v43  ;;  %v4283_v22 = vrot.slane %v4269_v17, %v8333_v32  ;;  %v4284_v36 = vcombine.high %v4276_v24, %v4276_v24 }
 0x409   : > { %v5195_v37 = vsel %vm4550_vm6, %v4276_v24, -inf  ;;  %v5124_v59 = vmax.f32 %v5122_v62, %v5123_v10  ;;  %v5567_v26 = vsel %vm1518_vm12, %v5117_v8, -inf  ;;  %v5577_v43 = vsel %vm1518_vm12, %v5194_v55, -inf }
 0x40a   : > { %v5131_v53 = vmax.f32 %v5129_v52, %v5130_v15  ;;  %v5137_v45 = vrot.slane %v5136_v38, 1  ;;  %v4285_v49 = vcombine.high %v4283_v22, %v4283_v22  ;;  %v5196_v9 = vrot.slane %v5195_v37, 4 }
 0x40b   : > { %v5202_v27 = vsel %vm4550_vm6, %v4284_v36, -inf  ;;  %v5209_v31 = vsel %vm4550_vm6, %v4283_v22, -inf  ;;  %v5570_v47 = vsel %vm1518_vm12, %v5124_v59, -inf  ;;  %v4235_v24 = vcombine.high %v3835_v35, %v3835_v35 }
 0x40c   : > { %v5138_v33 = vmax.f32 %v5136_v38, %v5137_v45  ;;  %v5573_v14 = vsel %vm1518_vm12, %v5131_v53, -inf  ;;  %v5203_v58 = vrot.slane %v5202_v27, 4  ;;  %v5572_v21 = vmax.f32 %v5570_v47, %v5571_v56 }
 0x40d   : > { %v5197_v62 = vmax.f32 %v5195_v37, %v5196_v9  ;;  %v5210_v52 = vrot.slane %v5209_v31, 4  ;;  %v5216_v17 = vsel %vm4550_vm6, %v4285_v49, -inf  ;;  %v5569_v10 = vmax.f32 %v5567_v26, %v5568_v1 }
 0x40e   : > { %v5204_v8 = vmax.f32 %v5202_v27, %v5203_v58  ;;  %v5575_v15 = vmax.f32 %v5573_v14, %v5574_v40  ;;  %v5576_v36 = vsel %vm1518_vm12, %v5138_v33, -inf  ;;  %v5217_v53 = vrot.slane %v5216_v17, 4  ;;  %v6323_v33 = vpop.f32.mrf.mxu1 }
 0x40f   : > { %v5198_v22 = vrot.slane %v5197_v62, 2  ;;  %v5211_v38 = vmax.f32 %v5209_v31, %v5210_v52  ;;  %v4242_v45 = vrot.slane %v3835_v35, %v8333_v32  ;;  %v5745_v60 = vsel %vm5703_vm11, %v5572_v21, %v5569_v10 }
 0x410   : > { %v5205_v59 = vrot.slane %v5204_v8, 2  ;;  %v4249_v55 = vrot.slane %v4235_v24, %v8333_v32  ;;  %v5218_v27 = vmax.f32 %v5216_v17, %v5217_v53  ;;  %v5578_v52 = vmax.f32 %v5576_v36, %v5577_v43 }
 0x411   : > { %v5199_v56 = vmax.f32 %v5197_v62, %v5198_v22  ;;  %v5212_v37 = vrot.slane %v5211_v38, 2  ;;  %v4250_v49 = vcombine.high %v4242_v45, %v4242_v45  ;;  %v5139_v1 = vsel %vm4550_vm6, %v4242_v45, -inf }
 0x412   : > { %v5206_v9 = vmax.f32 %v5204_v8, %v5205_v59  ;;  %v4251_v31 = vcombine.high %v4249_v55, %v4249_v55  ;;  %v5140_v14 = vrot.slane %v5139_v1, 4  ;;  %v5219_v40 = vrot.slane %v5218_v27, 2 }
 0x413   : > { %v5200_v26 = vrot.slane %v5199_v56, 1  ;;  %v5213_v47 = vmax.f32 %v5211_v38, %v5212_v37  ;;  %v5146_v35 = vsel %vm4550_vm6, %v4250_v49, -inf  ;;  %v5153_v21 = vsel %vm4550_vm6, %v4249_v55, -inf  ;;  %v3783_v55 = vpop.f32.mrf.mxu1 }
 0x414   : > { %v5207_v58 = vrot.slane %v5206_v9, 1  ;;  %v8786_v62 = vsel %vm5711_vm7, %v5560_v19, %v8751_v4  ;;  %v5141_v8 = vmax.f32 %v5139_v1, %v5140_v14  ;;  %v5147_v17 = vrot.slane %v5146_v35, 4 }
 0x415   : > { %v5746_v24 = vsel %vm5705_vm8, %v5575_v15, %v5745_v60  ;;  %v5220_v10 = vmax.f32 %v5218_v27, %v5219_v40  ;;  %v5154_v22 = vrot.slane %v5153_v21, 4  ;;  %v5160_v38 = vsel %vm4550_vm6, %v4251_v31, -inf }
 0x416   : > { %v5214_v53 = vrot.slane %v5213_v47, 1  ;;  %v5142_v45 = vrot.slane %v5141_v8, 2  ;;  %v5148_v37 = vmax.f32 %v5146_v35, %v5147_v17  ;;  %v5201_v50 = vmax.f32 %v5199_v56, %v5200_v26 }
 0x417   : > { %v5208_v28 = vmax.f32 %v5206_v9, %v5207_v58  ;;  %v5155_v19 = vmax.f32 %v5153_v21, %v5154_v22  ;;  %v5161_v4 = vrot.slane %v5160_v38, 4  ;;  %v8793_v49 = vsel %vm5707_vm2, %v5578_v52, %v5746_v24 }
 0x418   : > { %v5143_v43 = vmax.f32 %v5141_v8, %v5142_v45  ;;  %v5149_v36 = vrot.slane %v5148_v37, 2  ;;  %v3792_v15 = vadd.f32 %v8554_v29, %v6323_v33  ;;  %v5221_v60 = vrot.slane %v5220_v10, 1 }
 0x419   : > { %v5156_v27 = vrot.slane %v5155_v19, 2  ;;  %v5162_v1 = vmax.f32 %v5160_v38, %v5161_v4  ;;  %v3784_v31 = vadd.f32 %v8554_v29, %v3783_v55  ;;  %v5215_v14 = vmax.f32 %v5213_v47, %v5214_v53  ;;  %v6324_v55 = vpop.f32.mrf.mxu1 }
 0x41a   : > { %v5144_v40 = vrot.slane %v5143_v43, 1  ;;  %v5150_v35 = vmax.f32 %v5148_v37, %v5149_v36  ;;  %v3840_v17 = vmax.f32 %v3792_v15, 0.0  ;;  %v8798_v56 = vsel %vm1518_vm12, %v5201_v50, -inf }
 0x41b   : > { %v8801_v9 = vsel %vm1518_vm12, %v5208_v28, -inf  ;;  %v5157_v26 = vmax.f32 %v5155_v19, %v5156_v27  ;;  %v5163_v58 = vrot.slane %v5162_v1, 2  ;;  %v5222_v24 = vmax.f32 %v5220_v10, %v5221_v60 }
 0x41c   : > { %v5145_v21 = vmax.f32 %v5143_v43, %v5144_v40  ;;  %v5151_v52 = vrot.slane %v5150_v35, 1  ;;  %v4320_v33 = vcombine.high %v3840_v17, %v3840_v17  ;;  %v4327_v8 = vrot.slane %v3840_v17, %v8333_v32 }
 0x41d   : > { %v5158_v22 = vrot.slane %v5157_v26, 1  ;;  %v5164_v29 = vmax.f32 %v5162_v1, %v5163_v58  ;;  %v3838_v47 = vmax.f32 %v3784_v31, 0.0  ;;  %v8805_v38 = vsel %vm1518_vm12, %v5215_v14, -inf  ;;  %v8821_v31 = vld [vmem:[%s9082_s4] ss:$0 sm:$0xff] }
 0x41e   : > { %v5152_v53 = vmax.f32 %v5150_v35, %v5151_v52  ;;  %v4334_v45 = vrot.slane %v4320_v33, %v8333_v32  ;;  %v4335_v37 = vcombine.high %v4327_v8, %v4327_v8  ;;  %v5579_v19 = vsel %vm1518_vm12, %v5145_v21, -inf }
 0x41f   : > { %v5159_v50 = vmax.f32 %v5157_v26, %v5158_v22  ;;  %v5165_v28 = vrot.slane %v5164_v29, 1  ;;  %v5279_v4 = vsel %vm4550_vm6, %v4327_v8, -inf  ;;  %v8815_v60 = vsel %vm1518_vm12, %v5222_v24, -inf }
 0x420   : > { %v8811_v43 = vsel %vm1518_vm12, %v5152_v53, -inf  ;;  %v4336_v10 = vcombine.high %v4334_v45, %v4334_v45  ;;  %v5280_v36 = vrot.slane %v5279_v4, 4  ;;  %v5286_v15 = vsel %vm4550_vm6, %v4335_v37, -inf  ;;  %9120 = vst [vmem:[#allocation10_spill] sm:$0xff] %v8815_v60 }
 0x421   : > { %v4286_v27 = vcombine.high %v3838_v47, %v3838_v47  ;;  %v4293_v1 = vrot.slane %v3838_v47, %v8333_v32  ;;  %v3795_v14 = vadd.f32 %v8821_v31, %v6324_v55  ;;  %v5581_v40 = vmax.f32 %v5579_v19, %v8798_v56 }
 0x422   : > { %v5281_v35 = vmax.f32 %v5279_v4, %v5280_v36  ;;  %v5287_v17 = vrot.slane %v5286_v15, 4  ;;  %v5293_v26 = vsel %vm4550_vm6, %v4334_v45, -inf  ;;  %v5166_v58 = vmax.f32 %v5164_v29, %v5165_v28 }
 0x423   : > { %v5294_v52 = vrot.slane %v5293_v26, 4  ;;  %v5300_v33 = vsel %vm4550_vm6, %v4336_v10, -inf  ;;  %v8830_v8 = vsel %vm1518_vm12, %v5159_v50, -inf  ;;  %v4300_v56 = vrot.slane %v4286_v27, %v8333_v32 }
 0x424   : > { %v5282_v24 = vrot.slane %v5281_v35, 2  ;;  %v5288_v22 = vmax.f32 %v5286_v15, %v5287_v17  ;;  %v5301_v47 = vrot.slane %v5300_v33, 4  ;;  %v4301_v37 = vcombine.high %v4293_v1, %v4293_v1 }
 0x425   : > { %v5295_v53 = vmax.f32 %v5293_v26, %v5294_v52  ;;  %v5223_v55 = vsel %vm4550_vm6, %v4293_v1, -inf  ;;  %v4302_v36 = vcombine.high %v4300_v56, %v4300_v56  ;;  %v5237_v50 = vsel %vm4550_vm6, %v4300_v56, -inf }
 0x426   : > { %v5283_v45 = vmax.f32 %v5281_v35, %v5282_v24  ;;  %v5289_v29 = vrot.slane %v5288_v22, 2  ;;  %v5302_v28 = vmax.f32 %v5300_v33, %v5301_v47  ;;  %v5224_v19 = vrot.slane %v5223_v55, 4 }
 0x427   : > { %v5296_v4 = vrot.slane %v5295_v53, 2  ;;  %v5230_v10 = vsel %vm4550_vm6, %v4301_v37, -inf  ;;  %v5238_v27 = vrot.slane %v5237_v50, 4  ;;  %v5244_v25 = vsel %vm4550_vm6, %v4302_v36, -inf }
 0x428   : > { %v5284_v59 = vrot.slane %v5283_v45, 1  ;;  %v5290_v3 = vmax.f32 %v5288_v22, %v5289_v29  ;;  %v5303_v15 = vrot.slane %v5302_v28, 2  ;;  %v5225_v17 = vmax.f32 %v5223_v55, %v5224_v19 }
 0x429   : > { %v5297_v26 = vmax.f32 %v5295_v53, %v5296_v4  ;;  %v5231_v52 = vrot.slane %v5230_v10, 4  ;;  %v5239_v34 = vmax.f32 %v5237_v50, %v5238_v27  ;;  %v5245_v39 = vrot.slane %v5244_v25, 4  ;;  %v3786_v27 = vpop.f32.mrf.mxu1 }
 0x42a   : > { %v5285_v1 = vmax.f32 %v5283_v45, %v5284_v59  ;;  %v5291_v35 = vrot.slane %v5290_v3, 1  ;;  %v5304_v24 = vmax.f32 %v5302_v28, %v5303_v15  ;;  %v5226_v33 = vrot.slane %v5225_v17, 2 }
 0x42b   : > { %v5298_v47 = vrot.slane %v5297_v26, 1  ;;  %v5232_v21 = vmax.f32 %v5230_v10, %v5231_v52  ;;  %v5748_v22 = vsel %vm5709_vm5, %v5581_v40, %v8793_v49  ;;  %v5240_v19 = vrot.slane %v5239_v34, 2 }
 0x42c   : > { %v5305_v37 = vrot.slane %v5304_v24, 1  ;;  %v5227_v53 = vmax.f32 %v5225_v17, %v5226_v33  ;;  %v5292_v55 = vmax.f32 %v5290_v3, %v5291_v35  ;;  %v5246_v4 = vmax.f32 %v5244_v25, %v5245_v39 }
 0x42d   : > { %v5233_v29 = vrot.slane %v5232_v21, 2  ;;  %v8842_v59 = vsel %vm1518_vm12, %v5166_v58, -inf  ;;  %v5592_v45 = vsel %vm1518_vm12, %v5285_v1, -inf  ;;  %v3841_v36 = vmax.f32 %v3795_v14, 0.0 }
 0x42e   : > { %9121 = vst [vmem:[#allocation11_spill] sm:$0xff] %v8842_v59  ;;  %v5228_v28 = vrot.slane %v5227_v53, 1  ;;  %v5299_v10 = vmax.f32 %v5297_v26, %v5298_v47  ;;  %v5241_v15 = vmax.f32 %v5239_v34, %v5240_v19  ;;  %v5247_v52 = vrot.slane %v5246_v4, 2 }
 0x42f   : > { %v5234_v50 = vmax.f32 %v5232_v21, %v5233_v29  ;;  %v5306_v56 = vmax.f32 %v5304_v24, %v5305_v37  ;;  %v4337_v40 = vcombine.high %v3841_v36, %v3841_v36  ;;  %v4344_v3 = vrot.slane %v3841_v36, %v8333_v32 }
 0x430   : > { %v5229_v49 = vmax.f32 %v5227_v53, %v5228_v28  ;;  %v5595_v17 = vsel %vm1518_vm12, %v5292_v55, -inf  ;;  %v5242_v39 = vrot.slane %v5241_v15, 1  ;;  %v5248_v58 = vmax.f32 %v5246_v4, %v5247_v52 }
 0x431   : > { %v5235_v25 = vrot.slane %v5234_v50, 1  ;;  %v4351_v35 = vrot.slane %v4337_v40, %v8333_v32  ;;  %v4352_v1 = vcombine.high %v4344_v3, %v4344_v3  ;;  %v5307_v14 = vsel %vm4550_vm6, %v4344_v3, -inf }
 0x432   : > { %v3787_v21 = vadd.f32 %v8821_v31, %v3786_v27  ;;  %v5243_v26 = vmax.f32 %v5241_v15, %v5242_v39  ;;  %v5249_v33 = vrot.slane %v5248_v58, 1  ;;  %v5591_v24 = vsel %vm1518_vm12, %v5229_v49, -inf }
 0x433   : > { %v5236_v34 = vmax.f32 %v5234_v50, %v5235_v25  ;;  %v4353_v47 = vcombine.high %v4351_v35, %v4351_v35  ;;  %v5308_v37 = vrot.slane %v5307_v14, 4  ;;  %v5314_v53 = vsel %vm4550_vm6, %v4352_v1, -inf }
 0x434   : > { %v5321_v55 = vsel %vm4550_vm6, %v4351_v35, -inf  ;;  %v5250_v29 = vmax.f32 %v5248_v58, %v5249_v33  ;;  %v5597_v4 = vsel %vm1518_vm12, %v5243_v26, -inf  ;;  %v5315_v28 = vrot.slane %v5314_v53, 4 }
 0x435   : > { %v5594_v19 = vsel %vm1518_vm12, %v5236_v34, -inf  ;;  %v5598_v36 = vsel %vm1518_vm12, %v5299_v10, -inf  ;;  %v5309_v50 = vmax.f32 %v5307_v14, %v5308_v37  ;;  %v5322_v15 = vrot.slane %v5321_v55, 4 }
 0x436   : > { %v5596_v52 = vmax.f32 %v5594_v19, %v5595_v17  ;;  %v5593_v27 = vmax.f32 %v5591_v24, %v5592_v45  ;;  %v5316_v40 = vmax.f32 %v5314_v53, %v5315_v28  ;;  %v5328_v49 = vsel %vm4550_vm6, %v4353_v47, -inf }
 0x437   : > { %v3839_v3 = vmax.f32 %v3787_v21, 0.0  ;;  %v5599_v25 = vmax.f32 %v5597_v4, %v5598_v36  ;;  %v5600_v39 = vsel %vm1518_vm12, %v5250_v29, -inf  ;;  %v5310_v35 = vrot.slane %v5309_v50, 2 }
 0x438   : > { %v5323_v58 = vmax.f32 %v5321_v55, %v5322_v15  ;;  %v5752_v1 = vsel %vm5703_vm11, %v5596_v52, %v5593_v27  ;;  %v5317_v34 = vrot.slane %v5316_v40, 2  ;;  %v5329_v26 = vrot.slane %v5328_v49, 4  ;;  %v6327_v55 = vpop.f32.mrf.mxu1 }
 0x439   : > { %v4303_v33 = vcombine.high %v3839_v3, %v3839_v3  ;;  %v9122_v10 = vmax.f32 %v8811_v43, %v8801_v9  ;;  %v5311_v45 = vmax.f32 %v5309_v50, %v5310_v35  ;;  %v4310_v21 = vrot.slane %v3839_v3, %v8333_v32 }
 0x43a   : > { %v5324_v14 = vrot.slane %v5323_v58, 2  ;;  %v5601_v24 = vsel %vm1518_vm12, %v5306_v56, -inf  ;;  %v5318_v47 = vmax.f32 %v5316_v40, %v5317_v34  ;;  %v5330_v37 = vmax.f32 %v5328_v49, %v5329_v26 }
 0x43b   : > { %v8863_v17 = vsel %vm5711_vm7, %v9122_v10, %v5748_v22  ;;  %v4317_v53 = vrot.slane %v4303_v33, %v8333_v32  ;;  %v5602_v29 = vmax.f32 %v5600_v39, %v5601_v24  ;;  %v5753_v19 = vsel %vm5705_vm8, %v5599_v25, %v5752_v1  ;;  %v3799_v1 = vpop.f32.mrf.mxu1 }
 0x43c   : > { %v4318_v4 = vcombine.high %v4310_v21, %v4310_v21  ;;  %v5251_v9 = vsel %vm4550_vm6, %v4310_v21, -inf  ;;  %v5325_v43 = vmax.f32 %v5323_v58, %v5324_v14  ;;  %v5331_v22 = vrot.slane %v5330_v37, 2 }
 0x43d   : > { %v4319_v28 = vcombine.high %v4317_v53, %v4317_v53  ;;  %v5252_v36 = vrot.slane %v5251_v9, 4  ;;  %v5312_v52 = vrot.slane %v5311_v45, 1  ;;  %v5265_v56 = vsel %vm4550_vm6, %v4317_v53, -inf }
 0x43e   : > { %v5258_v50 = vsel %vm4550_vm6, %v4318_v4, -inf  ;;  %v3808_v15 = vadd.f32 %v8821_v31, %v6327_v55  ;;  %v5319_v27 = vrot.slane %v5318_v47, 1  ;;  %v5332_v40 = vmax.f32 %v5330_v37, %v5331_v22 }
 0x43f   : > { %v5253_v49 = vmax.f32 %v5251_v9, %v5252_v36  ;;  %v5259_v3 = vrot.slane %v5258_v50, 4  ;;  %v5266_v39 = vrot.slane %v5265_v56, 4  ;;  %v5272_v35 = vsel %vm4550_vm6, %v4319_v28, -inf }
 0x440   : > { %v8877_v58 = vsel %vm5707_vm2, %v5602_v29, %v5753_v19  ;;  %v5326_v34 = vrot.slane %v5325_v43, 1  ;;  %v5333_v26 = vrot.slane %v5332_v40, 1  ;;  %v5313_v14 = vmax.f32 %v5311_v45, %v5312_v52 }
 0x441   : > { %v5254_v33 = vrot.slane %v5253_v49, 2  ;;  %v5260_v10 = vmax.f32 %v5258_v50, %v5259_v3  ;;  %v5267_v21 = vmax.f32 %v5265_v56, %v5266_v39  ;;  %v5273_v24 = vrot.slane %v5272_v35, 4 }
 0x442   : > { %v3844_v37 = vmax.f32 %v3808_v15, 0.0  ;;  %v5320_v53 = vmax.f32 %v5318_v47, %v5319_v27  ;;  %v3800_v9 = vadd.f32 %v8821_v31, %v3799_v1  ;;  %v5327_v19 = vmax.f32 %v5325_v43, %v5326_v34 }
 0x443   : > { %v5255_v55 = vmax.f32 %v5253_v49, %v5254_v33  ;;  %v5261_v4 = vrot.slane %v5260_v10, 2  ;;  %v5268_v22 = vrot.slane %v5267_v21, 2  ;;  %v5274_v36 = vmax.f32 %v5272_v35, %v5273_v24 }
 0x444   : > { %v4388_v28 = vcombine.high %v3844_v37, %v3844_v37  ;;  %v4395_v29 = vrot.slane %v3844_v37, %v8333_v32  ;;  %v5334_v25 = vmax.f32 %v5332_v40, %v5333_v26  ;;  %v3842_v27 = vmax.f32 %v3800_v9, 0.0 }
 0x445   : > { %v5256_v60 = vrot.slane %v5255_v55, 1  ;;  %v5262_v59 = vmax.f32 %v5260_v10, %v5261_v4  ;;  %v5269_v7 = vmax.f32 %v5267_v21, %v5268_v22  ;;  %v5275_v50 = vrot.slane %v5274_v36, 2 }
 0x446   : > { %v4402_v45 = vrot.slane %v4388_v28, %v8333_v32  ;;  %v4403_v52 = vcombine.high %v4395_v29, %v4395_v29  ;;  %v5391_v15 = vsel %vm4550_vm6, %v4395_v29, -inf  ;;  %v5604_v1 = vsel %vm1518_vm12, %v5313_v14, -inf }
 0x447   : > { %v5257_v56 = vmax.f32 %v5255_v55, %v5256_v60  ;;  %v5263_v47 = vrot.slane %v5262_v59, 1  ;;  %v5270_v49 = vrot.slane %v5269_v7, 1  ;;  %v5276_v3 = vmax.f32 %v5274_v36, %v5275_v50 }
 0x448   : > { %v4404_v39 = vcombine.high %v4402_v45, %v4402_v45  ;;  %v5392_v35 = vrot.slane %v5391_v15, 4  ;;  %v5398_v40 = vsel %vm4550_vm6, %v4403_v52, -inf  ;;  %v5405_v34 = vsel %vm4550_vm6, %v4402_v45, -inf }
 0x449   : > { %v5264_v43 = vmax.f32 %v5262_v59, %v5263_v47  ;;  %v5271_v26 = vmax.f32 %v5269_v7, %v5270_v49  ;;  %v5277_v33 = vrot.slane %v5276_v3, 1  ;;  %v5603_v10 = vsel %vm1518_vm12, %v5257_v56, -inf }
 0x44a   : > { %v5393_v60 = vmax.f32 %v5391_v15, %v5392_v35  ;;  %v5399_v24 = vrot.slane %v5398_v40, 4  ;;  %v5406_v37 = vrot.slane %v5405_v34, 4  ;;  %v5412_v55 = vsel %vm4550_vm6, %v4404_v39, -inf }
 0x44b   : > { %v5606_v21 = vsel %vm1518_vm12, %v5264_v43, -inf  ;;  %v5607_v4 = vsel %vm1518_vm12, %v5320_v53, -inf  ;;  %v8891_v14 = vsel %vm1518_vm12, %v5327_v19, -inf  ;;  %v8894_v59 = vsel %vm1518_vm12, %v5334_v25, -inf }
 0x44c   : > { %v4354_v9 = vcombine.high %v3842_v27, %v3842_v27  ;;  %v5605_v7 = vmax.f32 %v5603_v10, %v5604_v1  ;;  %v5394_v22 = vrot.slane %v5393_v60, 2  ;;  %v5400_v36 = vmax.f32 %v5398_v40, %v5399_v24 }
 0x44d   : > { %v5407_v28 = vmax.f32 %v5405_v34, %v5406_v37  ;;  %v5278_v29 = vmax.f32 %v5276_v3, %v5277_v33  ;;  %v5608_v50 = vmax.f32 %v5606_v21, %v5607_v4  ;;  %v5413_v45 = vrot.slane %v5412_v55, 4  ;;  %v6328_v33 = vpop.f32.mrf.mxu1 }
 0x44e   : > { %v4361_v52 = vrot.slane %v3842_v27, %v8333_v32  ;;  %v8898_v56 = vsel %vm1518_vm12, %v5271_v26, -inf  ;;  %v5395_v53 = vmax.f32 %v5393_v60, %v5394_v22  ;;  %v5401_v47 = vrot.slane %v5400_v36, 2 }
 0x44f   : > { %v5408_v19 = vrot.slane %v5407_v28, 2  ;;  %v5414_v15 = vmax.f32 %v5412_v55, %v5413_v45  ;;  %v4368_v25 = vrot.slane %v4354_v9, %v8333_v32  ;;  %v5755_v10 = vsel %vm5709_vm5, %v5605_v7, %v8877_v58  ;;  %v3802_v7 = vpop.f32.mrf.mxu1 }
 0x450   : > { %v4369_v49 = vcombine.high %v4361_v52, %v4361_v52  ;;  %v5335_v39 = vsel %vm4550_vm6, %v4361_v52, -inf  ;;  %v5396_v35 = vrot.slane %v5395_v53, 1  ;;  %v5402_v1 = vmax.f32 %v5400_v36, %v5401_v47 }
 0x451   : > { %v5409_v43 = vmax.f32 %v5407_v28, %v5408_v19  ;;  %v5336_v3 = vrot.slane %v5335_v39, 4  ;;  %v5415_v40 = vrot.slane %v5414_v15, 2  ;;  %v4370_v34 = vcombine.high %v4368_v25, %v4368_v25 }
 0x452   : > { %v5342_v27 = vsel %vm4550_vm6, %v4369_v49, -inf  ;;  %v5349_v26 = vsel %vm4550_vm6, %v4368_v25, -inf  ;;  %v5403_v60 = vrot.slane %v5402_v1, 1  ;;  %v8910_v36 = vsel %vm1518_vm12, %v5278_v29, -inf }
 0x453   : > { %v5410_v21 = vrot.slane %v5409_v43, 1  ;;  %v5337_v24 = vmax.f32 %v5335_v39, %v5336_v3  ;;  %v5416_v37 = vmax.f32 %v5414_v15, %v5415_v40  ;;  %v5343_v55 = vrot.slane %v5342_v27, 4 }
 0x454   : > { %v5350_v4 = vrot.slane %v5349_v26, 4  ;;  %v5356_v9 = vsel %vm4550_vm6, %v4370_v34, -inf  ;;  %v5397_v28 = vmax.f32 %v5395_v53, %v5396_v35  ;;  %v5404_v52 = vmax.f32 %v5402_v1, %v5403_v60 }
 0x455   : > { %v5338_v45 = vrot.slane %v5337_v24, 2  ;;  %v5344_v47 = vmax.f32 %v5342_v27, %v5343_v55  ;;  %v5357_v58 = vrot.slane %v5356_v9, 4  ;;  %v8913_v25 = vsel %vm5711_vm7, %v5608_v50, %v5755_v10 }
 0x456   : > { %v5351_v19 = vmax.f32 %v5349_v26, %v5350_v4  ;;  %v5411_v15 = vmax.f32 %v5409_v43, %v5410_v21  ;;  %v3811_v39 = vadd.f32 %v8821_v31, %v6328_v33  ;;  %v5417_v3 = vrot.slane %v5416_v37, 1 }
 0x457   : > { %v5339_v49 = vmax.f32 %v5337_v24, %v5338_v45  ;;  %v5345_v40 = vrot.slane %v5344_v47, 2  ;;  %v5358_v22 = vmax.f32 %v5356_v9, %v5357_v58  ;;  %v5616_v29 = vsel %vm1518_vm12, %v5397_v28, -inf }
 0x458   : > { %v5352_v34 = vrot.slane %v5351_v19, 2  ;;  %v3845_v35 = vmax.f32 %v3811_v39, 0.0  ;;  %v3803_v1 = vadd.f32 %v8821_v31, %v3802_v7  ;;  %v5619_v27 = vsel %vm1518_vm12, %v5404_v52, -inf }
 0x459   : > { %v5340_v53 = vrot.slane %v5339_v49, 1  ;;  %v5346_v26 = vmax.f32 %v5344_v47, %v5345_v40  ;;  %v5359_v50 = vrot.slane %v5358_v22, 2  ;;  %v5622_v43 = vsel %vm1518_vm12, %v5411_v15, -inf }
 0x45a   : > { %v5353_v60 = vmax.f32 %v5351_v19, %v5352_v34  ;;  %v4405_v21 = vcombine.high %v3845_v35, %v3845_v35  ;;  %v4412_v33 = vrot.slane %v3845_v35, %v8333_v32  ;;  %v5418_v24 = vmax.f32 %v5416_v37, %v5417_v3 }
 0x45b   : > { %v5341_v10 = vmax.f32 %v5339_v49, %v5340_v53  ;;  %v5347_v55 = vrot.slane %v5346_v26, 1  ;;  %v5360_v9 = vmax.f32 %v5358_v22, %v5359_v50  ;;  %v3843_v58 = vmax.f32 %v3803_v1, 0.0 }
 0x45c   : > { %v5354_v4 = vrot.slane %v5353_v60, 1  ;;  %v4419_v28 = vrot.slane %v4405_v21, %v8333_v32  ;;  %v4420_v45 = vcombine.high %v4412_v33, %v4412_v33  ;;  %v5419_v31 = vsel %vm4550_vm6, %v4412_v33, -inf }
 0x45d   : > { %v5348_v52 = vmax.f32 %v5346_v26, %v5347_v55  ;;  %v5361_v19 = vrot.slane %v5360_v9, 1  ;;  %v5615_v7 = vsel %vm1518_vm12, %v5341_v10, -inf  ;;  %v5420_v49 = vrot.slane %v5419_v31, 4 }
 0x45e   : > { %v5355_v47 = vmax.f32 %v5353_v60, %v5354_v4  ;;  %v4421_v15 = vcombine.high %v4419_v28, %v4419_v28  ;;  %v5426_v39 = vsel %vm4550_vm6, %v4420_v45, -inf  ;;  %v5433_v37 = vsel %vm4550_vm6, %v4419_v28, -inf }
 0x45f   : > { %v5362_v3 = vmax.f32 %v5360_v9, %v5361_v19  ;;  %v5618_v22 = vsel %vm1518_vm12, %v5348_v52, -inf  ;;  %v5427_v34 = vrot.slane %v5426_v39, 4  ;;  %v5625_v53 = vsel %vm1518_vm12, %v5418_v24, -inf }
 0x460   : > { %v5621_v40 = vsel %vm1518_vm12, %v5355_v47, -inf  ;;  %v5620_v35 = vmax.f32 %v5618_v22, %v5619_v27  ;;  %v5421_v1 = vmax.f32 %v5419_v31, %v5420_v49  ;;  %v5434_v26 = vrot.slane %v5433_v37, 4 }
 0x461   : > { %v5624_v60 = vsel %vm1518_vm12, %v5362_v3, -inf  ;;  %v5428_v50 = vmax.f32 %v5426_v39, %v5427_v34  ;;  %v5440_v10 = vsel %vm4550_vm6, %v4421_v15, -inf  ;;  %v4371_v21 = vcombine.high %v3843_v58, %v3843_v58 }
 0x462   : > { %v5617_v33 = vmax.f32 %v5615_v7, %v5616_v29  ;;  %v5623_v55 = vmax.f32 %v5621_v40, %v5622_v43  ;;  %v5422_v4 = vrot.slane %v5421_v1, 2  ;;  %v5435_v9 = vmax.f32 %v5433_v37, %v5434_v26 }
 0x463   : > { %v5626_v28 = vmax.f32 %v5624_v60, %v5625_v53  ;;  %v5429_v45 = vrot.slane %v5428_v50, 2  ;;  %v5441_v52 = vrot.slane %v5440_v10, 4  ;;  %v4378_v47 = vrot.slane %v3843_v58, %v8333_v32 }
 0x464   : > { %v5759_v27 = vsel %vm5703_vm11, %v5620_v35, %v5617_v33  ;;  %v5423_v24 = vmax.f32 %v5421_v1, %v5422_v4  ;;  %v5436_v31 = vrot.slane %v5435_v9, 2  ;;  %v4385_v19 = vrot.slane %v4371_v21, %v8333_v32 }
 0x465   : > { %v5430_v49 = vmax.f32 %v5428_v50, %v5429_v45  ;;  %v5442_v39 = vmax.f32 %v5440_v10, %v5441_v52  ;;  %v4386_v3 = vcombine.high %v4378_v47, %v4378_v47  ;;  %v5363_v15 = vsel %vm4550_vm6, %v4378_v47, -inf }
 0x466   : > { %v5424_v29 = vrot.slane %v5423_v24, 1  ;;  %v5437_v43 = vmax.f32 %v5435_v9, %v5436_v31  ;;  %v4387_v7 = vcombine.high %v4385_v19, %v4385_v19  ;;  %v5364_v37 = vrot.slane %v5363_v15, 4 }
 0x467   : > { %v5431_v22 = vrot.slane %v5430_v49, 1  ;;  %v5443_v40 = vrot.slane %v5442_v39, 2  ;;  %v5370_v34 = vsel %vm4550_vm6, %v4386_v3, -inf  ;;  %v5377_v58 = vsel %vm4550_vm6, %v4385_v19, -inf }
 0x468   : > { %v5760_v53 = vsel %vm5705_vm8, %v5623_v55, %v5759_v27  ;;  %v5438_v35 = vrot.slane %v5437_v43, 1  ;;  %v5365_v1 = vmax.f32 %v5363_v15, %v5364_v37  ;;  %v5371_v26 = vrot.slane %v5370_v34, 4 }
 0x469   : > { %v5425_v60 = vmax.f32 %v5423_v24, %v5424_v29  ;;  %v5444_v50 = vmax.f32 %v5442_v39, %v5443_v40  ;;  %v5378_v10 = vrot.slane %v5377_v58, 4  ;;  %v5384_v21 = vsel %vm4550_vm6, %v4387_v7, -inf }
 0x46a   : > { %v5432_v33 = vmax.f32 %v5430_v49, %v5431_v22  ;;  %v5439_v4 = vmax.f32 %v5437_v43, %v5438_v35  ;;  %v5366_v9 = vrot.slane %v5365_v1, 2  ;;  %v5372_v45 = vmax.f32 %v5370_v34, %v5371_v26 }
 0x46b   : > { %v5614_v52 = vmax.f32 %v8910_v36, %v8894_v59  ;;  %v5379_v47 = vmax.f32 %v5377_v58, %v5378_v10  ;;  %v5385_v31 = vrot.slane %v5384_v21, 4  ;;  %v9123_v55 = vmax.f32 %v8412_v18, %v8402_v16 }
 0x46c   : > { %v5367_v24 = vmax.f32 %v5365_v1, %v5366_v9  ;;  %v5373_v19 = vrot.slane %v5372_v45, 2  ;;  %v5761_v39 = vsel %vm5707_vm2, %v5626_v28, %v5760_v53  ;;  %v5445_v49 = vrot.slane %v5444_v50, 1 }
 0x46d   : > { %v5714_v27 = vsel %vm5713_vm9, %v9123_v55, %v8456_v63  ;;  %v5628_v3 = vsel %vm1518_vm12, %v5425_v60, -inf  ;;  %v5380_v15 = vrot.slane %v5379_v47, 2  ;;  %v5386_v29 = vmax.f32 %v5384_v21, %v5385_v31 }
 0x46e   : > { %v5631_v59 = vsel %vm1518_vm12, %v5432_v33, -inf  ;;  %v5634_v36 = vsel %vm1518_vm12, %v5439_v4, -inf  ;;  %v5368_v43 = vrot.slane %v5367_v24, 1  ;;  %v5374_v7 = vmax.f32 %v5372_v45, %v5373_v19 }
 0x46f   : > { %v5381_v37 = vmax.f32 %v5379_v47, %v5380_v15  ;;  %v5387_v16 = vrot.slane %v5386_v29, 2  ;;  %v9124_v18 = vmax.f32 %v8426_v46, %v8405_v30  ;;  %v9125_v28 = vmax.f32 %v8493_v48, %v8482_v12  ;;  %v9135_v47 = vld [vmem:[#allocation8_spill] sm:$0xff] }
 0x470   : > { %v5369_v40 = vmax.f32 %v5367_v24, %v5368_v43  ;;  %v5375_v34 = vrot.slane %v5374_v7, 1  ;;  %v9126_v58 = vmax.f32 %v8580_v23, %v8568_v13  ;;  %v9127_v30 = vmax.f32 %v8662_v0, %v8648_v51 }
 0x471   : > { %v5716_v63 = vsel %vm5715_vm4, %v9124_v18, %v5714_v27  ;;  %v5722_v22 = vsel %vm5713_vm9, %v9125_v28, %v8537_v20  ;;  %v5446_v35 = vmax.f32 %v5444_v50, %v5445_v49  ;;  %v5382_v1 = vrot.slane %v5381_v37, 1  ;;  %v9137_v49 = vld [vmem:[#allocation11_spill] sm:$0xff] }
 0x472   : > { %v5729_v53 = vsel %vm5713_vm9, %v9126_v58, %v8624_v6  ;;  %v5736_v46 = vsel %vm5713_vm9, %v9127_v30, %v8684_v41  ;;  %v5388_v26 = vmax.f32 %v5386_v29, %v5387_v16  ;;  %v9128_v12 = vmax.f32 %v8676_v5, %v8658_v2  ;;  %v9140_v58 = vld [vmem:[#allocation7_spill] sm:$0xff] }
 0x473   : > { %v5376_v20 = vmax.f32 %v5374_v7, %v5375_v34  ;;  %v5627_v60 = vsel %vm1518_vm12, %v5369_v40, -inf  ;;  %v9129_v13 = vmax.f32 %v8507_v54, %v8485_v11  ;;  %v9130_v6 = vmax.f32 %v8898_v56, %v8891_v14 }
 0x474   : > { %v5737_v48 = vsel %vm5715_vm4, %v9128_v12, %v5736_v46  ;;  %v5383_v0 = vmax.f32 %v5381_v37, %v5382_v1  ;;  %v5389_v41 = vrot.slane %v5388_v26, 1  ;;  %v5629_v50 = vmax.f32 %v5627_v60, %v5628_v3 }
 0x475   : > { %v5723_v23 = vsel %vm5715_vm4, %v9129_v13, %v5722_v22  ;;  %v5757_v51 = vsel %vm5713_vm9, %v9130_v6, %v8913_v25  ;;  %v9131_v2 = vmax.f32 %v8614_v42, %v8571_v44  ;;  %v5630_v10 = vsel %vm1518_vm12, %v5376_v20, -inf }
 0x476   : > { %v9132_v11 = vmax.f32 %v8744_v57, %v8732_v61  ;;  %v5758_v14 = vsel %vm5715_vm4, %v5614_v52, %v5757_v51  ;;  %v5790_v56 = vcombine.low %v5723_v23, %v5737_v48  ;;  %v5390_v25 = vmax.f32 %v5388_v26, %v5389_v41  ;;  %v9134_v52 = vld [vmem:[#allocation9_spill] sm:$0xff] }
 0x477   : > { %v5730_v5 = vsel %vm5715_vm4, %v9131_v2, %v5729_v53  ;;  %v5632_v21 = vmax.f32 %v5630_v10, %v5631_v59  ;;  %v5633_v33 = vsel %vm1518_vm12, %v5383_v0, -inf  ;;  %v5762_v4 = vsel %vm5709_vm5, %v5629_v50, %v5761_v39 }
 0x478   : > { %v5743_v54 = vsel %vm5713_vm9, %v9132_v11, %v8786_v62  ;;  %v5637_v44 = vsel %vm1518_vm12, %v5446_v35, -inf  ;;  %v5635_v42 = vmax.f32 %v5633_v33, %v5634_v36  ;;  %v9133_v9 = vmax.f32 %v8830_v8, %v8805_v38  ;;  %v9138_v38 = vld [vmem:[#allocation10_spill] sm:$0xff] }
 0x479   : > { %v5774_v57 = vcombine.low %v5716_v63, %v5730_v5  ;;  %v5636_v62 = vsel %vm1518_vm12, %v5390_v25, -inf  ;;  %v5763_v45 = vsel %vm5711_vm7, %v5632_v21, %v5762_v4  ;;  %v9136_v31 = vmax.f32 %v9134_v52, %v9135_v47 }
 0x47a   : > { %v5750_v61 = vsel %vm5713_vm9, %v9133_v9, %v8863_v17  ;;  %v5638_v27 = vmax.f32 %v5636_v62, %v5637_v44  ;;  %v5764_v24 = vsel %vm5713_vm9, %v5635_v42, %v5763_v45  ;;  %v5798_v19 = vrot.slane %v5790_v56, %v8333_v32 }
 0x47b   : > { %v5744_v55 = vsel %vm5715_vm4, %v9136_v31, %v5743_v54  ;;  %v9139_v8 = vmax.f32 %v9137_v49, %v9138_v38  ;;  %v6559_v3 = vmov 1934713408   ;;  %v5791_v29 = vcombine.high %v5723_v23, %v5737_v48 }
 0x47c   : > { %v5806_v39 = vcombine.low %v5744_v55, %v5758_v14  ;;  %v5841_v15 = vunpack.c.l.s4 %v6559_v3  ;;  %v5765_v59 = vsel %vm5715_vm4, %v5638_v27, %v5764_v24  ;;  %v5782_v36 = vrot.slane %v5774_v57, %v8333_v32 }
 0x47d   : > { %v5751_v17 = vsel %vm5715_vm4, %v9139_v8, %v5750_v61  ;;  %v5775_v43 = vcombine.high %v5716_v63, %v5730_v5  ;;  %v5807_v7 = vcombine.high %v5744_v55, %v5758_v14  ;;  %v5805_v40 = vrot.slane %v5791_v29, %v8333_v32 }
 0x47e   : > { %v5822_v37 = vcombine.low %v5751_v17, %v5765_v59  ;;  %v5842_v16 = vunpack.c.0.s8 %v5841_v15  ;;  %v5823_v18 = vcombine.high %v5751_v17, %v5765_v59  ;;  %v5814_v28 = vrot.slane %v5806_v39, %v8333_v32 }
 0x47f   : > { %v5839_v22 = vcombine.high %v5782_v36, %v5798_v19  ;;  %v5838_v30 = vcombine.low %v5782_v36, %v5798_v19  ;;  %v5789_v35 = vrot.slane %v5775_v43, %v8333_v32  ;;  %v5821_v63 = vrot.slane %v5807_v7, %v8333_v32 }
 0x480   : > { %v5830_v34 = vrot.slane %v5822_v37, %v8333_v32  ;;  %v5845_v53 = vsub.s32 %v5842_v16, %v9140_v58  ;;  %v5837_v46 = vrot.slane %v5823_v18, %v8333_v32 }
 0x481   : > { %v5854_v12 = vcombine.low %v5789_v35, %v5805_v40  ;;  %v5855_v32 = vcombine.high %v5789_v35, %v5805_v40 }
 0x482   : > { %v5871_v1 = vcombine.high %v5814_v28, %v5830_v34  ;;  %v5870_v26 = vcombine.low %v5814_v28, %v5830_v34  ;;  %v5886_v48 = vcombine.low %v5821_v63, %v5837_v46  ;;  %v5853_v20 = vrot.slane %v5839_v22, %v5845_v53 }
 0x483   : > { %v5846_v13 = vrot.slane %v5838_v30, %v5845_v53  ;;  %v5887_v6 = vcombine.high %v5821_v63, %v5837_v46  ;;  %v5862_v2 = vrot.slane %v5854_v12, %v5845_v53  ;;  %v5869_v54 = vrot.slane %v5855_v32, %v5845_v53 }
 0x484   : > { %v5885_v60 = vrot.slane %v5871_v1, %v5845_v53  ;;  %v5878_v23 = vrot.slane %v5870_v26, %v5845_v53  ;;  %v5894_v41 = vrot.slane %v5886_v48, %v5845_v53 }
 0x485   : > { %v5901_v11 = vrot.slane %v5887_v6, %v5845_v53 }
 0x486   : > { %v5904_v51 = vcombine.low %v5853_v20, %v5885_v60  ;;  %v5903_v0 = vcombine.high %v5846_v13, %v5878_v23  ;;  %v5902_v50 = vcombine.low %v5846_v13, %v5878_v23  ;;  %v5906_v5 = vcombine.low %v5862_v2, %v5894_v41 }
 0x487   : > { %v5905_v10 = vcombine.high %v5853_v20, %v5885_v60  ;;  %v5908_v14 = vcombine.low %v5869_v54, %v5901_v11  ;;  %v5907_v56 = vcombine.high %v5862_v2, %v5894_v41  ;;  %v5909_v25 = vcombine.high %v5869_v54, %v5901_v11 }
 0x488   : > { %5915 = vrot.lane.b32.xlu1 %v5904_v51, %s6552_s16  ;;  %5911 = vrot.lane.b32.xlu0 %v5903_v0, %s6546_s10  ;;  %s215_s10 = sand.u32 1, %s6535_s19  }
 0x489   : > { %s6023_s16 = sshll.u32 %s215_s10, 3  ;;  %s5947_s26 = scalar_lea.sflag [#allocation5], %s215_s10 }
 0x48c   : > { %5923 = vrot.lane.b32.xlu1 %v5906_v5, %s6551_s15  ;;  %5919 = vrot.lane.b32.xlu0 %v5905_v10, %s6549_s13  ;;  %s6173_s13 = sshll.u32 %s6612_s22, 7  ;;  %s217_s15 = scalar_lea.vmem [#allocation4], %s6023_s16 }
 0x48d   : > { %s9041_s25 = scalar_lea.hbm %s9083_s5, %s6173_s13  ;;  %s6560_s22 = smov [#allocation4]  }
 0x48e   : > { %s6487_s14 = sshll.u32 %s6560_s22, 4  ;;  %s6488_s14 = int_to_ptr.vmem [resolvable:$false] %s6487_s14 }
 0x48f   : > { %s6489_s6 = scalar_lea.vmem %s6488_s14, 256 }
 0x490   : > { %5931 = vrot.lane.b32.xlu1 %v5908_v14, %s6554_s11  ;;  %5927 = vrot.lane.b32.xlu0 %v5907_v56, %s6555_s12  ;;  %s5960_s11 = sshll.u32 %s217_s15, 4  ;;  %s5961_s11 = int_to_ptr.vmem [resolvable:$true] %s5960_s11 }
 0x491   : > { %s6483_s30 = scalar_lea.vmem %s5961_s11, 128  ;;  %p6490_p0 = scmp.lt.s32.totalorder %s5961_s11, %s6488_s14 }
 0x492   : > { %p6484_p11 = scmp.ne.s32.totalorder %s5961_s11, %s6483_s30  ;;  %p6491_p1 = scmp.lt.s32.totalorder %s6489_s6, %s6483_s30 }
 0x494   : > { %5935 = vrot.lane.b32.xlu0 %v5909_v25, %s6557_s17  ;;  %p6485_p12 = pnand %p6484_p11, %p6629_p5  ;;  %p6492_p2 = por %p6491_p1, %p6490_p0 }
 0x496   : > { %p6486_p13 = pneg %p6485_p12 }
 0x498   : > { %p6493_p3 = pnand %p6492_p2, %p6486_p13 }
 0x4fa   : > { %v5916_v21 = vpop.permute.xlu1 %5915  ;;  %v5912_v33 = vpop.permute.xlu0 %5911 }
 0x4fb   : > { %v5938_v4 = vsel %vm1518_vm12, %v5902_v50, %v5912_v33 }
 0x4fc   : > { %v5939_v9 = vsel %vm1584_vm14, %v5938_v4, %v5916_v21 }
 0x4fe   : > { %v5924_v44 = vpop.permute.xlu1 %5923  ;;  %v5920_v42 = vpop.permute.xlu0 %5919 }
 0x4ff   : > { %v5940_v61 = vsel %vm1650_vm0, %v5939_v9, %v5920_v42 }
 0x500   : > { %v5941_v62 = vsel %vm1716_vm3, %v5940_v61, %v5924_v44 }
 0x502   : > { %v5928_v57 = vpop.permute.xlu0 %5927  ;;  %v5932_v45 = vpop.permute.xlu1 %5931 }
 0x503   : > { %v5942_v52 = vsel %vm3451_vm13, %v5941_v62, %v5928_v57 }
 0x504   : > { %v5943_v31 = vsel %vm3484_vm15, %v5942_v52, %v5932_v45 }
 0x506   : > { %v5936_v47 = vpop.permute.xlu0 %5935 }
 0x507   : > { %v5944_v55 = vsel %vm3517_vm1, %v5943_v31, %v5936_v47 }
 0x508   : > { %5945 = vst.msk [vmem:[%s217_s15] sm:$0xff] %vm3550_vm10, %v5944_v55 }
 0x509   : > { %6496 = shalt.err (!%p6493_p3)
}
 0x50a   : > { %s6497_s7 = scalar_lea.hbm %s9041_s25, 128  ;;  %s6501_s23 = scalar_lea.hbm %s9083_s5, 256 }
 0x50b   : > { %p6498_p4 = scmp.ne.s32.totalorder %s9041_s25, %s6497_s7  ;;  %p6502_p9 = scmp.lt.s32.totalorder %s9041_s25, %s9083_s5 }
 0x50c   : > { %p6503_p10 = scmp.lt.s32.totalorder %s6501_s23, %s6497_s7 }
 0x50d   : > { %p6499_p7 = pnand %p6498_p4, %p6629_p5 }
 0x50e   : > { %p6504_p11 = por %p6503_p10, %p6502_p9 }
 0x50f   : > { %p6500_p8 = pneg %p6499_p7 }
 0x511   : > { %p6505_p12 = pnand %p6504_p11, %p6500_p8 }
 0x513   : > { %6508 = shalt.err (!%p6505_p12)
}
 0x514   : > { %6331 = dma.vmem_to_hbm [thread:$0]  (%p6629_p5), %s5961_s11, 128, %s9041_s25, %s5947_s26  }
 0x515 PF: > { %p6337_p13 = scmp.ge.s32.totalorder %s6543_s21, 2  ;;  %s5972_s13 = sand.u32 1, %s6531_s18  }
 0x516   : > { %s5973_s15 = scalar_lea.sflag [#allocation5], %s5972_s13 }
 0x517   : > { %p6334_p0 = pnand %p6337_p13, %p6633_p6 }
 0x519   : > { %p6335_p1 = pneg %p6334_p0 }
 0x51b   : > { %6526 = dma.done.wait (%p6335_p1), %s5973_s15, 128  }
 0x51c   : > { %6528 = vsyncadd (%p6335_p1), %s5973_s15, 4294967168  ;;  %p15_p2 = scmp.ge.s32.totalorder %s6616_s24, 4   ;;  %s9141_s18 = smov %s6535_s19 }
 0x51d   : > { %s9142_s19 = smov %s6539_s20  ;;  %s9143_s20 = smov %s6627_s27 }
 0x51e   : > { %s9144_s21 = smov %s6616_s24  ;;  %17 = sbr.rel (!%p15_p2) target bundleno = 3 (0x3), region = 77 }
 0x523   :  { %5978 = vsyncpa [#allocation5], 1 }
 0x524   :  { %5980 = vsyncpa [#allocation5 + $0x1], 1 }

</bundles_post_ra>
